<compile_context>
chip_gen: v6e
topology: v6e:2x2x1
jax: 0.10.0
libtpu: 0.0.40
codegen_flags: <defaults>
</compile_context>

<pallas_src>
import math
from functools import partial

import jax
import jax.numpy as jnp
from jax.experimental import pallas as pl
from jax.experimental.pallas import tpu as pltpu


# ----------------------------------------------------------------------------
# pallas_call helpers
# ----------------------------------------------------------------------------
def _full_spec(shape):
    # Whole-array block, grid=() -> index_map takes no args; keep it in VMEM.
    return pl.BlockSpec(shape, lambda *_: (0,) * len(shape),
                        memory_space=pltpu.MemorySpace.VMEM)


# ----------------------------------------------------------------------------
# fused BigNode kernel: forward + on-device early-exit retry loop + fallback
# ----------------------------------------------------------------------------
def big_node_kernel(xh_ref, w_inh_ref, b_in_ref, b_h_ref,
                    w_sub1_ref, b_sub1_ref, w_sub2_ref, b_sub2_ref,
                    w_cl_ref, b_cl_ref,
                    w_qkv_ref, b_qkv_ref, w_gx_ref, w_ga_ref, b_g_ref,
                    ln_g_ref, ln_b_ref,
                    w_out_ref, b_out_ref, w_val_ref, b_val_ref,
                    o_ref,
                    mem_ref, done_ref,
                    *, input_dim, hidden_dim, num_coworkers, max_attempts):
    f32, bf16 = jnp.float32, jnp.bfloat16
    IN, H, NC = input_dim, hidden_dim, num_coworkers
    B = xh_ref.shape[0]
    inv_scale = 1.0 / math.sqrt(float(H))

    xh = xh_ref[...]                              # (B, IN+H) = cat([x, hidden])
    xh_b = xh.astype(bf16)
    w_inh = w_inh_ref[...]                        # (IN+H, H) bf16 = [w_in; w_h]
    b_in = b_in_ref[...]

    # x_proj + h_proj does not depend on the retry memory -> hoisted.
    base = (jnp.dot(xh_b, w_inh, preferred_element_type=f32)
            + b_in + b_h_ref[...])                                    # (B, H)

    done_ref[0] = jnp.int32(0)
    mem_ref[...] = jnp.zeros((B, H), f32)         # "central_memory" (starts empty)

    def attempt():
        combined_input = base + mem_ref[...]                          # (B, H)
        ci_b = combined_input.astype(bf16)

        # --- all 4 subworker stage-1 linears for BOTH coworkers: one matmul ---
        s1_all = jnp.tanh(
            jnp.dot(ci_b, w_sub1_ref[...], preferred_element_type=f32)
            + b_sub1_ref[...])                                        # (B, NC*8H)

        cos = []
        for c in range(NC):                                           # NC=2, unrolled
            s1 = s1_all[:, c * 8 * H:(c + 1) * 8 * H]                 # (B, 8H)
            # subworker output layers: block-diagonal (8H, 4H) -> cat(sub_out)
            sub = jnp.tanh(
                jnp.dot(s1.astype(bf16), w_sub2_ref[c],
                        preferred_element_type=f32) + b_sub2_ref[c])  # (B, 4H)
            # critical linear + single-step LSTM i,g,o gates (dead f-gate removed)
            cl = (jnp.dot(sub.astype(bf16), w_cl_ref[c],
                          preferred_element_type=f32) + b_cl_ref[c])  # (B, 4H)
            # full-vreg transcendentals once, then lane slices
            cl_sig = jax.nn.sigmoid(cl)
            cl_tanh = jnp.tanh(cl)
            critical = jnp.maximum(cl[:, 0:H], 0.0)
            i_g = cl_sig[:, H:2 * H]
            g_g = cl_tanh[:, 2 * H:3 * H]
            o_g = cl_sig[:, 3 * H:4 * H]
            pattern = o_g * jnp.tanh(i_g * g_g)        # c0 = 0 => c1 = i*g
            merged = critical + pattern
            m_b = merged.astype(bf16)
            # --- flash attention over the batch dim (faithful to 2-D torch) ---
            qkv = (jnp.dot(m_b, w_qkv_ref[c], preferred_element_type=f32)
                   + b_qkv_ref[c])                                    # (B, 3H)
            q, k, v = qkv[:, 0:H], qkv[:, H:2 * H], qkv[:, 2 * H:3 * H]
            s = jax.lax.dot_general(q.astype(bf16), k.astype(bf16),
                                    (((1,), (1,)), ((), ())),
                                    preferred_element_type=f32) * inv_scale
            s = s - jnp.max(s, axis=-1, keepdims=True)
            e = jnp.exp(s)
            attn = e * pl.reciprocal(jnp.sum(e, axis=-1, keepdims=True),
                                     approx=True)
            attn_out = jnp.dot(attn.astype(bf16), v.astype(bf16),
                               preferred_element_type=f32)            # (B, H)
            gate = jax.nn.sigmoid(
                jnp.dot(m_b, w_gx_ref[c], preferred_element_type=f32)
                + jnp.dot(attn_out.astype(bf16), w_ga_ref[c],
                          preferred_element_type=f32)
                + b_g_ref[c])
            ga = gate * attn_out
            # --- LayerNorm -----------------------------------------------------
            mu = jnp.mean(ga, axis=-1, keepdims=True)
            gc = ga - mu
            var = jnp.mean(gc * gc, axis=-1, keepdims=True)
            cos.append(gc * jax.lax.rsqrt(var + 1e-5) * ln_g_ref[c] + ln_b_ref[c])

        # BigNode output layer on lane-concatenated coworker outputs (one matmul)
        co_cat = jnp.concatenate(cos, axis=-1)                        # (B, NC*H)
        output = jnp.tanh(
            jnp.dot(co_cat.astype(bf16), w_out_ref[...],
                    preferred_element_type=f32) + b_out_ref[...])     # (B, H)
        valid = jax.nn.sigmoid(
            jnp.dot(output.astype(bf16), w_val_ref[...],
                    preferred_element_type=f32) + b_val_ref[...])     # (B, 1)
        return output, jnp.sum(valid)

    thresh = jnp.float32(0.5 * B)     # mean(valid) >= 0.5  <=>  sum(valid) >= 0.5*B

    # 1 initial attempt + up to 3 retries, statically unrolled; once validation
    # passes the remaining attempt bodies are skipped entirely (early exit).
    for _ in range(max_attempts):
        @pl.when(done_ref[0] == 0)
        def _attempt():
            output, vsum = attempt()
            o_ref[...] = output
            mem_ref[...] = output    # memory is written BEFORE validation, so a
                                     # failed attempt feeds the next one
            done_ref[0] = jnp.where(vsum >= thresh, jnp.int32(1), jnp.int32(0))

    # Every attempt failed -> fall back to input_proj(x). Computed only here.
    @pl.when(done_ref[0] == 0)
    def _fallback():
        o_ref[...] = (jnp.dot(xh_b[:, :IN], w_inh[:IN, :],
                              preferred_element_type=f32) + b_in)


# ----------------------------------------------------------------------------
# deterministic parameter initialization (PyTorch-style uniform fan-in bounds),
# packed into the fused / lane-dense layouts the kernel expects
# ----------------------------------------------------------------------------
def _init_linear(key, fan_in, fan_out):
    kw, kb = jax.random.split(key)
    bound = 1.0 / math.sqrt(fan_in)
    w = jax.random.uniform(kw, (fan_in, fan_out), jnp.float32, -bound, bound)
    b = jax.random.uniform(kb, (1, fan_out), jnp.float32, -bound, bound)
    return w, b


def _init_coworker(key, D, num_sub=4):
    nk = 3 * num_sub + 1 + 3 + 4
    ks = iter(jax.random.split(key, nk))

    sub1_w, sub1_b, sub2_blocks, sub2_b = [], [], [], []
    for _ in range(num_sub):
        wh, bh = _init_linear(next(ks), D, D)        # fc_hidden
        wx, bx = _init_linear(next(ks), D, D)        # fc_input
        wo, bo = _init_linear(next(ks), 2 * D, D)    # output_layer
        sub1_w += [wh, wx]
        sub1_b += [bh, bx]
        sub2_blocks.append(wo)
        sub2_b.append(bo)
    w_sub1 = jnp.concatenate(sub1_w, axis=1)         # (D, 8D)
    b_sub1 = jnp.concatenate(sub1_b, axis=1)         # (1, 8D)
    w_sub2 = jnp.zeros((2 * D * num_sub, D * num_sub), jnp.float32)
    for j, wo in enumerate(sub2_blocks):             # block-diagonal
        w_sub2 = w_sub2.at[j * 2 * D:(j + 1) * 2 * D, j * D:(j + 1) * D].set(wo)
    b_sub2 = jnp.concatenate(sub2_b, axis=1)         # (1, 4D)

    w_crit, b_crit = _init_linear(next(ks), D * num_sub, D)

    # single-step LSTM with zero (h0, c0): only W_ih / (b_ih + b_hh) matter;
    # the forget gate is dead (f * c0 == 0) and is not materialized.
    bound = 1.0 / math.sqrt(D)
    w_ih = jax.random.uniform(next(ks), (D * num_sub, 4 * D), jnp.float32,
                              -bound, bound)
    b_ih = jax.random.uniform(next(ks), (1, 4 * D), jnp.float32, -bound, bound)
    b_hh = jax.random.uniform(next(ks), (1, 4 * D), jnp.float32, -bound, bound)
    b_lstm = b_ih + b_hh
    w_i, w_g, w_o = w_ih[:, 0:D], w_ih[:, 2 * D:3 * D], w_ih[:, 3 * D:4 * D]
    b_i, b_gl, b_o = b_lstm[:, 0:D], b_lstm[:, 2 * D:3 * D], b_lstm[:, 3 * D:4 * D]

    w_cl = jnp.concatenate([w_crit, w_i, w_g, w_o], axis=1)    # (4D, 4D)
    b_cl = jnp.concatenate([b_crit, b_i, b_gl, b_o], axis=1)   # (1, 4D)

    wq, bq = _init_linear(next(ks), D, D)
    wk, bk = _init_linear(next(ks), D, D)
    wv, bv = _init_linear(next(ks), D, D)
    wg, bg = _init_linear(next(ks), 2 * D, D)
    w_qkv = jnp.concatenate([wq, wk, wv], axis=1)              # (D, 3D)
    b_qkv = jnp.concatenate([bq, bk, bv], axis=1)              # (1, 3D)

    return dict(w_sub1=w_sub1, b_sub1=b_sub1, w_sub2=w_sub2, b_sub2=b_sub2,
                w_cl=w_cl, b_cl=b_cl, w_qkv=w_qkv, b_qkv=b_qkv,
                w_gx=wg[:D], w_ga=wg[D:], b_g=bg,
                ln_g=jnp.ones((1, D), jnp.float32),
                ln_b=jnp.zeros((1, D), jnp.float32))


def _init_model(key, input_dim, hidden_dim, num_co_workers):
    ks = jax.random.split(key, num_co_workers + 4)
    w_in, b_in = _init_linear(ks[0], input_dim, hidden_dim)
    w_h, b_h = _init_linear(ks[1], hidden_dim, hidden_dim)
    cws = [_init_coworker(ks[2 + i], hidden_dim) for i in range(num_co_workers)]
    w_out, b_out = _init_linear(ks[2 + num_co_workers],
                                hidden_dim * num_co_workers, hidden_dim)
    w_val, b_val = _init_linear(ks[3 + num_co_workers], hidden_dim, 1)

    bf16 = jnp.bfloat16
    stack = lambda name: jnp.stack([cw[name] for cw in cws], axis=0)

    # NOTE: BigNode.flash_attn's own Q/K/V/gate linears never appear in the
    # forward graph (only its working-memory dict is used), so they are not
    # created.  Matmul weights are stored bf16 (MXU-native); biases stay f32.
    return dict(
        w_inh=jnp.concatenate([w_in, w_h], axis=0).astype(bf16),   # (IN+H, H)
        b_in=b_in, b_h=b_h,
        # stage-1 lane-fused across coworkers: (H, NC*8H)
        w_sub1=jnp.concatenate([cw["w_sub1"] for cw in cws], axis=1).astype(bf16),
        b_sub1=jnp.concatenate([cw["b_sub1"] for cw in cws], axis=1),
        w_sub2=stack("w_sub2").astype(bf16), b_sub2=stack("b_sub2"),
        w_cl=stack("w_cl").astype(bf16), b_cl=stack("b_cl"),
        w_qkv=stack("w_qkv").astype(bf16), b_qkv=stack("b_qkv"),
        w_gx=stack("w_gx").astype(bf16), w_ga=stack("w_ga").astype(bf16),
        b_g=stack("b_g"),
        ln_g=stack("ln_g"), ln_b=stack("ln_b"),
        w_out=w_out.astype(bf16),                                   # (NC*H, H)
        b_out=b_out,
        w_val=w_val.astype(bf16), b_val=b_val)


# ----------------------------------------------------------------------------
# forward (one jit, one pallas_call)
# ----------------------------------------------------------------------------
def _forward_impl(params, x, hidden_state):
    x = x.astype(jnp.float32)
    hidden_state = hidden_state.astype(jnp.float32)
    B = x.shape[0]
    H = params["b_in"].shape[1]
    IN = params["w_inh"].shape[0] - H
    NC = params["w_sub2"].shape[0]

    xh = jnp.concatenate([x, hidden_state], axis=-1)       # (B, IN+H)
    args = (xh,
            params["w_inh"], params["b_in"], params["b_h"],
            params["w_sub1"], params["b_sub1"], params["w_sub2"], params["b_sub2"],
            params["w_cl"], params["b_cl"],
            params["w_qkv"], params["b_qkv"],
            params["w_gx"], params["w_ga"], params["b_g"],
            params["ln_g"], params["ln_b"],
            params["w_out"], params["b_out"], params["w_val"], params["b_val"])

    out = pl.pallas_call(
        partial(big_node_kernel, input_dim=IN, hidden_dim=H,
                num_coworkers=NC, max_attempts=4),
        out_shape=jax.ShapeDtypeStruct((B, H), jnp.float32),
        in_specs=[_full_spec(a.shape) for a in args],
        out_specs=_full_spec((B, H)),
        scratch_shapes=[pltpu.VMEM((B, H), jnp.float32),    # retry working memory
                        pltpu.SMEM((1,), jnp.int32)],       # validation done flag
    )(*args)
    # Original module always ends up returning (output, output): success path
    # returns (output, output) and the fallback sets new_hidden = output.
    return out, out


class MemoryAugmentedNetworkPallas:
    memory_key = "central_memory"   # handled on-device (removed at end of forward)

    def __init__(self, input_dim, hidden_dim, num_co_workers=2, seed=0):
        self.input_dim = input_dim
        self.hidden_dim = hidden_dim
        self.num_co_workers = num_co_workers
        self.params = _init_model(jax.random.PRNGKey(seed),
                                  input_dim, hidden_dim, num_co_workers)
        self._fwd = jax.jit(_forward_impl)
        # TODO(synk): SubWorkerNode.update_hebbian_weights, the subworker
        # 'sub_i' working-memory writes and MemoryManager.consolidate_memory
        # mutate host-side state that never feeds this forward's output, so
        # they are omitted from the kernel.

    def __call__(self, x, hidden_state=None):
        B = x.shape[0]
        if hidden_state is None:
            hidden_state = jnp.zeros((B, self.hidden_dim), jnp.float32)
        return self._fwd(self.params, x, hidden_state)


if __name__ == "__main__":
    key = jax.random.PRNGKey(0)
    batch, input_dim, hidden_dim = 8, 16, 32
    x = jax.random.normal(key, (batch, input_dim), jnp.float32)

    model = MemoryAugmentedNetworkPallas(input_dim, hidden_dim, num_co_workers=2, seed=0)
    out, new_hidden = model(x)
    jax.block_until_ready((out, new_hidden))
    assert out.shape == (batch, hidden_dim)
    assert new_hidden.shape == (batch, hidden_dim)
    assert bool(jnp.all(jnp.isfinite(out)))
    assert bool(jnp.all(jnp.isfinite(new_hidden)))
    print("KERNEL_OK")
</pallas_src>

<mosaic_0001>
module attributes {stable_mosaic.version = 11 : i64} {
  func.func @big_node_kernel(%arg0: memref<8x48xf32, #tpu.memory_space<vmem>>, %arg1: memref<48x32xbf16, #tpu.memory_space<vmem>>, %arg2: memref<1x32xf32, #tpu.memory_space<vmem>>, %arg3: memref<1x32xf32, #tpu.memory_space<vmem>>, %arg4: memref<32x512xbf16, #tpu.memory_space<vmem>>, %arg5: memref<1x512xf32, #tpu.memory_space<vmem>>, %arg6: memref<2x256x128xbf16, #tpu.memory_space<vmem>>, %arg7: memref<2x1x128xf32, #tpu.memory_space<vmem>>, %arg8: memref<2x128x128xbf16, #tpu.memory_space<vmem>>, %arg9: memref<2x1x128xf32, #tpu.memory_space<vmem>>, %arg10: memref<2x32x96xbf16, #tpu.memory_space<vmem>>, %arg11: memref<2x1x96xf32, #tpu.memory_space<vmem>>, %arg12: memref<2x32x32xbf16, #tpu.memory_space<vmem>>, %arg13: memref<2x32x32xbf16, #tpu.memory_space<vmem>>, %arg14: memref<2x1x32xf32, #tpu.memory_space<vmem>>, %arg15: memref<2x1x32xf32, #tpu.memory_space<vmem>>, %arg16: memref<2x1x32xf32, #tpu.memory_space<vmem>>, %arg17: memref<64x32xbf16, #tpu.memory_space<vmem>>, %arg18: memref<1x32xf32, #tpu.memory_space<vmem>>, %arg19: memref<32x1xbf16, #tpu.memory_space<vmem>>, %arg20: memref<1x1xf32, #tpu.memory_space<vmem>>, %arg21: memref<8x32xf32, #tpu.memory_space<vmem>>, %arg22: memref<8x32xf32, #tpu.memory_space<vmem>>, %arg23: memref<1xi32, #tpu.memory_space<smem>>) attributes {dimension_semantics = [], scalar_prefetch = 0 : i64, scratch_operands = 2 : i64, tpu.core_type = #tpu.core_type<tc>} {
    %c0 = arith.constant 0 : index
    %c0_0 = arith.constant 0 : index
    %0 = vector.load %arg0[%c0, %c0_0] : memref<8x48xf32, #tpu.memory_space<vmem>>, vector<8x48xf32>
    %1 = arith.truncf %0 : vector<8x48xf32> to vector<8x48xbf16>
    %c0_1 = arith.constant 0 : index
    %c0_2 = arith.constant 0 : index
    %2 = vector.load %arg1[%c0_1, %c0_2] : memref<48x32xbf16, #tpu.memory_space<vmem>>, vector<48x32xbf16>
    %c0_3 = arith.constant 0 : index
    %c0_4 = arith.constant 0 : index
    %3 = vector.load %arg2[%c0_3, %c0_4] : memref<1x32xf32, #tpu.memory_space<vmem>>, vector<1x32xf32>
    %cst = arith.constant dense<0.000000e+00> : vector<8x32xf32>
    %4 = tpu.matmul %1, %2, %cst {dimension_numbers = #tpu.dot_dimension_numbers<[1], [0], [0], [1], [0, 0, 1, 1], [], []>} : vector<8x48xbf16>, vector<48x32xbf16>, vector<8x32xf32> -> vector<8x32xf32>
    %5 = vector.broadcast %3 : vector<1x32xf32> to vector<8x32xf32>
    %6 = arith.addf %4, %5 : vector<8x32xf32>
    %c0_5 = arith.constant 0 : index
    %c0_6 = arith.constant 0 : index
    %7 = vector.load %arg3[%c0_5, %c0_6] : memref<1x32xf32, #tpu.memory_space<vmem>>, vector<1x32xf32>
    %8 = vector.broadcast %7 : vector<1x32xf32> to vector<8x32xf32>
    %9 = arith.addf %6, %8 : vector<8x32xf32>
    %c0_i32 = arith.constant 0 : i32
    %c0_7 = arith.constant 0 : index
    %10 = memref.load %arg23[%c0_7] : memref<1xi32, #tpu.memory_space<smem>>
    memref.store %c0_i32, %arg23[%c0_7] : memref<1xi32, #tpu.memory_space<smem>>
    %cst_8 = arith.constant 0.000000e+00 : f32
    %11 = vector.broadcast %cst_8 : f32 to vector<8x32xf32>
    %c0_9 = arith.constant 0 : index
    %c0_10 = arith.constant 0 : index
    %12 = vector.load %arg22[%c0_9, %c0_10] : memref<8x32xf32, #tpu.memory_space<vmem>>, vector<8x32xf32>
    tpu.vector_store %arg22[%c0_9, %c0_10], %11 {strides = array<i32>} : memref<8x32xf32, #tpu.memory_space<vmem>>, vector<8x32xf32>,
    %c0_11 = arith.constant 0 : index
    %13 = memref.load %arg23[%c0_11] : memref<1xi32, #tpu.memory_space<smem>>
    %c0_i32_12 = arith.constant 0 : i32
    %14 = arith.cmpi eq, %13, %c0_i32_12 : i32
    %15 = arith.extui %14 : i1 to i32
    %cst_13 = arith.constant 4.000000e+00 : f32
    %c0_i32_14 = arith.constant 0 : i32
    %16 = arith.cmpi ne, %15, %c0_i32_14 : i32
    scf.if %16 {
      %c0_30 = arith.constant 0 : index
      %c0_31 = arith.constant 0 : index
      %33 = vector.load %arg22[%c0_30, %c0_31] : memref<8x32xf32, #tpu.memory_space<vmem>>, vector<8x32xf32>
      %34 = arith.addf %9, %33 : vector<8x32xf32>
      %35 = arith.truncf %34 : vector<8x32xf32> to vector<8x32xbf16>
      %c0_32 = arith.constant 0 : index
      %c0_33 = arith.constant 0 : index
      %36 = vector.load %arg4[%c0_32, %c0_33] : memref<32x512xbf16, #tpu.memory_space<vmem>>, vector<32x512xbf16>
      %cst_34 = arith.constant dense<0.000000e+00> : vector<8x512xf32>
      %37 = tpu.matmul %35, %36, %cst_34 {dimension_numbers = #tpu.dot_dimension_numbers<[1], [0], [0], [1], [0, 0, 1, 1], [], []>} : vector<8x32xbf16>, vector<32x512xbf16>, vector<8x512xf32> -> vector<8x512xf32>
      %c0_35 = arith.constant 0 : index
      %c0_36 = arith.constant 0 : index
      %38 = vector.load %arg5[%c0_35, %c0_36] : memref<1x512xf32, #tpu.memory_space<vmem>>, vector<1x512xf32>
      %39 = vector.broadcast %38 : vector<1x512xf32> to vector<8x512xf32>
      %40 = arith.addf %37, %39 : vector<8x512xf32>
      %41 = math.tanh %40 : vector<8x512xf32>
      %42 = vector.extract_strided_slice %41 {offsets = [0, 0], sizes = [8, 256], strides = [1, 1]} : vector<8x512xf32> to vector<8x256xf32>
      %43 = arith.truncf %42 : vector<8x256xf32> to vector<8x256xbf16>
      %c0_37 = arith.constant 0 : index
      %c0_38 = arith.constant 0 : index
      %c0_39 = arith.constant 0 : index
      %44 = vector.load %arg6[%c0_37, %c0_38, %c0_39] : memref<2x256x128xbf16, #tpu.memory_space<vmem>>, vector<1x256x128xbf16>
      %45 = vector.shape_cast %44 : vector<1x256x128xbf16> to vector<256x128xbf16>
      %cst_40 = arith.constant dense<0.000000e+00> : vector<8x128xf32>
      %46 = tpu.matmul %43, %45, %cst_40 {dimension_numbers = #tpu.dot_dimension_numbers<[1], [0], [0], [1], [0, 0, 1, 1], [], []>} : vector<8x256xbf16>, vector<256x128xbf16>, vector<8x128xf32> -> vector<8x128xf32>
      %c0_41 = arith.constant 0 : index
      %c0_42 = arith.constant 0 : index
      %c0_43 = arith.constant 0 : index
      %47 = vector.load %arg7[%c0_41, %c0_42, %c0_43] : memref<2x1x128xf32, #tpu.memory_space<vmem>>, vector<1x1x128xf32>
      %48 = vector.shape_cast %47 : vector<1x1x128xf32> to vector<1x128xf32>
      %49 = vector.broadcast %48 : vector<1x128xf32> to vector<8x128xf32>
      %50 = arith.addf %46, %49 : vector<8x128xf32>
      %51 = math.tanh %50 : vector<8x128xf32>
      %52 = arith.truncf %51 : vector<8x128xf32> to vector<8x128xbf16>
      %c0_44 = arith.constant 0 : index
      %c0_45 = arith.constant 0 : index
      %c0_46 = arith.constant 0 : index
      %53 = vector.load %arg8[%c0_44, %c0_45, %c0_46] : memref<2x128x128xbf16, #tpu.memory_space<vmem>>, vector<1x128x128xbf16>
      %54 = vector.shape_cast %53 : vector<1x128x128xbf16> to vector<128x128xbf16>
      %cst_47 = arith.constant dense<0.000000e+00> : vector<8x128xf32>
      %55 = tpu.matmul %52, %54, %cst_47 {dimension_numbers = #tpu.dot_dimension_numbers<[1], [0], [0], [1], [0, 0, 1, 1], [], []>} : vector<8x128xbf16>, vector<128x128xbf16>, vector<8x128xf32> -> vector<8x128xf32>
      %c0_48 = arith.constant 0 : index
      %c0_49 = arith.constant 0 : index
      %c0_50 = arith.constant 0 : index
      %56 = vector.load %arg9[%c0_48, %c0_49, %c0_50] : memref<2x1x128xf32, #tpu.memory_space<vmem>>, vector<1x1x128xf32>
      %57 = vector.shape_cast %56 : vector<1x1x128xf32> to vector<1x128xf32>
      %58 = vector.broadcast %57 : vector<1x128xf32> to vector<8x128xf32>
      %59 = arith.addf %55, %58 : vector<8x128xf32>
      %60 = arith.negf %59 : vector<8x128xf32>
      %61 = math.exp %60 : vector<8x128xf32>
      %cst_51 = arith.constant 1.000000e+00 : f32
      %62 = vector.broadcast %cst_51 : f32 to vector<8x128xf32>
      %63 = arith.addf %62, %61 : vector<8x128xf32>
      %64 = arith.divf %62, %63 : vector<8x128xf32>
      %65 = math.tanh %59 : vector<8x128xf32>
      %66 = vector.extract_strided_slice %59 {offsets = [0, 0], sizes = [8, 32], strides = [1, 1]} : vector<8x128xf32> to vector<8x32xf32>
      %cst_52 = arith.constant 0.000000e+00 : f32
      %67 = vector.broadcast %cst_52 : f32 to vector<8x32xf32>
      %68 = arith.maximumf %66, %67 : vector<8x32xf32>
      %69 = vector.extract_strided_slice %64 {offsets = [0, 32], sizes = [8, 32], strides = [1, 1]} : vector<8x128xf32> to vector<8x32xf32>
      %70 = vector.extract_strided_slice %65 {offsets = [0, 64], sizes = [8, 32], strides = [1, 1]} : vector<8x128xf32> to vector<8x32xf32>
      %71 = vector.extract_strided_slice %64 {offsets = [0, 96], sizes = [8, 32], strides = [1, 1]} : vector<8x128xf32> to vector<8x32xf32>
      %72 = arith.mulf %69, %70 : vector<8x32xf32>
      %73 = math.tanh %72 : vector<8x32xf32>
      %74 = arith.mulf %71, %73 : vector<8x32xf32>
      %75 = arith.addf %68, %74 : vector<8x32xf32>
      %76 = arith.truncf %75 : vector<8x32xf32> to vector<8x32xbf16>
      %c0_53 = arith.constant 0 : index
      %c0_54 = arith.constant 0 : index
      %c0_55 = arith.constant 0 : index
      %77 = vector.load %arg10[%c0_53, %c0_54, %c0_55] : memref<2x32x96xbf16, #tpu.memory_space<vmem>>, vector<1x32x96xbf16>
      %78 = vector.shape_cast %77 : vector<1x32x96xbf16> to vector<32x96xbf16>
      %cst_56 = arith.constant dense<0.000000e+00> : vector<8x96xf32>
      %79 = tpu.matmul %76, %78, %cst_56 {dimension_numbers = #tpu.dot_dimension_numbers<[1], [0], [0], [1], [0, 0, 1, 1], [], []>} : vector<8x32xbf16>, vector<32x96xbf16>, vector<8x96xf32> -> vector<8x96xf32>
      %c0_57 = arith.constant 0 : index
      %c0_58 = arith.constant 0 : index
      %c0_59 = arith.constant 0 : index
      %80 = vector.load %arg11[%c0_57, %c0_58, %c0_59] : memref<2x1x96xf32, #tpu.memory_space<vmem>>, vector<1x1x96xf32>
      %81 = vector.shape_cast %80 : vector<1x1x96xf32> to vector<1x96xf32>
      %82 = vector.broadcast %81 : vector<1x96xf32> to vector<8x96xf32>
      %83 = arith.addf %79, %82 : vector<8x96xf32>
      %84 = vector.extract_strided_slice %83 {offsets = [0, 0], sizes = [8, 32], strides = [1, 1]} : vector<8x96xf32> to vector<8x32xf32>
      %85 = vector.extract_strided_slice %83 {offsets = [0, 32], sizes = [8, 32], strides = [1, 1]} : vector<8x96xf32> to vector<8x32xf32>
      %86 = vector.extract_strided_slice %83 {offsets = [0, 64], sizes = [8, 32], strides = [1, 1]} : vector<8x96xf32> to vector<8x32xf32>
      %87 = arith.truncf %84 : vector<8x32xf32> to vector<8x32xbf16>
      %88 = arith.truncf %85 : vector<8x32xf32> to vector<8x32xbf16>
      %cst_60 = arith.constant dense<0.000000e+00> : vector<8x8xf32>
      %89 = tpu.matmul %87, %88, %cst_60 {dimension_numbers = #tpu.dot_dimension_numbers<[1], [1], [0], [0], [0, 0, 1, 0], [], []>} : vector<8x32xbf16>, vector<8x32xbf16>, vector<8x8xf32> -> vector<8x8xf32>
      %cst_61 = arith.constant 0.176776692 : f32
      %90 = vector.broadcast %cst_61 : f32 to vector<8x8xf32>
      %91 = arith.mulf %89, %90 : vector<8x8xf32>
      %cst_62 = arith.constant dense<0xFF800000> : vector<8xf32>
      %92 = vector.multi_reduction <maximumf>, %91, %cst_62 [1] : vector<8x8xf32> to vector<8xf32>
      %93 = vector.shape_cast %92 : vector<8xf32> to vector<8x1xf32>
      %94 = vector.broadcast %93 : vector<8x1xf32> to vector<8x8xf32>
      %95 = arith.subf %91, %94 : vector<8x8xf32>
      %96 = math.exp %95 : vector<8x8xf32>
      %cst_63 = arith.constant dense<0.000000e+00> : vector<8xf32>
      %97 = vector.multi_reduction <add>, %96, %cst_63 [1] : vector<8x8xf32> to vector<8xf32>
      %98 = vector.shape_cast %97 : vector<8xf32> to vector<8x1xf32>
      %99 = tpu.reciprocal %98 {approx = true} : vector<8x1xf32> -> vector<8x1xf32>
      %100 = vector.broadcast %99 : vector<8x1xf32> to vector<8x8xf32>
      %101 = arith.mulf %96, %100 : vector<8x8xf32>
      %102 = arith.truncf %101 : vector<8x8xf32> to vector<8x8xbf16>
      %103 = arith.truncf %86 : vector<8x32xf32> to vector<8x32xbf16>
      %cst_64 = arith.constant dense<0.000000e+00> : vector<8x32xf32>
      %104 = tpu.matmul %102, %103, %cst_64 {dimension_numbers = #tpu.dot_dimension_numbers<[1], [0], [0], [1], [0, 0, 1, 1], [], []>} : vector<8x8xbf16>, vector<8x32xbf16>, vector<8x32xf32> -> vector<8x32xf32>
      %c0_65 = arith.constant 0 : index
      %c0_66 = arith.constant 0 : index
      %c0_67 = arith.constant 0 : index
      %105 = vector.load %arg12[%c0_65, %c0_66, %c0_67] : memref<2x32x32xbf16, #tpu.memory_space<vmem>>, vector<1x32x32xbf16>
      %106 = vector.shape_cast %105 : vector<1x32x32xbf16> to vector<32x32xbf16>
      %cst_68 = arith.constant dense<0.000000e+00> : vector<8x32xf32>
      %107 = tpu.matmul %76, %106, %cst_68 {dimension_numbers = #tpu.dot_dimension_numbers<[1], [0], [0], [1], [0, 0, 1, 1], [], []>} : vector<8x32xbf16>, vector<32x32xbf16>, vector<8x32xf32> -> vector<8x32xf32>
      %108 = arith.truncf %104 : vector<8x32xf32> to vector<8x32xbf16>
      %c0_69 = arith.constant 0 : index
      %c0_70 = arith.constant 0 : index
      %c0_71 = arith.constant 0 : index
      %109 = vector.load %arg13[%c0_69, %c0_70, %c0_71] : memref<2x32x32xbf16, #tpu.memory_space<vmem>>, vector<1x32x32xbf16>
      %110 = vector.shape_cast %109 : vector<1x32x32xbf16> to vector<32x32xbf16>
      %cst_72 = arith.constant dense<0.000000e+00> : vector<8x32xf32>
      %111 = tpu.matmul %108, %110, %cst_72 {dimension_numbers = #tpu.dot_dimension_numbers<[1], [0], [0], [1], [0, 0, 1, 1], [], []>} : vector<8x32xbf16>, vector<32x32xbf16>, vector<8x32xf32> -> vector<8x32xf32>
      %112 = arith.addf %107, %111 : vector<8x32xf32>
      %c0_73 = arith.constant 0 : index
      %c0_74 = arith.constant 0 : index
      %c0_75 = arith.constant 0 : index
      %113 = vector.load %arg14[%c0_73, %c0_74, %c0_75] : memref<2x1x32xf32, #tpu.memory_space<vmem>>, vector<1x1x32xf32>
      %114 = vector.shape_cast %113 : vector<1x1x32xf32> to vector<1x32xf32>
      %115 = vector.broadcast %114 : vector<1x32xf32> to vector<8x32xf32>
      %116 = arith.addf %112, %115 : vector<8x32xf32>
      %117 = arith.negf %116 : vector<8x32xf32>
      %118 = math.exp %117 : vector<8x32xf32>
      %cst_76 = arith.constant 1.000000e+00 : f32
      %119 = vector.broadcast %cst_76 : f32 to vector<8x32xf32>
      %120 = arith.addf %119, %118 : vector<8x32xf32>
      %121 = arith.divf %119, %120 : vector<8x32xf32>
      %122 = arith.mulf %121, %104 : vector<8x32xf32>
      %cst_77 = arith.constant dense<0.000000e+00> : vector<8xf32>
      %123 = vector.multi_reduction <add>, %122, %cst_77 [1] : vector<8x32xf32> to vector<8xf32>
      %124 = vector.shape_cast %123 : vector<8xf32> to vector<8x1xf32>
      %cst_78 = arith.constant 3.200000e+01 : f32
      %125 = vector.broadcast %cst_78 : f32 to vector<8x1xf32>
      %126 = arith.divf %124, %125 : vector<8x1xf32>
      %127 = vector.broadcast %126 : vector<8x1xf32> to vector<8x32xf32>
      %128 = arith.subf %122, %127 : vector<8x32xf32>
      %129 = arith.mulf %128, %128 : vector<8x32xf32>
      %cst_79 = arith.constant dense<0.000000e+00> : vector<8xf32>
      %130 = vector.multi_reduction <add>, %129, %cst_79 [1] : vector<8x32xf32> to vector<8xf32>
      %131 = vector.shape_cast %130 : vector<8xf32> to vector<8x1xf32>
      %cst_80 = arith.constant 3.200000e+01 : f32
      %132 = vector.broadcast %cst_80 : f32 to vector<8x1xf32>
      %133 = arith.divf %131, %132 : vector<8x1xf32>
      %cst_81 = arith.constant 9.99999974E-6 : f32
      %134 = vector.broadcast %cst_81 : f32 to vector<8x1xf32>
      %135 = arith.addf %133, %134 : vector<8x1xf32>
      %136 = math.rsqrt %135 : vector<8x1xf32>
      %137 = vector.broadcast %136 : vector<8x1xf32> to vector<8x32xf32>
      %138 = arith.mulf %128, %137 : vector<8x32xf32>
      %c0_82 = arith.constant 0 : index
      %c0_83 = arith.constant 0 : index
      %c0_84 = arith.constant 0 : index
      %139 = vector.load %arg15[%c0_82, %c0_83, %c0_84] : memref<2x1x32xf32, #tpu.memory_space<vmem>>, vector<1x1x32xf32>
      %140 = vector.shape_cast %139 : vector<1x1x32xf32> to vector<1x32xf32>
      %141 = vector.broadcast %140 : vector<1x32xf32> to vector<8x32xf32>
      %142 = arith.mulf %138, %141 : vector<8x32xf32>
      %c0_85 = arith.constant 0 : index
      %c0_86 = arith.constant 0 : index
      %c0_87 = arith.constant 0 : index
      %143 = vector.load %arg16[%c0_85, %c0_86, %c0_87] : memref<2x1x32xf32, #tpu.memory_space<vmem>>, vector<1x1x32xf32>
      %144 = vector.shape_cast %143 : vector<1x1x32xf32> to vector<1x32xf32>
      %145 = vector.broadcast %144 : vector<1x32xf32> to vector<8x32xf32>
      %146 = arith.addf %142, %145 : vector<8x32xf32>
      %147 = vector.extract_strided_slice %41 {offsets = [0, 256], sizes = [8, 256], strides = [1, 1]} : vector<8x512xf32> to vector<8x256xf32>
      %148 = arith.truncf %147 : vector<8x256xf32> to vector<8x256xbf16>
      %c1 = arith.constant 1 : index
      %c0_88 = arith.constant 0 : index
      %c0_89 = arith.constant 0 : index
      %149 = vector.load %arg6[%c1, %c0_88, %c0_89] : memref<2x256x128xbf16, #tpu.memory_space<vmem>>, vector<1x256x128xbf16>
      %150 = vector.shape_cast %149 : vector<1x256x128xbf16> to vector<256x128xbf16>
      %cst_90 = arith.constant dense<0.000000e+00> : vector<8x128xf32>
      %151 = tpu.matmul %148, %150, %cst_90 {dimension_numbers = #tpu.dot_dimension_numbers<[1], [0], [0], [1], [0, 0, 1, 1], [], []>} : vector<8x256xbf16>, vector<256x128xbf16>, vector<8x128xf32> -> vector<8x128xf32>
      %c1_91 = arith.constant 1 : index
      %c0_92 = arith.constant 0 : index
      %c0_93 = arith.constant 0 : index
      %152 = vector.load %arg7[%c1_91, %c0_92, %c0_93] : memref<2x1x128xf32, #tpu.memory_space<vmem>>, vector<1x1x128xf32>
      %153 = vector.shape_cast %152 : vector<1x1x128xf32> to vector<1x128xf32>
      %154 = vector.broadcast %153 : vector<1x128xf32> to vector<8x128xf32>
      %155 = arith.addf %151, %154 : vector<8x128xf32>
      %156 = math.tanh %155 : vector<8x128xf32>
      %157 = arith.truncf %156 : vector<8x128xf32> to vector<8x128xbf16>
      %c1_94 = arith.constant 1 : index
      %c0_95 = arith.constant 0 : index
      %c0_96 = arith.constant 0 : index
      %158 = vector.load %arg8[%c1_94, %c0_95, %c0_96] : memref<2x128x128xbf16, #tpu.memory_space<vmem>>, vector<1x128x128xbf16>
      %159 = vector.shape_cast %158 : vector<1x128x128xbf16> to vector<128x128xbf16>
      %cst_97 = arith.constant dense<0.000000e+00> : vector<8x128xf32>
      %160 = tpu.matmul %157, %159, %cst_97 {dimension_numbers = #tpu.dot_dimension_numbers<[1], [0], [0], [1], [0, 0, 1, 1], [], []>} : vector<8x128xbf16>, vector<128x128xbf16>, vector<8x128xf32> -> vector<8x128xf32>
      %c1_98 = arith.constant 1 : index
      %c0_99 = arith.constant 0 : index
      %c0_100 = arith.constant 0 : index
      %161 = vector.load %arg9[%c1_98, %c0_99, %c0_100] : memref<2x1x128xf32, #tpu.memory_space<vmem>>, vector<1x1x128xf32>
      %162 = vector.shape_cast %161 : vector<1x1x128xf32> to vector<1x128xf32>
      %163 = vector.broadcast %162 : vector<1x128xf32> to vector<8x128xf32>
      %164 = arith.addf %160, %163 : vector<8x128xf32>
      %165 = arith.negf %164 : vector<8x128xf32>
      %166 = math.exp %165 : vector<8x128xf32>
      %cst_101 = arith.constant 1.000000e+00 : f32
      %167 = vector.broadcast %cst_101 : f32 to vector<8x128xf32>
      %168 = arith.addf %167, %166 : vector<8x128xf32>
      %169 = arith.divf %167, %168 : vector<8x128xf32>
      %170 = math.tanh %164 : vector<8x128xf32>
      %171 = vector.extract_strided_slice %164 {offsets = [0, 0], sizes = [8, 32], strides = [1, 1]} : vector<8x128xf32> to vector<8x32xf32>
      %cst_102 = arith.constant 0.000000e+00 : f32
      %172 = vector.broadcast %cst_102 : f32 to vector<8x32xf32>
      %173 = arith.maximumf %171, %172 : vector<8x32xf32>
      %174 = vector.extract_strided_slice %169 {offsets = [0, 32], sizes = [8, 32], strides = [1, 1]} : vector<8x128xf32> to vector<8x32xf32>
      %175 = vector.extract_strided_slice %170 {offsets = [0, 64], sizes = [8, 32], strides = [1, 1]} : vector<8x128xf32> to vector<8x32xf32>
      %176 = vector.extract_strided_slice %169 {offsets = [0, 96], sizes = [8, 32], strides = [1, 1]} : vector<8x128xf32> to vector<8x32xf32>
      %177 = arith.mulf %174, %175 : vector<8x32xf32>
      %178 = math.tanh %177 : vector<8x32xf32>
      %179 = arith.mulf %176, %178 : vector<8x32xf32>
      %180 = arith.addf %173, %179 : vector<8x32xf32>
      %181 = arith.truncf %180 : vector<8x32xf32> to vector<8x32xbf16>
      %c1_103 = arith.constant 1 : index
      %c0_104 = arith.constant 0 : index
      %c0_105 = arith.constant 0 : index
      %182 = vector.load %arg10[%c1_103, %c0_104, %c0_105] : memref<2x32x96xbf16, #tpu.memory_space<vmem>>, vector<1x32x96xbf16>
      %183 = vector.shape_cast %182 : vector<1x32x96xbf16> to vector<32x96xbf16>
      %cst_106 = arith.constant dense<0.000000e+00> : vector<8x96xf32>
      %184 = tpu.matmul %181, %183, %cst_106 {dimension_numbers = #tpu.dot_dimension_numbers<[1], [0], [0], [1], [0, 0, 1, 1], [], []>} : vector<8x32xbf16>, vector<32x96xbf16>, vector<8x96xf32> -> vector<8x96xf32>
      %c1_107 = arith.constant 1 : index
      %c0_108 = arith.constant 0 : index
      %c0_109 = arith.constant 0 : index
      %185 = vector.load %arg11[%c1_107, %c0_108, %c0_109] : memref<2x1x96xf32, #tpu.memory_space<vmem>>, vector<1x1x96xf32>
      %186 = vector.shape_cast %185 : vector<1x1x96xf32> to vector<1x96xf32>
      %187 = vector.broadcast %186 : vector<1x96xf32> to vector<8x96xf32>
      %188 = arith.addf %184, %187 : vector<8x96xf32>
      %189 = vector.extract_strided_slice %188 {offsets = [0, 0], sizes = [8, 32], strides = [1, 1]} : vector<8x96xf32> to vector<8x32xf32>
      %190 = vector.extract_strided_slice %188 {offsets = [0, 32], sizes = [8, 32], strides = [1, 1]} : vector<8x96xf32> to vector<8x32xf32>
      %191 = vector.extract_strided_slice %188 {offsets = [0, 64], sizes = [8, 32], strides = [1, 1]} : vector<8x96xf32> to vector<8x32xf32>
      %192 = arith.truncf %189 : vector<8x32xf32> to vector<8x32xbf16>
      %193 = arith.truncf %190 : vector<8x32xf32> to vector<8x32xbf16>
      %cst_110 = arith.constant dense<0.000000e+00> : vector<8x8xf32>
      %194 = tpu.matmul %192, %193, %cst_110 {dimension_numbers = #tpu.dot_dimension_numbers<[1], [1], [0], [0], [0, 0, 1, 0], [], []>} : vector<8x32xbf16>, vector<8x32xbf16>, vector<8x8xf32> -> vector<8x8xf32>
      %cst_111 = arith.constant 0.176776692 : f32
      %195 = vector.broadcast %cst_111 : f32 to vector<8x8xf32>
      %196 = arith.mulf %194, %195 : vector<8x8xf32>
      %cst_112 = arith.constant dense<0xFF800000> : vector<8xf32>
      %197 = vector.multi_reduction <maximumf>, %196, %cst_112 [1] : vector<8x8xf32> to vector<8xf32>
      %198 = vector.shape_cast %197 : vector<8xf32> to vector<8x1xf32>
      %199 = vector.broadcast %198 : vector<8x1xf32> to vector<8x8xf32>
      %200 = arith.subf %196, %199 : vector<8x8xf32>
      %201 = math.exp %200 : vector<8x8xf32>
      %cst_113 = arith.constant dense<0.000000e+00> : vector<8xf32>
      %202 = vector.multi_reduction <add>, %201, %cst_113 [1] : vector<8x8xf32> to vector<8xf32>
      %203 = vector.shape_cast %202 : vector<8xf32> to vector<8x1xf32>
      %204 = tpu.reciprocal %203 {approx = true} : vector<8x1xf32> -> vector<8x1xf32>
      %205 = vector.broadcast %204 : vector<8x1xf32> to vector<8x8xf32>
      %206 = arith.mulf %201, %205 : vector<8x8xf32>
      %207 = arith.truncf %206 : vector<8x8xf32> to vector<8x8xbf16>
      %208 = arith.truncf %191 : vector<8x32xf32> to vector<8x32xbf16>
      %cst_114 = arith.constant dense<0.000000e+00> : vector<8x32xf32>
      %209 = tpu.matmul %207, %208, %cst_114 {dimension_numbers = #tpu.dot_dimension_numbers<[1], [0], [0], [1], [0, 0, 1, 1], [], []>} : vector<8x8xbf16>, vector<8x32xbf16>, vector<8x32xf32> -> vector<8x32xf32>
      %c1_115 = arith.constant 1 : index
      %c0_116 = arith.constant 0 : index
      %c0_117 = arith.constant 0 : index
      %210 = vector.load %arg12[%c1_115, %c0_116, %c0_117] : memref<2x32x32xbf16, #tpu.memory_space<vmem>>, vector<1x32x32xbf16>
      %211 = vector.shape_cast %210 : vector<1x32x32xbf16> to vector<32x32xbf16>
      %cst_118 = arith.constant dense<0.000000e+00> : vector<8x32xf32>
      %212 = tpu.matmul %181, %211, %cst_118 {dimension_numbers = #tpu.dot_dimension_numbers<[1], [0], [0], [1], [0, 0, 1, 1], [], []>} : vector<8x32xbf16>, vector<32x32xbf16>, vector<8x32xf32> -> vector<8x32xf32>
      %213 = arith.truncf %209 : vector<8x32xf32> to vector<8x32xbf16>
      %c1_119 = arith.constant 1 : index
      %c0_120 = arith.constant 0 : index
      %c0_121 = arith.constant 0 : index
      %214 = vector.load %arg13[%c1_119, %c0_120, %c0_121] : memref<2x32x32xbf16, #tpu.memory_space<vmem>>, vector<1x32x32xbf16>
      %215 = vector.shape_cast %214 : vector<1x32x32xbf16> to vector<32x32xbf16>
      %cst_122 = arith.constant dense<0.000000e+00> : vector<8x32xf32>
      %216 = tpu.matmul %213, %215, %cst_122 {dimension_numbers = #tpu.dot_dimension_numbers<[1], [0], [0], [1], [0, 0, 1, 1], [], []>} : vector<8x32xbf16>, vector<32x32xbf16>, vector<8x32xf32> -> vector<8x32xf32>
      %217 = arith.addf %212, %216 : vector<8x32xf32>
      %c1_123 = arith.constant 1 : index
      %c0_124 = arith.constant 0 : index
      %c0_125 = arith.constant 0 : index
      %218 = vector.load %arg14[%c1_123, %c0_124, %c0_125] : memref<2x1x32xf32, #tpu.memory_space<vmem>>, vector<1x1x32xf32>
      %219 = vector.shape_cast %218 : vector<1x1x32xf32> to vector<1x32xf32>
      %220 = vector.broadcast %219 : vector<1x32xf32> to vector<8x32xf32>
      %221 = arith.addf %217, %220 : vector<8x32xf32>
      %222 = arith.negf %221 : vector<8x32xf32>
      %223 = math.exp %222 : vector<8x32xf32>
      %cst_126 = arith.constant 1.000000e+00 : f32
      %224 = vector.broadcast %cst_126 : f32 to vector<8x32xf32>
      %225 = arith.addf %224, %223 : vector<8x32xf32>
      %226 = arith.divf %224, %225 : vector<8x32xf32>
      %227 = arith.mulf %226, %209 : vector<8x32xf32>
      %cst_127 = arith.constant dense<0.000000e+00> : vector<8xf32>
      %228 = vector.multi_reduction <add>, %227, %cst_127 [1] : vector<8x32xf32> to vector<8xf32>
      %229 = vector.shape_cast %228 : vector<8xf32> to vector<8x1xf32>
      %cst_128 = arith.constant 3.200000e+01 : f32
      %230 = vector.broadcast %cst_128 : f32 to vector<8x1xf32>
      %231 = arith.divf %229, %230 : vector<8x1xf32>
      %232 = vector.broadcast %231 : vector<8x1xf32> to vector<8x32xf32>
      %233 = arith.subf %227, %232 : vector<8x32xf32>
      %234 = arith.mulf %233, %233 : vector<8x32xf32>
      %cst_129 = arith.constant dense<0.000000e+00> : vector<8xf32>
      %235 = vector.multi_reduction <add>, %234, %cst_129 [1] : vector<8x32xf32> to vector<8xf32>
      %236 = vector.shape_cast %235 : vector<8xf32> to vector<8x1xf32>
      %cst_130 = arith.constant 3.200000e+01 : f32
      %237 = vector.broadcast %cst_130 : f32 to vector<8x1xf32>
      %238 = arith.divf %236, %237 : vector<8x1xf32>
      %cst_131 = arith.constant 9.99999974E-6 : f32
      %239 = vector.broadcast %cst_131 : f32 to vector<8x1xf32>
      %240 = arith.addf %238, %239 : vector<8x1xf32>
      %241 = math.rsqrt %240 : vector<8x1xf32>
      %242 = vector.broadcast %241 : vector<8x1xf32> to vector<8x32xf32>
      %243 = arith.mulf %233, %242 : vector<8x32xf32>
      %c1_132 = arith.constant 1 : index
      %c0_133 = arith.constant 0 : index
      %c0_134 = arith.constant 0 : index
      %244 = vector.load %arg15[%c1_132, %c0_133, %c0_134] : memref<2x1x32xf32, #tpu.memory_space<vmem>>, vector<1x1x32xf32>
      %245 = vector.shape_cast %244 : vector<1x1x32xf32> to vector<1x32xf32>
      %246 = vector.broadcast %245 : vector<1x32xf32> to vector<8x32xf32>
      %247 = arith.mulf %243, %246 : vector<8x32xf32>
      %c1_135 = arith.constant 1 : index
      %c0_136 = arith.constant 0 : index
      %c0_137 = arith.constant 0 : index
      %248 = vector.load %arg16[%c1_135, %c0_136, %c0_137] : memref<2x1x32xf32, #tpu.memory_space<vmem>>, vector<1x1x32xf32>
      %249 = vector.shape_cast %248 : vector<1x1x32xf32> to vector<1x32xf32>
      %250 = vector.broadcast %249 : vector<1x32xf32> to vector<8x32xf32>
      %251 = arith.addf %247, %250 : vector<8x32xf32>
      %252 = tpu.concatenate %146, %251 in 1 : vector<8x32xf32>, vector<8x32xf32> -> vector<8x64xf32>
      %253 = arith.truncf %252 : vector<8x64xf32> to vector<8x64xbf16>
      %c0_138 = arith.constant 0 : index
      %c0_139 = arith.constant 0 : index
      %254 = vector.load %arg17[%c0_138, %c0_139] : memref<64x32xbf16, #tpu.memory_space<vmem>>, vector<64x32xbf16>
      %cst_140 = arith.constant dense<0.000000e+00> : vector<8x32xf32>
      %255 = tpu.matmul %253, %254, %cst_140 {dimension_numbers = #tpu.dot_dimension_numbers<[1], [0], [0], [1], [0, 0, 1, 1], [], []>} : vector<8x64xbf16>, vector<64x32xbf16>, vector<8x32xf32> -> vector<8x32xf32>
      %c0_141 = arith.constant 0 : index
      %c0_142 = arith.constant 0 : index
      %256 = vector.load %arg18[%c0_141, %c0_142] : memref<1x32xf32, #tpu.memory_space<vmem>>, vector<1x32xf32>
      %257 = vector.broadcast %256 : vector<1x32xf32> to vector<8x32xf32>
      %258 = arith.addf %255, %257 : vector<8x32xf32>
      %259 = math.tanh %258 : vector<8x32xf32>
      %260 = arith.truncf %259 : vector<8x32xf32> to vector<8x32xbf16>
      %c0_143 = arith.constant 0 : index
      %c0_144 = arith.constant 0 : index
      %261 = vector.load %arg19[%c0_143, %c0_144] : memref<32x1xbf16, #tpu.memory_space<vmem>>, vector<32x1xbf16>
      %cst_145 = arith.constant dense<0.000000e+00> : vector<8x1xf32>
      %262 = tpu.matmul %260, %261, %cst_145 {dimension_numbers = #tpu.dot_dimension_numbers<[1], [0], [0], [1], [0, 0, 1, 1], [], []>} : vector<8x32xbf16>, vector<32x1xbf16>, vector<8x1xf32> -> vector<8x1xf32>
      %c0_146 = arith.constant 0 : index
      %c0_147 = arith.constant 0 : index
      %263 = vector.load %arg20[%c0_146, %c0_147] : memref<1x1xf32, #tpu.memory_space<vmem>>, vector<1x1xf32>
      %264 = vector.broadcast %263 : vector<1x1xf32> to vector<8x1xf32>
      %265 = arith.addf %262, %264 : vector<8x1xf32>
      %266 = arith.negf %265 : vector<8x1xf32>
      %267 = math.exp %266 : vector<8x1xf32>
      %cst_148 = arith.constant 1.000000e+00 : f32
      %268 = vector.broadcast %cst_148 : f32 to vector<8x1xf32>
      %269 = arith.addf %268, %267 : vector<8x1xf32>
      %270 = arith.divf %268, %269 : vector<8x1xf32>
      %271 = vector.shape_cast %270 : vector<8x1xf32> to vector<1x8x1xf32>
      %cst_149 = arith.constant dense<0.000000e+00> : vector<1xf32>
      %272 = vector.multi_reduction <add>, %271, %cst_149 [1, 2] : vector<1x8x1xf32> to vector<1xf32>
      %273 = vector.shape_cast %272 : vector<1xf32> to vector<1x1x1xf32>
      %274 = vector.extract %273[0, 0, 0] : f32 from vector<1x1x1xf32>
      %c0_150 = arith.constant 0 : index
      %c0_151 = arith.constant 0 : index
      %275 = vector.load %arg21[%c0_150, %c0_151] : memref<8x32xf32, #tpu.memory_space<vmem>>, vector<8x32xf32>
      tpu.vector_store %arg21[%c0_150, %c0_151], %259 {strides = array<i32>} : memref<8x32xf32, #tpu.memory_space<vmem>>, vector<8x32xf32>,
      %c0_152 = arith.constant 0 : index
      %c0_153 = arith.constant 0 : index
      %276 = vector.load %arg22[%c0_152, %c0_153] : memref<8x32xf32, #tpu.memory_space<vmem>>, vector<8x32xf32>
      tpu.vector_store %arg22[%c0_152, %c0_153], %259 {strides = array<i32>} : memref<8x32xf32, #tpu.memory_space<vmem>>, vector<8x32xf32>,
      %277 = arith.cmpf oge, %274, %cst_13 : f32
      %c1_i32 = arith.constant 1 : i32
      %c0_i32_154 = arith.constant 0 : i32
      %278 = arith.select %277, %c1_i32, %c0_i32_154 : i32
      %c0_155 = arith.constant 0 : index
      %279 = memref.load %arg23[%c0_155] : memref<1xi32, #tpu.memory_space<smem>>
      memref.store %278, %arg23[%c0_155] : memref<1xi32, #tpu.memory_space<smem>>
    } else {
    }
    %c0_15 = arith.constant 0 : index
    %17 = memref.load %arg23[%c0_15] : memref<1xi32, #tpu.memory_space<smem>>
    %c0_i32_16 = arith.constant 0 : i32
    %18 = arith.cmpi eq, %17, %c0_i32_16 : i32
    %19 = arith.extui %18 : i1 to i32
    %cst_17 = arith.constant 4.000000e+00 : f32
    %c0_i32_18 = arith.constant 0 : i32
    %20 = arith.cmpi ne, %19, %c0_i32_18 : i32
    scf.if %20 {
      %c0_30 = arith.constant 0 : index
      %c0_31 = arith.constant 0 : index
      %33 = vector.load %arg22[%c0_30, %c0_31] : memref<8x32xf32, #tpu.memory_space<vmem>>, vector<8x32xf32>
      %34 = arith.addf %9, %33 : vector<8x32xf32>
      %35 = arith.truncf %34 : vector<8x32xf32> to vector<8x32xbf16>
      %c0_32 = arith.constant 0 : index
      %c0_33 = arith.constant 0 : index
      %36 = vector.load %arg4[%c0_32, %c0_33] : memref<32x512xbf16, #tpu.memory_space<vmem>>, vector<32x512xbf16>
      %cst_34 = arith.constant dense<0.000000e+00> : vector<8x512xf32>
      %37 = tpu.matmul %35, %36, %cst_34 {dimension_numbers = #tpu.dot_dimension_numbers<[1], [0], [0], [1], [0, 0, 1, 1], [], []>} : vector<8x32xbf16>, vector<32x512xbf16>, vector<8x512xf32> -> vector<8x512xf32>
      %c0_35 = arith.constant 0 : index
      %c0_36 = arith.constant 0 : index
      %38 = vector.load %arg5[%c0_35, %c0_36] : memref<1x512xf32, #tpu.memory_space<vmem>>, vector<1x512xf32>
      %39 = vector.broadcast %38 : vector<1x512xf32> to vector<8x512xf32>
      %40 = arith.addf %37, %39 : vector<8x512xf32>
      %41 = math.tanh %40 : vector<8x512xf32>
      %42 = vector.extract_strided_slice %41 {offsets = [0, 0], sizes = [8, 256], strides = [1, 1]} : vector<8x512xf32> to vector<8x256xf32>
      %43 = arith.truncf %42 : vector<8x256xf32> to vector<8x256xbf16>
      %c0_37 = arith.constant 0 : index
      %c0_38 = arith.constant 0 : index
      %c0_39 = arith.constant 0 : index
      %44 = vector.load %arg6[%c0_37, %c0_38, %c0_39] : memref<2x256x128xbf16, #tpu.memory_space<vmem>>, vector<1x256x128xbf16>
      %45 = vector.shape_cast %44 : vector<1x256x128xbf16> to vector<256x128xbf16>
      %cst_40 = arith.constant dense<0.000000e+00> : vector<8x128xf32>
      %46 = tpu.matmul %43, %45, %cst_40 {dimension_numbers = #tpu.dot_dimension_numbers<[1], [0], [0], [1], [0, 0, 1, 1], [], []>} : vector<8x256xbf16>, vector<256x128xbf16>, vector<8x128xf32> -> vector<8x128xf32>
      %c0_41 = arith.constant 0 : index
      %c0_42 = arith.constant 0 : index
      %c0_43 = arith.constant 0 : index
      %47 = vector.load %arg7[%c0_41, %c0_42, %c0_43] : memref<2x1x128xf32, #tpu.memory_space<vmem>>, vector<1x1x128xf32>
      %48 = vector.shape_cast %47 : vector<1x1x128xf32> to vector<1x128xf32>
      %49 = vector.broadcast %48 : vector<1x128xf32> to vector<8x128xf32>
      %50 = arith.addf %46, %49 : vector<8x128xf32>
      %51 = math.tanh %50 : vector<8x128xf32>
      %52 = arith.truncf %51 : vector<8x128xf32> to vector<8x128xbf16>
      %c0_44 = arith.constant 0 : index
      %c0_45 = arith.constant 0 : index
      %c0_46 = arith.constant 0 : index
      %53 = vector.load %arg8[%c0_44, %c0_45, %c0_46] : memref<2x128x128xbf16, #tpu.memory_space<vmem>>, vector<1x128x128xbf16>
      %54 = vector.shape_cast %53 : vector<1x128x128xbf16> to vector<128x128xbf16>
      %cst_47 = arith.constant dense<0.000000e+00> : vector<8x128xf32>
      %55 = tpu.matmul %52, %54, %cst_47 {dimension_numbers = #tpu.dot_dimension_numbers<[1], [0], [0], [1], [0, 0, 1, 1], [], []>} : vector<8x128xbf16>, vector<128x128xbf16>, vector<8x128xf32> -> vector<8x128xf32>
      %c0_48 = arith.constant 0 : index
      %c0_49 = arith.constant 0 : index
      %c0_50 = arith.constant 0 : index
      %56 = vector.load %arg9[%c0_48, %c0_49, %c0_50] : memref<2x1x128xf32, #tpu.memory_space<vmem>>, vector<1x1x128xf32>
      %57 = vector.shape_cast %56 : vector<1x1x128xf32> to vector<1x128xf32>
      %58 = vector.broadcast %57 : vector<1x128xf32> to vector<8x128xf32>
      %59 = arith.addf %55, %58 : vector<8x128xf32>
      %60 = arith.negf %59 : vector<8x128xf32>
      %61 = math.exp %60 : vector<8x128xf32>
      %cst_51 = arith.constant 1.000000e+00 : f32
      %62 = vector.broadcast %cst_51 : f32 to vector<8x128xf32>
      %63 = arith.addf %62, %61 : vector<8x128xf32>
      %64 = arith.divf %62, %63 : vector<8x128xf32>
      %65 = math.tanh %59 : vector<8x128xf32>
      %66 = vector.extract_strided_slice %59 {offsets = [0, 0], sizes = [8, 32], strides = [1, 1]} : vector<8x128xf32> to vector<8x32xf32>
      %cst_52 = arith.constant 0.000000e+00 : f32
      %67 = vector.broadcast %cst_52 : f32 to vector<8x32xf32>
      %68 = arith.maximumf %66, %67 : vector<8x32xf32>
      %69 = vector.extract_strided_slice %64 {offsets = [0, 32], sizes = [8, 32], strides = [1, 1]} : vector<8x128xf32> to vector<8x32xf32>
      %70 = vector.extract_strided_slice %65 {offsets = [0, 64], sizes = [8, 32], strides = [1, 1]} : vector<8x128xf32> to vector<8x32xf32>
      %71 = vector.extract_strided_slice %64 {offsets = [0, 96], sizes = [8, 32], strides = [1, 1]} : vector<8x128xf32> to vector<8x32xf32>
      %72 = arith.mulf %69, %70 : vector<8x32xf32>
      %73 = math.tanh %72 : vector<8x32xf32>
      %74 = arith.mulf %71, %73 : vector<8x32xf32>
      %75 = arith.addf %68, %74 : vector<8x32xf32>
      %76 = arith.truncf %75 : vector<8x32xf32> to vector<8x32xbf16>
      %c0_53 = arith.constant 0 : index
      %c0_54 = arith.constant 0 : index
      %c0_55 = arith.constant 0 : index
      %77 = vector.load %arg10[%c0_53, %c0_54, %c0_55] : memref<2x32x96xbf16, #tpu.memory_space<vmem>>, vector<1x32x96xbf16>
      %78 = vector.shape_cast %77 : vector<1x32x96xbf16> to vector<32x96xbf16>
      %cst_56 = arith.constant dense<0.000000e+00> : vector<8x96xf32>
      %79 = tpu.matmul %76, %78, %cst_56 {dimension_numbers = #tpu.dot_dimension_numbers<[1], [0], [0], [1], [0, 0, 1, 1], [], []>} : vector<8x32xbf16>, vector<32x96xbf16>, vector<8x96xf32> -> vector<8x96xf32>
      %c0_57 = arith.constant 0 : index
      %c0_58 = arith.constant 0 : index
      %c0_59 = arith.constant 0 : index
      %80 = vector.load %arg11[%c0_57, %c0_58, %c0_59] : memref<2x1x96xf32, #tpu.memory_space<vmem>>, vector<1x1x96xf32>
      %81 = vector.shape_cast %80 : vector<1x1x96xf32> to vector<1x96xf32>
      %82 = vector.broadcast %81 : vector<1x96xf32> to vector<8x96xf32>
      %83 = arith.addf %79, %82 : vector<8x96xf32>
      %84 = vector.extract_strided_slice %83 {offsets = [0, 0], sizes = [8, 32], strides = [1, 1]} : vector<8x96xf32> to vector<8x32xf32>
      %85 = vector.extract_strided_slice %83 {offsets = [0, 32], sizes = [8, 32], strides = [1, 1]} : vector<8x96xf32> to vector<8x32xf32>
      %86 = vector.extract_strided_slice %83 {offsets = [0, 64], sizes = [8, 32], strides = [1, 1]} : vector<8x96xf32> to vector<8x32xf32>
      %87 = arith.truncf %84 : vector<8x32xf32> to vector<8x32xbf16>
      %88 = arith.truncf %85 : vector<8x32xf32> to vector<8x32xbf16>
      %cst_60 = arith.constant dense<0.000000e+00> : vector<8x8xf32>
      %89 = tpu.matmul %87, %88, %cst_60 {dimension_numbers = #tpu.dot_dimension_numbers<[1], [1], [0], [0], [0, 0, 1, 0], [], []>} : vector<8x32xbf16>, vector<8x32xbf16>, vector<8x8xf32> -> vector<8x8xf32>
      %cst_61 = arith.constant 0.176776692 : f32
      %90 = vector.broadcast %cst_61 : f32 to vector<8x8xf32>
      %91 = arith.mulf %89, %90 : vector<8x8xf32>
      %cst_62 = arith.constant dense<0xFF800000> : vector<8xf32>
      %92 = vector.multi_reduction <maximumf>, %91, %cst_62 [1] : vector<8x8xf32> to vector<8xf32>
      %93 = vector.shape_cast %92 : vector<8xf32> to vector<8x1xf32>
      %94 = vector.broadcast %93 : vector<8x1xf32> to vector<8x8xf32>
      %95 = arith.subf %91, %94 : vector<8x8xf32>
      %96 = math.exp %95 : vector<8x8xf32>
      %cst_63 = arith.constant dense<0.000000e+00> : vector<8xf32>
      %97 = vector.multi_reduction <add>, %96, %cst_63 [1] : vector<8x8xf32> to vector<8xf32>
      %98 = vector.shape_cast %97 : vector<8xf32> to vector<8x1xf32>
      %99 = tpu.reciprocal %98 {approx = true} : vector<8x1xf32> -> vector<8x1xf32>
      %100 = vector.broadcast %99 : vector<8x1xf32> to vector<8x8xf32>
      %101 = arith.mulf %96, %100 : vector<8x8xf32>
      %102 = arith.truncf %101 : vector<8x8xf32> to vector<8x8xbf16>
      %103 = arith.truncf %86 : vector<8x32xf32> to vector<8x32xbf16>
      %cst_64 = arith.constant dense<0.000000e+00> : vector<8x32xf32>
      %104 = tpu.matmul %102, %103, %cst_64 {dimension_numbers = #tpu.dot_dimension_numbers<[1], [0], [0], [1], [0, 0, 1, 1], [], []>} : vector<8x8xbf16>, vector<8x32xbf16>, vector<8x32xf32> -> vector<8x32xf32>
      %c0_65 = arith.constant 0 : index
      %c0_66 = arith.constant 0 : index
      %c0_67 = arith.constant 0 : index
      %105 = vector.load %arg12[%c0_65, %c0_66, %c0_67] : memref<2x32x32xbf16, #tpu.memory_space<vmem>>, vector<1x32x32xbf16>
      %106 = vector.shape_cast %105 : vector<1x32x32xbf16> to vector<32x32xbf16>
      %cst_68 = arith.constant dense<0.000000e+00> : vector<8x32xf32>
      %107 = tpu.matmul %76, %106, %cst_68 {dimension_numbers = #tpu.dot_dimension_numbers<[1], [0], [0], [1], [0, 0, 1, 1], [], []>} : vector<8x32xbf16>, vector<32x32xbf16>, vector<8x32xf32> -> vector<8x32xf32>
      %108 = arith.truncf %104 : vector<8x32xf32> to vector<8x32xbf16>
      %c0_69 = arith.constant 0 : index
      %c0_70 = arith.constant 0 : index
      %c0_71 = arith.constant 0 : index
      %109 = vector.load %arg13[%c0_69, %c0_70, %c0_71] : memref<2x32x32xbf16, #tpu.memory_space<vmem>>, vector<1x32x32xbf16>
      %110 = vector.shape_cast %109 : vector<1x32x32xbf16> to vector<32x32xbf16>
      %cst_72 = arith.constant dense<0.000000e+00> : vector<8x32xf32>
      %111 = tpu.matmul %108, %110, %cst_72 {dimension_numbers = #tpu.dot_dimension_numbers<[1], [0], [0], [1], [0, 0, 1, 1], [], []>} : vector<8x32xbf16>, vector<32x32xbf16>, vector<8x32xf32> -> vector<8x32xf32>
      %112 = arith.addf %107, %111 : vector<8x32xf32>
      %c0_73 = arith.constant 0 : index
      %c0_74 = arith.constant 0 : index
      %c0_75 = arith.constant 0 : index
      %113 = vector.load %arg14[%c0_73, %c0_74, %c0_75] : memref<2x1x32xf32, #tpu.memory_space<vmem>>, vector<1x1x32xf32>
      %114 = vector.shape_cast %113 : vector<1x1x32xf32> to vector<1x32xf32>
      %115 = vector.broadcast %114 : vector<1x32xf32> to vector<8x32xf32>
      %116 = arith.addf %112, %115 : vector<8x32xf32>
      %117 = arith.negf %116 : vector<8x32xf32>
      %118 = math.exp %117 : vector<8x32xf32>
      %cst_76 = arith.constant 1.000000e+00 : f32
      %119 = vector.broadcast %cst_76 : f32 to vector<8x32xf32>
      %120 = arith.addf %119, %118 : vector<8x32xf32>
      %121 = arith.divf %119, %120 : vector<8x32xf32>
      %122 = arith.mulf %121, %104 : vector<8x32xf32>
      %cst_77 = arith.constant dense<0.000000e+00> : vector<8xf32>
      %123 = vector.multi_reduction <add>, %122, %cst_77 [1] : vector<8x32xf32> to vector<8xf32>
      %124 = vector.shape_cast %123 : vector<8xf32> to vector<8x1xf32>
      %cst_78 = arith.constant 3.200000e+01 : f32
      %125 = vector.broadcast %cst_78 : f32 to vector<8x1xf32>
      %126 = arith.divf %124, %125 : vector<8x1xf32>
      %127 = vector.broadcast %126 : vector<8x1xf32> to vector<8x32xf32>
      %128 = arith.subf %122, %127 : vector<8x32xf32>
      %129 = arith.mulf %128, %128 : vector<8x32xf32>
      %cst_79 = arith.constant dense<0.000000e+00> : vector<8xf32>
      %130 = vector.multi_reduction <add>, %129, %cst_79 [1] : vector<8x32xf32> to vector<8xf32>
      %131 = vector.shape_cast %130 : vector<8xf32> to vector<8x1xf32>
      %cst_80 = arith.constant 3.200000e+01 : f32
      %132 = vector.broadcast %cst_80 : f32 to vector<8x1xf32>
      %133 = arith.divf %131, %132 : vector<8x1xf32>
      %cst_81 = arith.constant 9.99999974E-6 : f32
      %134 = vector.broadcast %cst_81 : f32 to vector<8x1xf32>
      %135 = arith.addf %133, %134 : vector<8x1xf32>
      %136 = math.rsqrt %135 : vector<8x1xf32>
      %137 = vector.broadcast %136 : vector<8x1xf32> to vector<8x32xf32>
      %138 = arith.mulf %128, %137 : vector<8x32xf32>
      %c0_82 = arith.constant 0 : index
      %c0_83 = arith.constant 0 : index
      %c0_84 = arith.constant 0 : index
      %139 = vector.load %arg15[%c0_82, %c0_83, %c0_84] : memref<2x1x32xf32, #tpu.memory_space<vmem>>, vector<1x1x32xf32>
      %140 = vector.shape_cast %139 : vector<1x1x32xf32> to vector<1x32xf32>
      %141 = vector.broadcast %140 : vector<1x32xf32> to vector<8x32xf32>
      %142 = arith.mulf %138, %141 : vector<8x32xf32>
      %c0_85 = arith.constant 0 : index
      %c0_86 = arith.constant 0 : index
      %c0_87 = arith.constant 0 : index
      %143 = vector.load %arg16[%c0_85, %c0_86, %c0_87] : memref<2x1x32xf32, #tpu.memory_space<vmem>>, vector<1x1x32xf32>
      %144 = vector.shape_cast %143 : vector<1x1x32xf32> to vector<1x32xf32>
      %145 = vector.broadcast %144 : vector<1x32xf32> to vector<8x32xf32>
      %146 = arith.addf %142, %145 : vector<8x32xf32>
      %147 = vector.extract_strided_slice %41 {offsets = [0, 256], sizes = [8, 256], strides = [1, 1]} : vector<8x512xf32> to vector<8x256xf32>
      %148 = arith.truncf %147 : vector<8x256xf32> to vector<8x256xbf16>
      %c1 = arith.constant 1 : index
      %c0_88 = arith.constant 0 : index
      %c0_89 = arith.constant 0 : index
      %149 = vector.load %arg6[%c1, %c0_88, %c0_89] : memref<2x256x128xbf16, #tpu.memory_space<vmem>>, vector<1x256x128xbf16>
      %150 = vector.shape_cast %149 : vector<1x256x128xbf16> to vector<256x128xbf16>
      %cst_90 = arith.constant dense<0.000000e+00> : vector<8x128xf32>
      %151 = tpu.matmul %148, %150, %cst_90 {dimension_numbers = #tpu.dot_dimension_numbers<[1], [0], [0], [1], [0, 0, 1, 1], [], []>} : vector<8x256xbf16>, vector<256x128xbf16>, vector<8x128xf32> -> vector<8x128xf32>
      %c1_91 = arith.constant 1 : index
      %c0_92 = arith.constant 0 : index
      %c0_93 = arith.constant 0 : index
      %152 = vector.load %arg7[%c1_91, %c0_92, %c0_93] : memref<2x1x128xf32, #tpu.memory_space<vmem>>, vector<1x1x128xf32>
      %153 = vector.shape_cast %152 : vector<1x1x128xf32> to vector<1x128xf32>
      %154 = vector.broadcast %153 : vector<1x128xf32> to vector<8x128xf32>
      %155 = arith.addf %151, %154 : vector<8x128xf32>
      %156 = math.tanh %155 : vector<8x128xf32>
      %157 = arith.truncf %156 : vector<8x128xf32> to vector<8x128xbf16>
      %c1_94 = arith.constant 1 : index
      %c0_95 = arith.constant 0 : index
      %c0_96 = arith.constant 0 : index
      %158 = vector.load %arg8[%c1_94, %c0_95, %c0_96] : memref<2x128x128xbf16, #tpu.memory_space<vmem>>, vector<1x128x128xbf16>
      %159 = vector.shape_cast %158 : vector<1x128x128xbf16> to vector<128x128xbf16>
      %cst_97 = arith.constant dense<0.000000e+00> : vector<8x128xf32>
      %160 = tpu.matmul %157, %159, %cst_97 {dimension_numbers = #tpu.dot_dimension_numbers<[1], [0], [0], [1], [0, 0, 1, 1], [], []>} : vector<8x128xbf16>, vector<128x128xbf16>, vector<8x128xf32> -> vector<8x128xf32>
      %c1_98 = arith.constant 1 : index
      %c0_99 = arith.constant 0 : index
      %c0_100 = arith.constant 0 : index
      %161 = vector.load %arg9[%c1_98, %c0_99, %c0_100] : memref<2x1x128xf32, #tpu.memory_space<vmem>>, vector<1x1x128xf32>
      %162 = vector.shape_cast %161 : vector<1x1x128xf32> to vector<1x128xf32>
      %163 = vector.broadcast %162 : vector<1x128xf32> to vector<8x128xf32>
      %164 = arith.addf %160, %163 : vector<8x128xf32>
      %165 = arith.negf %164 : vector<8x128xf32>
      %166 = math.exp %165 : vector<8x128xf32>
      %cst_101 = arith.constant 1.000000e+00 : f32
      %167 = vector.broadcast %cst_101 : f32 to vector<8x128xf32>
      %168 = arith.addf %167, %166 : vector<8x128xf32>
      %169 = arith.divf %167, %168 : vector<8x128xf32>
      %170 = math.tanh %164 : vector<8x128xf32>
      %171 = vector.extract_strided_slice %164 {offsets = [0, 0], sizes = [8, 32], strides = [1, 1]} : vector<8x128xf32> to vector<8x32xf32>
      %cst_102 = arith.constant 0.000000e+00 : f32
      %172 = vector.broadcast %cst_102 : f32 to vector<8x32xf32>
      %173 = arith.maximumf %171, %172 : vector<8x32xf32>
      %174 = vector.extract_strided_slice %169 {offsets = [0, 32], sizes = [8, 32], strides = [1, 1]} : vector<8x128xf32> to vector<8x32xf32>
      %175 = vector.extract_strided_slice %170 {offsets = [0, 64], sizes = [8, 32], strides = [1, 1]} : vector<8x128xf32> to vector<8x32xf32>
      %176 = vector.extract_strided_slice %169 {offsets = [0, 96], sizes = [8, 32], strides = [1, 1]} : vector<8x128xf32> to vector<8x32xf32>
      %177 = arith.mulf %174, %175 : vector<8x32xf32>
      %178 = math.tanh %177 : vector<8x32xf32>
      %179 = arith.mulf %176, %178 : vector<8x32xf32>
      %180 = arith.addf %173, %179 : vector<8x32xf32>
      %181 = arith.truncf %180 : vector<8x32xf32> to vector<8x32xbf16>
      %c1_103 = arith.constant 1 : index
      %c0_104 = arith.constant 0 : index
      %c0_105 = arith.constant 0 : index
      %182 = vector.load %arg10[%c1_103, %c0_104, %c0_105] : memref<2x32x96xbf16, #tpu.memory_space<vmem>>, vector<1x32x96xbf16>
      %183 = vector.shape_cast %182 : vector<1x32x96xbf16> to vector<32x96xbf16>
      %cst_106 = arith.constant dense<0.000000e+00> : vector<8x96xf32>
      %184 = tpu.matmul %181, %183, %cst_106 {dimension_numbers = #tpu.dot_dimension_numbers<[1], [0], [0], [1], [0, 0, 1, 1], [], []>} : vector<8x32xbf16>, vector<32x96xbf16>, vector<8x96xf32> -> vector<8x96xf32>
      %c1_107 = arith.constant 1 : index
      %c0_108 = arith.constant 0 : index
      %c0_109 = arith.constant 0 : index
      %185 = vector.load %arg11[%c1_107, %c0_108, %c0_109] : memref<2x1x96xf32, #tpu.memory_space<vmem>>, vector<1x1x96xf32>
      %186 = vector.shape_cast %185 : vector<1x1x96xf32> to vector<1x96xf32>
      %187 = vector.broadcast %186 : vector<1x96xf32> to vector<8x96xf32>
      %188 = arith.addf %184, %187 : vector<8x96xf32>
      %189 = vector.extract_strided_slice %188 {offsets = [0, 0], sizes = [8, 32], strides = [1, 1]} : vector<8x96xf32> to vector<8x32xf32>
      %190 = vector.extract_strided_slice %188 {offsets = [0, 32], sizes = [8, 32], strides = [1, 1]} : vector<8x96xf32> to vector<8x32xf32>
      %191 = vector.extract_strided_slice %188 {offsets = [0, 64], sizes = [8, 32], strides = [1, 1]} : vector<8x96xf32> to vector<8x32xf32>
      %192 = arith.truncf %189 : vector<8x32xf32> to vector<8x32xbf16>
      %193 = arith.truncf %190 : vector<8x32xf32> to vector<8x32xbf16>
      %cst_110 = arith.constant dense<0.000000e+00> : vector<8x8xf32>
      %194 = tpu.matmul %192, %193, %cst_110 {dimension_numbers = #tpu.dot_dimension_numbers<[1], [1], [0], [0], [0, 0, 1, 0], [], []>} : vector<8x32xbf16>, vector<8x32xbf16>, vector<8x8xf32> -> vector<8x8xf32>
      %cst_111 = arith.constant 0.176776692 : f32
      %195 = vector.broadcast %cst_111 : f32 to vector<8x8xf32>
      %196 = arith.mulf %194, %195 : vector<8x8xf32>
      %cst_112 = arith.constant dense<0xFF800000> : vector<8xf32>
      %197 = vector.multi_reduction <maximumf>, %196, %cst_112 [1] : vector<8x8xf32> to vector<8xf32>
      %198 = vector.shape_cast %197 : vector<8xf32> to vector<8x1xf32>
      %199 = vector.broadcast %198 : vector<8x1xf32> to vector<8x8xf32>
      %200 = arith.subf %196, %199 : vector<8x8xf32>
      %201 = math.exp %200 : vector<8x8xf32>
      %cst_113 = arith.constant dense<0.000000e+00> : vector<8xf32>
      %202 = vector.multi_reduction <add>, %201, %cst_113 [1] : vector<8x8xf32> to vector<8xf32>
      %203 = vector.shape_cast %202 : vector<8xf32> to vector<8x1xf32>
      %204 = tpu.reciprocal %203 {approx = true} : vector<8x1xf32> -> vector<8x1xf32>
      %205 = vector.broadcast %204 : vector<8x1xf32> to vector<8x8xf32>
      %206 = arith.mulf %201, %205 : vector<8x8xf32>
      %207 = arith.truncf %206 : vector<8x8xf32> to vector<8x8xbf16>
      %208 = arith.truncf %191 : vector<8x32xf32> to vector<8x32xbf16>
      %cst_114 = arith.constant dense<0.000000e+00> : vector<8x32xf32>
      %209 = tpu.matmul %207, %208, %cst_114 {dimension_numbers = #tpu.dot_dimension_numbers<[1], [0], [0], [1], [0, 0, 1, 1], [], []>} : vector<8x8xbf16>, vector<8x32xbf16>, vector<8x32xf32> -> vector<8x32xf32>
      %c1_115 = arith.constant 1 : index
      %c0_116 = arith.constant 0 : index
      %c0_117 = arith.constant 0 : index
      %210 = vector.load %arg12[%c1_115, %c0_116, %c0_117] : memref<2x32x32xbf16, #tpu.memory_space<vmem>>, vector<1x32x32xbf16>
      %211 = vector.shape_cast %210 : vector<1x32x32xbf16> to vector<32x32xbf16>
      %cst_118 = arith.constant dense<0.000000e+00> : vector<8x32xf32>
      %212 = tpu.matmul %181, %211, %cst_118 {dimension_numbers = #tpu.dot_dimension_numbers<[1], [0], [0], [1], [0, 0, 1, 1], [], []>} : vector<8x32xbf16>, vector<32x32xbf16>, vector<8x32xf32> -> vector<8x32xf32>
      %213 = arith.truncf %209 : vector<8x32xf32> to vector<8x32xbf16>
      %c1_119 = arith.constant 1 : index
      %c0_120 = arith.constant 0 : index
      %c0_121 = arith.constant 0 : index
      %214 = vector.load %arg13[%c1_119, %c0_120, %c0_121] : memref<2x32x32xbf16, #tpu.memory_space<vmem>>, vector<1x32x32xbf16>
      %215 = vector.shape_cast %214 : vector<1x32x32xbf16> to vector<32x32xbf16>
      %cst_122 = arith.constant dense<0.000000e+00> : vector<8x32xf32>
      %216 = tpu.matmul %213, %215, %cst_122 {dimension_numbers = #tpu.dot_dimension_numbers<[1], [0], [0], [1], [0, 0, 1, 1], [], []>} : vector<8x32xbf16>, vector<32x32xbf16>, vector<8x32xf32> -> vector<8x32xf32>
      %217 = arith.addf %212, %216 : vector<8x32xf32>
      %c1_123 = arith.constant 1 : index
      %c0_124 = arith.constant 0 : index
      %c0_125 = arith.constant 0 : index
      %218 = vector.load %arg14[%c1_123, %c0_124, %c0_125] : memref<2x1x32xf32, #tpu.memory_space<vmem>>, vector<1x1x32xf32>
      %219 = vector.shape_cast %218 : vector<1x1x32xf32> to vector<1x32xf32>
      %220 = vector.broadcast %219 : vector<1x32xf32> to vector<8x32xf32>
      %221 = arith.addf %217, %220 : vector<8x32xf32>
      %222 = arith.negf %221 : vector<8x32xf32>
      %223 = math.exp %222 : vector<8x32xf32>
      %cst_126 = arith.constant 1.000000e+00 : f32
      %224 = vector.broadcast %cst_126 : f32 to vector<8x32xf32>
      %225 = arith.addf %224, %223 : vector<8x32xf32>
      %226 = arith.divf %224, %225 : vector<8x32xf32>
      %227 = arith.mulf %226, %209 : vector<8x32xf32>
      %cst_127 = arith.constant dense<0.000000e+00> : vector<8xf32>
      %228 = vector.multi_reduction <add>, %227, %cst_127 [1] : vector<8x32xf32> to vector<8xf32>
      %229 = vector.shape_cast %228 : vector<8xf32> to vector<8x1xf32>
      %cst_128 = arith.constant 3.200000e+01 : f32
      %230 = vector.broadcast %cst_128 : f32 to vector<8x1xf32>
      %231 = arith.divf %229, %230 : vector<8x1xf32>
      %232 = vector.broadcast %231 : vector<8x1xf32> to vector<8x32xf32>
      %233 = arith.subf %227, %232 : vector<8x32xf32>
      %234 = arith.mulf %233, %233 : vector<8x32xf32>
      %cst_129 = arith.constant dense<0.000000e+00> : vector<8xf32>
      %235 = vector.multi_reduction <add>, %234, %cst_129 [1] : vector<8x32xf32> to vector<8xf32>
      %236 = vector.shape_cast %235 : vector<8xf32> to vector<8x1xf32>
      %cst_130 = arith.constant 3.200000e+01 : f32
      %237 = vector.broadcast %cst_130 : f32 to vector<8x1xf32>
      %238 = arith.divf %236, %237 : vector<8x1xf32>
      %cst_131 = arith.constant 9.99999974E-6 : f32
      %239 = vector.broadcast %cst_131 : f32 to vector<8x1xf32>
      %240 = arith.addf %238, %239 : vector<8x1xf32>
      %241 = math.rsqrt %240 : vector<8x1xf32>
      %242 = vector.broadcast %241 : vector<8x1xf32> to vector<8x32xf32>
      %243 = arith.mulf %233, %242 : vector<8x32xf32>
      %c1_132 = arith.constant 1 : index
      %c0_133 = arith.constant 0 : index
      %c0_134 = arith.constant 0 : index
      %244 = vector.load %arg15[%c1_132, %c0_133, %c0_134] : memref<2x1x32xf32, #tpu.memory_space<vmem>>, vector<1x1x32xf32>
      %245 = vector.shape_cast %244 : vector<1x1x32xf32> to vector<1x32xf32>
      %246 = vector.broadcast %245 : vector<1x32xf32> to vector<8x32xf32>
      %247 = arith.mulf %243, %246 : vector<8x32xf32>
      %c1_135 = arith.constant 1 : index
      %c0_136 = arith.constant 0 : index
      %c0_137 = arith.constant 0 : index
      %248 = vector.load %arg16[%c1_135, %c0_136, %c0_137] : memref<2x1x32xf32, #tpu.memory_space<vmem>>, vector<1x1x32xf32>
      %249 = vector.shape_cast %248 : vector<1x1x32xf32> to vector<1x32xf32>
      %250 = vector.broadcast %249 : vector<1x32xf32> to vector<8x32xf32>
      %251 = arith.addf %247, %250 : vector<8x32xf32>
      %252 = tpu.concatenate %146, %251 in 1 : vector<8x32xf32>, vector<8x32xf32> -> vector<8x64xf32>
      %253 = arith.truncf %252 : vector<8x64xf32> to vector<8x64xbf16>
      %c0_138 = arith.constant 0 : index
      %c0_139 = arith.constant 0 : index
      %254 = vector.load %arg17[%c0_138, %c0_139] : memref<64x32xbf16, #tpu.memory_space<vmem>>, vector<64x32xbf16>
      %cst_140 = arith.constant dense<0.000000e+00> : vector<8x32xf32>
      %255 = tpu.matmul %253, %254, %cst_140 {dimension_numbers = #tpu.dot_dimension_numbers<[1], [0], [0], [1], [0, 0, 1, 1], [], []>} : vector<8x64xbf16>, vector<64x32xbf16>, vector<8x32xf32> -> vector<8x32xf32>
      %c0_141 = arith.constant 0 : index
      %c0_142 = arith.constant 0 : index
      %256 = vector.load %arg18[%c0_141, %c0_142] : memref<1x32xf32, #tpu.memory_space<vmem>>, vector<1x32xf32>
      %257 = vector.broadcast %256 : vector<1x32xf32> to vector<8x32xf32>
      %258 = arith.addf %255, %257 : vector<8x32xf32>
      %259 = math.tanh %258 : vector<8x32xf32>
      %260 = arith.truncf %259 : vector<8x32xf32> to vector<8x32xbf16>
      %c0_143 = arith.constant 0 : index
      %c0_144 = arith.constant 0 : index
      %261 = vector.load %arg19[%c0_143, %c0_144] : memref<32x1xbf16, #tpu.memory_space<vmem>>, vector<32x1xbf16>
      %cst_145 = arith.constant dense<0.000000e+00> : vector<8x1xf32>
      %262 = tpu.matmul %260, %261, %cst_145 {dimension_numbers = #tpu.dot_dimension_numbers<[1], [0], [0], [1], [0, 0, 1, 1], [], []>} : vector<8x32xbf16>, vector<32x1xbf16>, vector<8x1xf32> -> vector<8x1xf32>
      %c0_146 = arith.constant 0 : index
      %c0_147 = arith.constant 0 : index
      %263 = vector.load %arg20[%c0_146, %c0_147] : memref<1x1xf32, #tpu.memory_space<vmem>>, vector<1x1xf32>
      %264 = vector.broadcast %263 : vector<1x1xf32> to vector<8x1xf32>
      %265 = arith.addf %262, %264 : vector<8x1xf32>
      %266 = arith.negf %265 : vector<8x1xf32>
      %267 = math.exp %266 : vector<8x1xf32>
      %cst_148 = arith.constant 1.000000e+00 : f32
      %268 = vector.broadcast %cst_148 : f32 to vector<8x1xf32>
      %269 = arith.addf %268, %267 : vector<8x1xf32>
      %270 = arith.divf %268, %269 : vector<8x1xf32>
      %271 = vector.shape_cast %270 : vector<8x1xf32> to vector<1x8x1xf32>
      %cst_149 = arith.constant dense<0.000000e+00> : vector<1xf32>
      %272 = vector.multi_reduction <add>, %271, %cst_149 [1, 2] : vector<1x8x1xf32> to vector<1xf32>
      %273 = vector.shape_cast %272 : vector<1xf32> to vector<1x1x1xf32>
      %274 = vector.extract %273[0, 0, 0] : f32 from vector<1x1x1xf32>
      %c0_150 = arith.constant 0 : index
      %c0_151 = arith.constant 0 : index
      %275 = vector.load %arg21[%c0_150, %c0_151] : memref<8x32xf32, #tpu.memory_space<vmem>>, vector<8x32xf32>
      tpu.vector_store %arg21[%c0_150, %c0_151], %259 {strides = array<i32>} : memref<8x32xf32, #tpu.memory_space<vmem>>, vector<8x32xf32>,
      %c0_152 = arith.constant 0 : index
      %c0_153 = arith.constant 0 : index
      %276 = vector.load %arg22[%c0_152, %c0_153] : memref<8x32xf32, #tpu.memory_space<vmem>>, vector<8x32xf32>
      tpu.vector_store %arg22[%c0_152, %c0_153], %259 {strides = array<i32>} : memref<8x32xf32, #tpu.memory_space<vmem>>, vector<8x32xf32>,
      %277 = arith.cmpf oge, %274, %cst_17 : f32
      %c1_i32 = arith.constant 1 : i32
      %c0_i32_154 = arith.constant 0 : i32
      %278 = arith.select %277, %c1_i32, %c0_i32_154 : i32
      %c0_155 = arith.constant 0 : index
      %279 = memref.load %arg23[%c0_155] : memref<1xi32, #tpu.memory_space<smem>>
      memref.store %278, %arg23[%c0_155] : memref<1xi32, #tpu.memory_space<smem>>
    } else {
    }
    %c0_19 = arith.constant 0 : index
    %21 = memref.load %arg23[%c0_19] : memref<1xi32, #tpu.memory_space<smem>>
    %c0_i32_20 = arith.constant 0 : i32
    %22 = arith.cmpi eq, %21, %c0_i32_20 : i32
    %23 = arith.extui %22 : i1 to i32
    %cst_21 = arith.constant 4.000000e+00 : f32
    %c0_i32_22 = arith.constant 0 : i32
    %24 = arith.cmpi ne, %23, %c0_i32_22 : i32
    scf.if %24 {
      %c0_30 = arith.constant 0 : index
      %c0_31 = arith.constant 0 : index
      %33 = vector.load %arg22[%c0_30, %c0_31] : memref<8x32xf32, #tpu.memory_space<vmem>>, vector<8x32xf32>
      %34 = arith.addf %9, %33 : vector<8x32xf32>
      %35 = arith.truncf %34 : vector<8x32xf32> to vector<8x32xbf16>
      %c0_32 = arith.constant 0 : index
      %c0_33 = arith.constant 0 : index
      %36 = vector.load %arg4[%c0_32, %c0_33] : memref<32x512xbf16, #tpu.memory_space<vmem>>, vector<32x512xbf16>
      %cst_34 = arith.constant dense<0.000000e+00> : vector<8x512xf32>
      %37 = tpu.matmul %35, %36, %cst_34 {dimension_numbers = #tpu.dot_dimension_numbers<[1], [0], [0], [1], [0, 0, 1, 1], [], []>} : vector<8x32xbf16>, vector<32x512xbf16>, vector<8x512xf32> -> vector<8x512xf32>
      %c0_35 = arith.constant 0 : index
      %c0_36 = arith.constant 0 : index
      %38 = vector.load %arg5[%c0_35, %c0_36] : memref<1x512xf32, #tpu.memory_space<vmem>>, vector<1x512xf32>
      %39 = vector.broadcast %38 : vector<1x512xf32> to vector<8x512xf32>
      %40 = arith.addf %37, %39 : vector<8x512xf32>
      %41 = math.tanh %40 : vector<8x512xf32>
      %42 = vector.extract_strided_slice %41 {offsets = [0, 0], sizes = [8, 256], strides = [1, 1]} : vector<8x512xf32> to vector<8x256xf32>
      %43 = arith.truncf %42 : vector<8x256xf32> to vector<8x256xbf16>
      %c0_37 = arith.constant 0 : index
      %c0_38 = arith.constant 0 : index
      %c0_39 = arith.constant 0 : index
      %44 = vector.load %arg6[%c0_37, %c0_38, %c0_39] : memref<2x256x128xbf16, #tpu.memory_space<vmem>>, vector<1x256x128xbf16>
      %45 = vector.shape_cast %44 : vector<1x256x128xbf16> to vector<256x128xbf16>
      %cst_40 = arith.constant dense<0.000000e+00> : vector<8x128xf32>
      %46 = tpu.matmul %43, %45, %cst_40 {dimension_numbers = #tpu.dot_dimension_numbers<[1], [0], [0], [1], [0, 0, 1, 1], [], []>} : vector<8x256xbf16>, vector<256x128xbf16>, vector<8x128xf32> -> vector<8x128xf32>
      %c0_41 = arith.constant 0 : index
      %c0_42 = arith.constant 0 : index
      %c0_43 = arith.constant 0 : index
      %47 = vector.load %arg7[%c0_41, %c0_42, %c0_43] : memref<2x1x128xf32, #tpu.memory_space<vmem>>, vector<1x1x128xf32>
      %48 = vector.shape_cast %47 : vector<1x1x128xf32> to vector<1x128xf32>
      %49 = vector.broadcast %48 : vector<1x128xf32> to vector<8x128xf32>
      %50 = arith.addf %46, %49 : vector<8x128xf32>
      %51 = math.tanh %50 : vector<8x128xf32>
      %52 = arith.truncf %51 : vector<8x128xf32> to vector<8x128xbf16>
      %c0_44 = arith.constant 0 : index
      %c0_45 = arith.constant 0 : index
      %c0_46 = arith.constant 0 : index
      %53 = vector.load %arg8[%c0_44, %c0_45, %c0_46] : memref<2x128x128xbf16, #tpu.memory_space<vmem>>, vector<1x128x128xbf16>
      %54 = vector.shape_cast %53 : vector<1x128x128xbf16> to vector<128x128xbf16>
      %cst_47 = arith.constant dense<0.000000e+00> : vector<8x128xf32>
      %55 = tpu.matmul %52, %54, %cst_47 {dimension_numbers = #tpu.dot_dimension_numbers<[1], [0], [0], [1], [0, 0, 1, 1], [], []>} : vector<8x128xbf16>, vector<128x128xbf16>, vector<8x128xf32> -> vector<8x128xf32>
      %c0_48 = arith.constant 0 : index
      %c0_49 = arith.constant 0 : index
      %c0_50 = arith.constant 0 : index
      %56 = vector.load %arg9[%c0_48, %c0_49, %c0_50] : memref<2x1x128xf32, #tpu.memory_space<vmem>>, vector<1x1x128xf32>
      %57 = vector.shape_cast %56 : vector<1x1x128xf32> to vector<1x128xf32>
      %58 = vector.broadcast %57 : vector<1x128xf32> to vector<8x128xf32>
      %59 = arith.addf %55, %58 : vector<8x128xf32>
      %60 = arith.negf %59 : vector<8x128xf32>
      %61 = math.exp %60 : vector<8x128xf32>
      %cst_51 = arith.constant 1.000000e+00 : f32
      %62 = vector.broadcast %cst_51 : f32 to vector<8x128xf32>
      %63 = arith.addf %62, %61 : vector<8x128xf32>
      %64 = arith.divf %62, %63 : vector<8x128xf32>
      %65 = math.tanh %59 : vector<8x128xf32>
      %66 = vector.extract_strided_slice %59 {offsets = [0, 0], sizes = [8, 32], strides = [1, 1]} : vector<8x128xf32> to vector<8x32xf32>
      %cst_52 = arith.constant 0.000000e+00 : f32
      %67 = vector.broadcast %cst_52 : f32 to vector<8x32xf32>
      %68 = arith.maximumf %66, %67 : vector<8x32xf32>
      %69 = vector.extract_strided_slice %64 {offsets = [0, 32], sizes = [8, 32], strides = [1, 1]} : vector<8x128xf32> to vector<8x32xf32>
      %70 = vector.extract_strided_slice %65 {offsets = [0, 64], sizes = [8, 32], strides = [1, 1]} : vector<8x128xf32> to vector<8x32xf32>
      %71 = vector.extract_strided_slice %64 {offsets = [0, 96], sizes = [8, 32], strides = [1, 1]} : vector<8x128xf32> to vector<8x32xf32>
      %72 = arith.mulf %69, %70 : vector<8x32xf32>
      %73 = math.tanh %72 : vector<8x32xf32>
      %74 = arith.mulf %71, %73 : vector<8x32xf32>
      %75 = arith.addf %68, %74 : vector<8x32xf32>
      %76 = arith.truncf %75 : vector<8x32xf32> to vector<8x32xbf16>
      %c0_53 = arith.constant 0 : index
      %c0_54 = arith.constant 0 : index
      %c0_55 = arith.constant 0 : index
      %77 = vector.load %arg10[%c0_53, %c0_54, %c0_55] : memref<2x32x96xbf16, #tpu.memory_space<vmem>>, vector<1x32x96xbf16>
      %78 = vector.shape_cast %77 : vector<1x32x96xbf16> to vector<32x96xbf16>
      %cst_56 = arith.constant dense<0.000000e+00> : vector<8x96xf32>
      %79 = tpu.matmul %76, %78, %cst_56 {dimension_numbers = #tpu.dot_dimension_numbers<[1], [0], [0], [1], [0, 0, 1, 1], [], []>} : vector<8x32xbf16>, vector<32x96xbf16>, vector<8x96xf32> -> vector<8x96xf32>
      %c0_57 = arith.constant 0 : index
      %c0_58 = arith.constant 0 : index
      %c0_59 = arith.constant 0 : index
      %80 = vector.load %arg11[%c0_57, %c0_58, %c0_59] : memref<2x1x96xf32, #tpu.memory_space<vmem>>, vector<1x1x96xf32>
      %81 = vector.shape_cast %80 : vector<1x1x96xf32> to vector<1x96xf32>
      %82 = vector.broadcast %81 : vector<1x96xf32> to vector<8x96xf32>
      %83 = arith.addf %79, %82 : vector<8x96xf32>
      %84 = vector.extract_strided_slice %83 {offsets = [0, 0], sizes = [8, 32], strides = [1, 1]} : vector<8x96xf32> to vector<8x32xf32>
      %85 = vector.extract_strided_slice %83 {offsets = [0, 32], sizes = [8, 32], strides = [1, 1]} : vector<8x96xf32> to vector<8x32xf32>
      %86 = vector.extract_strided_slice %83 {offsets = [0, 64], sizes = [8, 32], strides = [1, 1]} : vector<8x96xf32> to vector<8x32xf32>
      %87 = arith.truncf %84 : vector<8x32xf32> to vector<8x32xbf16>
      %88 = arith.truncf %85 : vector<8x32xf32> to vector<8x32xbf16>
      %cst_60 = arith.constant dense<0.000000e+00> : vector<8x8xf32>
      %89 = tpu.matmul %87, %88, %cst_60 {dimension_numbers = #tpu.dot_dimension_numbers<[1], [1], [0], [0], [0, 0, 1, 0], [], []>} : vector<8x32xbf16>, vector<8x32xbf16>, vector<8x8xf32> -> vector<8x8xf32>
      %cst_61 = arith.constant 0.176776692 : f32
      %90 = vector.broadcast %cst_61 : f32 to vector<8x8xf32>
      %91 = arith.mulf %89, %90 : vector<8x8xf32>
      %cst_62 = arith.constant dense<0xFF800000> : vector<8xf32>
      %92 = vector.multi_reduction <maximumf>, %91, %cst_62 [1] : vector<8x8xf32> to vector<8xf32>
      %93 = vector.shape_cast %92 : vector<8xf32> to vector<8x1xf32>
      %94 = vector.broadcast %93 : vector<8x1xf32> to vector<8x8xf32>
      %95 = arith.subf %91, %94 : vector<8x8xf32>
      %96 = math.exp %95 : vector<8x8xf32>
      %cst_63 = arith.constant dense<0.000000e+00> : vector<8xf32>
      %97 = vector.multi_reduction <add>, %96, %cst_63 [1] : vector<8x8xf32> to vector<8xf32>
      %98 = vector.shape_cast %97 : vector<8xf32> to vector<8x1xf32>
      %99 = tpu.reciprocal %98 {approx = true} : vector<8x1xf32> -> vector<8x1xf32>
      %100 = vector.broadcast %99 : vector<8x1xf32> to vector<8x8xf32>
      %101 = arith.mulf %96, %100 : vector<8x8xf32>
      %102 = arith.truncf %101 : vector<8x8xf32> to vector<8x8xbf16>
      %103 = arith.truncf %86 : vector<8x32xf32> to vector<8x32xbf16>
      %cst_64 = arith.constant dense<0.000000e+00> : vector<8x32xf32>
      %104 = tpu.matmul %102, %103, %cst_64 {dimension_numbers = #tpu.dot_dimension_numbers<[1], [0], [0], [1], [0, 0, 1, 1], [], []>} : vector<8x8xbf16>, vector<8x32xbf16>, vector<8x32xf32> -> vector<8x32xf32>
      %c0_65 = arith.constant 0 : index
      %c0_66 = arith.constant 0 : index
      %c0_67 = arith.constant 0 : index
      %105 = vector.load %arg12[%c0_65, %c0_66, %c0_67] : memref<2x32x32xbf16, #tpu.memory_space<vmem>>, vector<1x32x32xbf16>
      %106 = vector.shape_cast %105 : vector<1x32x32xbf16> to vector<32x32xbf16>
      %cst_68 = arith.constant dense<0.000000e+00> : vector<8x32xf32>
      %107 = tpu.matmul %76, %106, %cst_68 {dimension_numbers = #tpu.dot_dimension_numbers<[1], [0], [0], [1], [0, 0, 1, 1], [], []>} : vector<8x32xbf16>, vector<32x32xbf16>, vector<8x32xf32> -> vector<8x32xf32>
      %108 = arith.truncf %104 : vector<8x32xf32> to vector<8x32xbf16>
      %c0_69 = arith.constant 0 : index
      %c0_70 = arith.constant 0 : index
      %c0_71 = arith.constant 0 : index
      %109 = vector.load %arg13[%c0_69, %c0_70, %c0_71] : memref<2x32x32xbf16, #tpu.memory_space<vmem>>, vector<1x32x32xbf16>
      %110 = vector.shape_cast %109 : vector<1x32x32xbf16> to vector<32x32xbf16>
      %cst_72 = arith.constant dense<0.000000e+00> : vector<8x32xf32>
      %111 = tpu.matmul %108, %110, %cst_72 {dimension_numbers = #tpu.dot_dimension_numbers<[1], [0], [0], [1], [0, 0, 1, 1], [], []>} : vector<8x32xbf16>, vector<32x32xbf16>, vector<8x32xf32> -> vector<8x32xf32>
      %112 = arith.addf %107, %111 : vector<8x32xf32>
      %c0_73 = arith.constant 0 : index
      %c0_74 = arith.constant 0 : index
      %c0_75 = arith.constant 0 : index
      %113 = vector.load %arg14[%c0_73, %c0_74, %c0_75] : memref<2x1x32xf32, #tpu.memory_space<vmem>>, vector<1x1x32xf32>
      %114 = vector.shape_cast %113 : vector<1x1x32xf32> to vector<1x32xf32>
      %115 = vector.broadcast %114 : vector<1x32xf32> to vector<8x32xf32>
      %116 = arith.addf %112, %115 : vector<8x32xf32>
      %117 = arith.negf %116 : vector<8x32xf32>
      %118 = math.exp %117 : vector<8x32xf32>
      %cst_76 = arith.constant 1.000000e+00 : f32
      %119 = vector.broadcast %cst_76 : f32 to vector<8x32xf32>
      %120 = arith.addf %119, %118 : vector<8x32xf32>
      %121 = arith.divf %119, %120 : vector<8x32xf32>
      %122 = arith.mulf %121, %104 : vector<8x32xf32>
      %cst_77 = arith.constant dense<0.000000e+00> : vector<8xf32>
      %123 = vector.multi_reduction <add>, %122, %cst_77 [1] : vector<8x32xf32> to vector<8xf32>
      %124 = vector.shape_cast %123 : vector<8xf32> to vector<8x1xf32>
      %cst_78 = arith.constant 3.200000e+01 : f32
      %125 = vector.broadcast %cst_78 : f32 to vector<8x1xf32>
      %126 = arith.divf %124, %125 : vector<8x1xf32>
      %127 = vector.broadcast %126 : vector<8x1xf32> to vector<8x32xf32>
      %128 = arith.subf %122, %127 : vector<8x32xf32>
      %129 = arith.mulf %128, %128 : vector<8x32xf32>
      %cst_79 = arith.constant dense<0.000000e+00> : vector<8xf32>
      %130 = vector.multi_reduction <add>, %129, %cst_79 [1] : vector<8x32xf32> to vector<8xf32>
      %131 = vector.shape_cast %130 : vector<8xf32> to vector<8x1xf32>
      %cst_80 = arith.constant 3.200000e+01 : f32
      %132 = vector.broadcast %cst_80 : f32 to vector<8x1xf32>
      %133 = arith.divf %131, %132 : vector<8x1xf32>
      %cst_81 = arith.constant 9.99999974E-6 : f32
      %134 = vector.broadcast %cst_81 : f32 to vector<8x1xf32>
      %135 = arith.addf %133, %134 : vector<8x1xf32>
      %136 = math.rsqrt %135 : vector<8x1xf32>
      %137 = vector.broadcast %136 : vector<8x1xf32> to vector<8x32xf32>
      %138 = arith.mulf %128, %137 : vector<8x32xf32>
      %c0_82 = arith.constant 0 : index
      %c0_83 = arith.constant 0 : index
      %c0_84 = arith.constant 0 : index
      %139 = vector.load %arg15[%c0_82, %c0_83, %c0_84] : memref<2x1x32xf32, #tpu.memory_space<vmem>>, vector<1x1x32xf32>
      %140 = vector.shape_cast %139 : vector<1x1x32xf32> to vector<1x32xf32>
      %141 = vector.broadcast %140 : vector<1x32xf32> to vector<8x32xf32>
      %142 = arith.mulf %138, %141 : vector<8x32xf32>
      %c0_85 = arith.constant 0 : index
      %c0_86 = arith.constant 0 : index
      %c0_87 = arith.constant 0 : index
      %143 = vector.load %arg16[%c0_85, %c0_86, %c0_87] : memref<2x1x32xf32, #tpu.memory_space<vmem>>, vector<1x1x32xf32>
      %144 = vector.shape_cast %143 : vector<1x1x32xf32> to vector<1x32xf32>
      %145 = vector.broadcast %144 : vector<1x32xf32> to vector<8x32xf32>
      %146 = arith.addf %142, %145 : vector<8x32xf32>
      %147 = vector.extract_strided_slice %41 {offsets = [0, 256], sizes = [8, 256], strides = [1, 1]} : vector<8x512xf32> to vector<8x256xf32>
      %148 = arith.truncf %147 : vector<8x256xf32> to vector<8x256xbf16>
      %c1 = arith.constant 1 : index
      %c0_88 = arith.constant 0 : index
      %c0_89 = arith.constant 0 : index
      %149 = vector.load %arg6[%c1, %c0_88, %c0_89] : memref<2x256x128xbf16, #tpu.memory_space<vmem>>, vector<1x256x128xbf16>
      %150 = vector.shape_cast %149 : vector<1x256x128xbf16> to vector<256x128xbf16>
      %cst_90 = arith.constant dense<0.000000e+00> : vector<8x128xf32>
      %151 = tpu.matmul %148, %150, %cst_90 {dimension_numbers = #tpu.dot_dimension_numbers<[1], [0], [0], [1], [0, 0, 1, 1], [], []>} : vector<8x256xbf16>, vector<256x128xbf16>, vector<8x128xf32> -> vector<8x128xf32>
      %c1_91 = arith.constant 1 : index
      %c0_92 = arith.constant 0 : index
      %c0_93 = arith.constant 0 : index
      %152 = vector.load %arg7[%c1_91, %c0_92, %c0_93] : memref<2x1x128xf32, #tpu.memory_space<vmem>>, vector<1x1x128xf32>
      %153 = vector.shape_cast %152 : vector<1x1x128xf32> to vector<1x128xf32>
      %154 = vector.broadcast %153 : vector<1x128xf32> to vector<8x128xf32>
      %155 = arith.addf %151, %154 : vector<8x128xf32>
      %156 = math.tanh %155 : vector<8x128xf32>
      %157 = arith.truncf %156 : vector<8x128xf32> to vector<8x128xbf16>
      %c1_94 = arith.constant 1 : index
      %c0_95 = arith.constant 0 : index
      %c0_96 = arith.constant 0 : index
      %158 = vector.load %arg8[%c1_94, %c0_95, %c0_96] : memref<2x128x128xbf16, #tpu.memory_space<vmem>>, vector<1x128x128xbf16>
      %159 = vector.shape_cast %158 : vector<1x128x128xbf16> to vector<128x128xbf16>
      %cst_97 = arith.constant dense<0.000000e+00> : vector<8x128xf32>
      %160 = tpu.matmul %157, %159, %cst_97 {dimension_numbers = #tpu.dot_dimension_numbers<[1], [0], [0], [1], [0, 0, 1, 1], [], []>} : vector<8x128xbf16>, vector<128x128xbf16>, vector<8x128xf32> -> vector<8x128xf32>
      %c1_98 = arith.constant 1 : index
      %c0_99 = arith.constant 0 : index
      %c0_100 = arith.constant 0 : index
      %161 = vector.load %arg9[%c1_98, %c0_99, %c0_100] : memref<2x1x128xf32, #tpu.memory_space<vmem>>, vector<1x1x128xf32>
      %162 = vector.shape_cast %161 : vector<1x1x128xf32> to vector<1x128xf32>
      %163 = vector.broadcast %162 : vector<1x128xf32> to vector<8x128xf32>
      %164 = arith.addf %160, %163 : vector<8x128xf32>
      %165 = arith.negf %164 : vector<8x128xf32>
      %166 = math.exp %165 : vector<8x128xf32>
      %cst_101 = arith.constant 1.000000e+00 : f32
      %167 = vector.broadcast %cst_101 : f32 to vector<8x128xf32>
      %168 = arith.addf %167, %166 : vector<8x128xf32>
      %169 = arith.divf %167, %168 : vector<8x128xf32>
      %170 = math.tanh %164 : vector<8x128xf32>
      %171 = vector.extract_strided_slice %164 {offsets = [0, 0], sizes = [8, 32], strides = [1, 1]} : vector<8x128xf32> to vector<8x32xf32>
      %cst_102 = arith.constant 0.000000e+00 : f32
      %172 = vector.broadcast %cst_102 : f32 to vector<8x32xf32>
      %173 = arith.maximumf %171, %172 : vector<8x32xf32>
      %174 = vector.extract_strided_slice %169 {offsets = [0, 32], sizes = [8, 32], strides = [1, 1]} : vector<8x128xf32> to vector<8x32xf32>
      %175 = vector.extract_strided_slice %170 {offsets = [0, 64], sizes = [8, 32], strides = [1, 1]} : vector<8x128xf32> to vector<8x32xf32>
      %176 = vector.extract_strided_slice %169 {offsets = [0, 96], sizes = [8, 32], strides = [1, 1]} : vector<8x128xf32> to vector<8x32xf32>
      %177 = arith.mulf %174, %175 : vector<8x32xf32>
      %178 = math.tanh %177 : vector<8x32xf32>
      %179 = arith.mulf %176, %178 : vector<8x32xf32>
      %180 = arith.addf %173, %179 : vector<8x32xf32>
      %181 = arith.truncf %180 : vector<8x32xf32> to vector<8x32xbf16>
      %c1_103 = arith.constant 1 : index
      %c0_104 = arith.constant 0 : index
      %c0_105 = arith.constant 0 : index
      %182 = vector.load %arg10[%c1_103, %c0_104, %c0_105] : memref<2x32x96xbf16, #tpu.memory_space<vmem>>, vector<1x32x96xbf16>
      %183 = vector.shape_cast %182 : vector<1x32x96xbf16> to vector<32x96xbf16>
      %cst_106 = arith.constant dense<0.000000e+00> : vector<8x96xf32>
      %184 = tpu.matmul %181, %183, %cst_106 {dimension_numbers = #tpu.dot_dimension_numbers<[1], [0], [0], [1], [0, 0, 1, 1], [], []>} : vector<8x32xbf16>, vector<32x96xbf16>, vector<8x96xf32> -> vector<8x96xf32>
      %c1_107 = arith.constant 1 : index
      %c0_108 = arith.constant 0 : index
      %c0_109 = arith.constant 0 : index
      %185 = vector.load %arg11[%c1_107, %c0_108, %c0_109] : memref<2x1x96xf32, #tpu.memory_space<vmem>>, vector<1x1x96xf32>
      %186 = vector.shape_cast %185 : vector<1x1x96xf32> to vector<1x96xf32>
      %187 = vector.broadcast %186 : vector<1x96xf32> to vector<8x96xf32>
      %188 = arith.addf %184, %187 : vector<8x96xf32>
      %189 = vector.extract_strided_slice %188 {offsets = [0, 0], sizes = [8, 32], strides = [1, 1]} : vector<8x96xf32> to vector<8x32xf32>
      %190 = vector.extract_strided_slice %188 {offsets = [0, 32], sizes = [8, 32], strides = [1, 1]} : vector<8x96xf32> to vector<8x32xf32>
      %191 = vector.extract_strided_slice %188 {offsets = [0, 64], sizes = [8, 32], strides = [1, 1]} : vector<8x96xf32> to vector<8x32xf32>
      %192 = arith.truncf %189 : vector<8x32xf32> to vector<8x32xbf16>
      %193 = arith.truncf %190 : vector<8x32xf32> to vector<8x32xbf16>
      %cst_110 = arith.constant dense<0.000000e+00> : vector<8x8xf32>
      %194 = tpu.matmul %192, %193, %cst_110 {dimension_numbers = #tpu.dot_dimension_numbers<[1], [1], [0], [0], [0, 0, 1, 0], [], []>} : vector<8x32xbf16>, vector<8x32xbf16>, vector<8x8xf32> -> vector<8x8xf32>
      %cst_111 = arith.constant 0.176776692 : f32
      %195 = vector.broadcast %cst_111 : f32 to vector<8x8xf32>
      %196 = arith.mulf %194, %195 : vector<8x8xf32>
      %cst_112 = arith.constant dense<0xFF800000> : vector<8xf32>
      %197 = vector.multi_reduction <maximumf>, %196, %cst_112 [1] : vector<8x8xf32> to vector<8xf32>
      %198 = vector.shape_cast %197 : vector<8xf32> to vector<8x1xf32>
      %199 = vector.broadcast %198 : vector<8x1xf32> to vector<8x8xf32>
      %200 = arith.subf %196, %199 : vector<8x8xf32>
      %201 = math.exp %200 : vector<8x8xf32>
      %cst_113 = arith.constant dense<0.000000e+00> : vector<8xf32>
      %202 = vector.multi_reduction <add>, %201, %cst_113 [1] : vector<8x8xf32> to vector<8xf32>
      %203 = vector.shape_cast %202 : vector<8xf32> to vector<8x1xf32>
      %204 = tpu.reciprocal %203 {approx = true} : vector<8x1xf32> -> vector<8x1xf32>
      %205 = vector.broadcast %204 : vector<8x1xf32> to vector<8x8xf32>
      %206 = arith.mulf %201, %205 : vector<8x8xf32>
      %207 = arith.truncf %206 : vector<8x8xf32> to vector<8x8xbf16>
      %208 = arith.truncf %191 : vector<8x32xf32> to vector<8x32xbf16>
      %cst_114 = arith.constant dense<0.000000e+00> : vector<8x32xf32>
      %209 = tpu.matmul %207, %208, %cst_114 {dimension_numbers = #tpu.dot_dimension_numbers<[1], [0], [0], [1], [0, 0, 1, 1], [], []>} : vector<8x8xbf16>, vector<8x32xbf16>, vector<8x32xf32> -> vector<8x32xf32>
      %c1_115 = arith.constant 1 : index
      %c0_116 = arith.constant 0 : index
      %c0_117 = arith.constant 0 : index
      %210 = vector.load %arg12[%c1_115, %c0_116, %c0_117] : memref<2x32x32xbf16, #tpu.memory_space<vmem>>, vector<1x32x32xbf16>
      %211 = vector.shape_cast %210 : vector<1x32x32xbf16> to vector<32x32xbf16>
      %cst_118 = arith.constant dense<0.000000e+00> : vector<8x32xf32>
      %212 = tpu.matmul %181, %211, %cst_118 {dimension_numbers = #tpu.dot_dimension_numbers<[1], [0], [0], [1], [0, 0, 1, 1], [], []>} : vector<8x32xbf16>, vector<32x32xbf16>, vector<8x32xf32> -> vector<8x32xf32>
      %213 = arith.truncf %209 : vector<8x32xf32> to vector<8x32xbf16>
      %c1_119 = arith.constant 1 : index
      %c0_120 = arith.constant 0 : index
      %c0_121 = arith.constant 0 : index
      %214 = vector.load %arg13[%c1_119, %c0_120, %c0_121] : memref<2x32x32xbf16, #tpu.memory_space<vmem>>, vector<1x32x32xbf16>
      %215 = vector.shape_cast %214 : vector<1x32x32xbf16> to vector<32x32xbf16>
      %cst_122 = arith.constant dense<0.000000e+00> : vector<8x32xf32>
      %216 = tpu.matmul %213, %215, %cst_122 {dimension_numbers = #tpu.dot_dimension_numbers<[1], [0], [0], [1], [0, 0, 1, 1], [], []>} : vector<8x32xbf16>, vector<32x32xbf16>, vector<8x32xf32> -> vector<8x32xf32>
      %217 = arith.addf %212, %216 : vector<8x32xf32>
      %c1_123 = arith.constant 1 : index
      %c0_124 = arith.constant 0 : index
      %c0_125 = arith.constant 0 : index
      %218 = vector.load %arg14[%c1_123, %c0_124, %c0_125] : memref<2x1x32xf32, #tpu.memory_space<vmem>>, vector<1x1x32xf32>
      %219 = vector.shape_cast %218 : vector<1x1x32xf32> to vector<1x32xf32>
      %220 = vector.broadcast %219 : vector<1x32xf32> to vector<8x32xf32>
      %221 = arith.addf %217, %220 : vector<8x32xf32>
      %222 = arith.negf %221 : vector<8x32xf32>
      %223 = math.exp %222 : vector<8x32xf32>
      %cst_126 = arith.constant 1.000000e+00 : f32
      %224 = vector.broadcast %cst_126 : f32 to vector<8x32xf32>
      %225 = arith.addf %224, %223 : vector<8x32xf32>
      %226 = arith.divf %224, %225 : vector<8x32xf32>
      %227 = arith.mulf %226, %209 : vector<8x32xf32>
      %cst_127 = arith.constant dense<0.000000e+00> : vector<8xf32>
      %228 = vector.multi_reduction <add>, %227, %cst_127 [1] : vector<8x32xf32> to vector<8xf32>
      %229 = vector.shape_cast %228 : vector<8xf32> to vector<8x1xf32>
      %cst_128 = arith.constant 3.200000e+01 : f32
      %230 = vector.broadcast %cst_128 : f32 to vector<8x1xf32>
      %231 = arith.divf %229, %230 : vector<8x1xf32>
      %232 = vector.broadcast %231 : vector<8x1xf32> to vector<8x32xf32>
      %233 = arith.subf %227, %232 : vector<8x32xf32>
      %234 = arith.mulf %233, %233 : vector<8x32xf32>
      %cst_129 = arith.constant dense<0.000000e+00> : vector<8xf32>
      %235 = vector.multi_reduction <add>, %234, %cst_129 [1] : vector<8x32xf32> to vector<8xf32>
      %236 = vector.shape_cast %235 : vector<8xf32> to vector<8x1xf32>
      %cst_130 = arith.constant 3.200000e+01 : f32
      %237 = vector.broadcast %cst_130 : f32 to vector<8x1xf32>
      %238 = arith.divf %236, %237 : vector<8x1xf32>
      %cst_131 = arith.constant 9.99999974E-6 : f32
      %239 = vector.broadcast %cst_131 : f32 to vector<8x1xf32>
      %240 = arith.addf %238, %239 : vector<8x1xf32>
      %241 = math.rsqrt %240 : vector<8x1xf32>
      %242 = vector.broadcast %241 : vector<8x1xf32> to vector<8x32xf32>
      %243 = arith.mulf %233, %242 : vector<8x32xf32>
      %c1_132 = arith.constant 1 : index
      %c0_133 = arith.constant 0 : index
      %c0_134 = arith.constant 0 : index
      %244 = vector.load %arg15[%c1_132, %c0_133, %c0_134] : memref<2x1x32xf32, #tpu.memory_space<vmem>>, vector<1x1x32xf32>
      %245 = vector.shape_cast %244 : vector<1x1x32xf32> to vector<1x32xf32>
      %246 = vector.broadcast %245 : vector<1x32xf32> to vector<8x32xf32>
      %247 = arith.mulf %243, %246 : vector<8x32xf32>
      %c1_135 = arith.constant 1 : index
      %c0_136 = arith.constant 0 : index
      %c0_137 = arith.constant 0 : index
      %248 = vector.load %arg16[%c1_135, %c0_136, %c0_137] : memref<2x1x32xf32, #tpu.memory_space<vmem>>, vector<1x1x32xf32>
      %249 = vector.shape_cast %248 : vector<1x1x32xf32> to vector<1x32xf32>
      %250 = vector.broadcast %249 : vector<1x32xf32> to vector<8x32xf32>
      %251 = arith.addf %247, %250 : vector<8x32xf32>
      %252 = tpu.concatenate %146, %251 in 1 : vector<8x32xf32>, vector<8x32xf32> -> vector<8x64xf32>
      %253 = arith.truncf %252 : vector<8x64xf32> to vector<8x64xbf16>
      %c0_138 = arith.constant 0 : index
      %c0_139 = arith.constant 0 : index
      %254 = vector.load %arg17[%c0_138, %c0_139] : memref<64x32xbf16, #tpu.memory_space<vmem>>, vector<64x32xbf16>
      %cst_140 = arith.constant dense<0.000000e+00> : vector<8x32xf32>
      %255 = tpu.matmul %253, %254, %cst_140 {dimension_numbers = #tpu.dot_dimension_numbers<[1], [0], [0], [1], [0, 0, 1, 1], [], []>} : vector<8x64xbf16>, vector<64x32xbf16>, vector<8x32xf32> -> vector<8x32xf32>
      %c0_141 = arith.constant 0 : index
      %c0_142 = arith.constant 0 : index
      %256 = vector.load %arg18[%c0_141, %c0_142] : memref<1x32xf32, #tpu.memory_space<vmem>>, vector<1x32xf32>
      %257 = vector.broadcast %256 : vector<1x32xf32> to vector<8x32xf32>
      %258 = arith.addf %255, %257 : vector<8x32xf32>
      %259 = math.tanh %258 : vector<8x32xf32>
      %260 = arith.truncf %259 : vector<8x32xf32> to vector<8x32xbf16>
      %c0_143 = arith.constant 0 : index
      %c0_144 = arith.constant 0 : index
      %261 = vector.load %arg19[%c0_143, %c0_144] : memref<32x1xbf16, #tpu.memory_space<vmem>>, vector<32x1xbf16>
      %cst_145 = arith.constant dense<0.000000e+00> : vector<8x1xf32>
      %262 = tpu.matmul %260, %261, %cst_145 {dimension_numbers = #tpu.dot_dimension_numbers<[1], [0], [0], [1], [0, 0, 1, 1], [], []>} : vector<8x32xbf16>, vector<32x1xbf16>, vector<8x1xf32> -> vector<8x1xf32>
      %c0_146 = arith.constant 0 : index
      %c0_147 = arith.constant 0 : index
      %263 = vector.load %arg20[%c0_146, %c0_147] : memref<1x1xf32, #tpu.memory_space<vmem>>, vector<1x1xf32>
      %264 = vector.broadcast %263 : vector<1x1xf32> to vector<8x1xf32>
      %265 = arith.addf %262, %264 : vector<8x1xf32>
      %266 = arith.negf %265 : vector<8x1xf32>
      %267 = math.exp %266 : vector<8x1xf32>
      %cst_148 = arith.constant 1.000000e+00 : f32
      %268 = vector.broadcast %cst_148 : f32 to vector<8x1xf32>
      %269 = arith.addf %268, %267 : vector<8x1xf32>
      %270 = arith.divf %268, %269 : vector<8x1xf32>
      %271 = vector.shape_cast %270 : vector<8x1xf32> to vector<1x8x1xf32>
      %cst_149 = arith.constant dense<0.000000e+00> : vector<1xf32>
      %272 = vector.multi_reduction <add>, %271, %cst_149 [1, 2] : vector<1x8x1xf32> to vector<1xf32>
      %273 = vector.shape_cast %272 : vector<1xf32> to vector<1x1x1xf32>
      %274 = vector.extract %273[0, 0, 0] : f32 from vector<1x1x1xf32>
      %c0_150 = arith.constant 0 : index
      %c0_151 = arith.constant 0 : index
      %275 = vector.load %arg21[%c0_150, %c0_151] : memref<8x32xf32, #tpu.memory_space<vmem>>, vector<8x32xf32>
      tpu.vector_store %arg21[%c0_150, %c0_151], %259 {strides = array<i32>} : memref<8x32xf32, #tpu.memory_space<vmem>>, vector<8x32xf32>,
      %c0_152 = arith.constant 0 : index
      %c0_153 = arith.constant 0 : index
      %276 = vector.load %arg22[%c0_152, %c0_153] : memref<8x32xf32, #tpu.memory_space<vmem>>, vector<8x32xf32>
      tpu.vector_store %arg22[%c0_152, %c0_153], %259 {strides = array<i32>} : memref<8x32xf32, #tpu.memory_space<vmem>>, vector<8x32xf32>,
      %277 = arith.cmpf oge, %274, %cst_21 : f32
      %c1_i32 = arith.constant 1 : i32
      %c0_i32_154 = arith.constant 0 : i32
      %278 = arith.select %277, %c1_i32, %c0_i32_154 : i32
      %c0_155 = arith.constant 0 : index
      %279 = memref.load %arg23[%c0_155] : memref<1xi32, #tpu.memory_space<smem>>
      memref.store %278, %arg23[%c0_155] : memref<1xi32, #tpu.memory_space<smem>>
    } else {
    }
    %c0_23 = arith.constant 0 : index
    %25 = memref.load %arg23[%c0_23] : memref<1xi32, #tpu.memory_space<smem>>
    %c0_i32_24 = arith.constant 0 : i32
    %26 = arith.cmpi eq, %25, %c0_i32_24 : i32
    %27 = arith.extui %26 : i1 to i32
    %cst_25 = arith.constant 4.000000e+00 : f32
    %c0_i32_26 = arith.constant 0 : i32
    %28 = arith.cmpi ne, %27, %c0_i32_26 : i32
    scf.if %28 {
      %c0_30 = arith.constant 0 : index
      %c0_31 = arith.constant 0 : index
      %33 = vector.load %arg22[%c0_30, %c0_31] : memref<8x32xf32, #tpu.memory_space<vmem>>, vector<8x32xf32>
      %34 = arith.addf %9, %33 : vector<8x32xf32>
      %35 = arith.truncf %34 : vector<8x32xf32> to vector<8x32xbf16>
      %c0_32 = arith.constant 0 : index
      %c0_33 = arith.constant 0 : index
      %36 = vector.load %arg4[%c0_32, %c0_33] : memref<32x512xbf16, #tpu.memory_space<vmem>>, vector<32x512xbf16>
      %cst_34 = arith.constant dense<0.000000e+00> : vector<8x512xf32>
      %37 = tpu.matmul %35, %36, %cst_34 {dimension_numbers = #tpu.dot_dimension_numbers<[1], [0], [0], [1], [0, 0, 1, 1], [], []>} : vector<8x32xbf16>, vector<32x512xbf16>, vector<8x512xf32> -> vector<8x512xf32>
      %c0_35 = arith.constant 0 : index
      %c0_36 = arith.constant 0 : index
      %38 = vector.load %arg5[%c0_35, %c0_36] : memref<1x512xf32, #tpu.memory_space<vmem>>, vector<1x512xf32>
      %39 = vector.broadcast %38 : vector<1x512xf32> to vector<8x512xf32>
      %40 = arith.addf %37, %39 : vector<8x512xf32>
      %41 = math.tanh %40 : vector<8x512xf32>
      %42 = vector.extract_strided_slice %41 {offsets = [0, 0], sizes = [8, 256], strides = [1, 1]} : vector<8x512xf32> to vector<8x256xf32>
      %43 = arith.truncf %42 : vector<8x256xf32> to vector<8x256xbf16>
      %c0_37 = arith.constant 0 : index
      %c0_38 = arith.constant 0 : index
      %c0_39 = arith.constant 0 : index
      %44 = vector.load %arg6[%c0_37, %c0_38, %c0_39] : memref<2x256x128xbf16, #tpu.memory_space<vmem>>, vector<1x256x128xbf16>
      %45 = vector.shape_cast %44 : vector<1x256x128xbf16> to vector<256x128xbf16>
      %cst_40 = arith.constant dense<0.000000e+00> : vector<8x128xf32>
      %46 = tpu.matmul %43, %45, %cst_40 {dimension_numbers = #tpu.dot_dimension_numbers<[1], [0], [0], [1], [0, 0, 1, 1], [], []>} : vector<8x256xbf16>, vector<256x128xbf16>, vector<8x128xf32> -> vector<8x128xf32>
      %c0_41 = arith.constant 0 : index
      %c0_42 = arith.constant 0 : index
      %c0_43 = arith.constant 0 : index
      %47 = vector.load %arg7[%c0_41, %c0_42, %c0_43] : memref<2x1x128xf32, #tpu.memory_space<vmem>>, vector<1x1x128xf32>
      %48 = vector.shape_cast %47 : vector<1x1x128xf32> to vector<1x128xf32>
      %49 = vector.broadcast %48 : vector<1x128xf32> to vector<8x128xf32>
      %50 = arith.addf %46, %49 : vector<8x128xf32>
      %51 = math.tanh %50 : vector<8x128xf32>
      %52 = arith.truncf %51 : vector<8x128xf32> to vector<8x128xbf16>
      %c0_44 = arith.constant 0 : index
      %c0_45 = arith.constant 0 : index
      %c0_46 = arith.constant 0 : index
      %53 = vector.load %arg8[%c0_44, %c0_45, %c0_46] : memref<2x128x128xbf16, #tpu.memory_space<vmem>>, vector<1x128x128xbf16>
      %54 = vector.shape_cast %53 : vector<1x128x128xbf16> to vector<128x128xbf16>
      %cst_47 = arith.constant dense<0.000000e+00> : vector<8x128xf32>
      %55 = tpu.matmul %52, %54, %cst_47 {dimension_numbers = #tpu.dot_dimension_numbers<[1], [0], [0], [1], [0, 0, 1, 1], [], []>} : vector<8x128xbf16>, vector<128x128xbf16>, vector<8x128xf32> -> vector<8x128xf32>
      %c0_48 = arith.constant 0 : index
      %c0_49 = arith.constant 0 : index
      %c0_50 = arith.constant 0 : index
      %56 = vector.load %arg9[%c0_48, %c0_49, %c0_50] : memref<2x1x128xf32, #tpu.memory_space<vmem>>, vector<1x1x128xf32>
      %57 = vector.shape_cast %56 : vector<1x1x128xf32> to vector<1x128xf32>
      %58 = vector.broadcast %57 : vector<1x128xf32> to vector<8x128xf32>
      %59 = arith.addf %55, %58 : vector<8x128xf32>
      %60 = arith.negf %59 : vector<8x128xf32>
      %61 = math.exp %60 : vector<8x128xf32>
      %cst_51 = arith.constant 1.000000e+00 : f32
      %62 = vector.broadcast %cst_51 : f32 to vector<8x128xf32>
      %63 = arith.addf %62, %61 : vector<8x128xf32>
      %64 = arith.divf %62, %63 : vector<8x128xf32>
      %65 = math.tanh %59 : vector<8x128xf32>
      %66 = vector.extract_strided_slice %59 {offsets = [0, 0], sizes = [8, 32], strides = [1, 1]} : vector<8x128xf32> to vector<8x32xf32>
      %cst_52 = arith.constant 0.000000e+00 : f32
      %67 = vector.broadcast %cst_52 : f32 to vector<8x32xf32>
      %68 = arith.maximumf %66, %67 : vector<8x32xf32>
      %69 = vector.extract_strided_slice %64 {offsets = [0, 32], sizes = [8, 32], strides = [1, 1]} : vector<8x128xf32> to vector<8x32xf32>
      %70 = vector.extract_strided_slice %65 {offsets = [0, 64], sizes = [8, 32], strides = [1, 1]} : vector<8x128xf32> to vector<8x32xf32>
      %71 = vector.extract_strided_slice %64 {offsets = [0, 96], sizes = [8, 32], strides = [1, 1]} : vector<8x128xf32> to vector<8x32xf32>
      %72 = arith.mulf %69, %70 : vector<8x32xf32>
      %73 = math.tanh %72 : vector<8x32xf32>
      %74 = arith.mulf %71, %73 : vector<8x32xf32>
      %75 = arith.addf %68, %74 : vector<8x32xf32>
      %76 = arith.truncf %75 : vector<8x32xf32> to vector<8x32xbf16>
      %c0_53 = arith.constant 0 : index
      %c0_54 = arith.constant 0 : index
      %c0_55 = arith.constant 0 : index
      %77 = vector.load %arg10[%c0_53, %c0_54, %c0_55] : memref<2x32x96xbf16, #tpu.memory_space<vmem>>, vector<1x32x96xbf16>
      %78 = vector.shape_cast %77 : vector<1x32x96xbf16> to vector<32x96xbf16>
      %cst_56 = arith.constant dense<0.000000e+00> : vector<8x96xf32>
      %79 = tpu.matmul %76, %78, %cst_56 {dimension_numbers = #tpu.dot_dimension_numbers<[1], [0], [0], [1], [0, 0, 1, 1], [], []>} : vector<8x32xbf16>, vector<32x96xbf16>, vector<8x96xf32> -> vector<8x96xf32>
      %c0_57 = arith.constant 0 : index
      %c0_58 = arith.constant 0 : index
      %c0_59 = arith.constant 0 : index
      %80 = vector.load %arg11[%c0_57, %c0_58, %c0_59] : memref<2x1x96xf32, #tpu.memory_space<vmem>>, vector<1x1x96xf32>
      %81 = vector.shape_cast %80 : vector<1x1x96xf32> to vector<1x96xf32>
      %82 = vector.broadcast %81 : vector<1x96xf32> to vector<8x96xf32>
      %83 = arith.addf %79, %82 : vector<8x96xf32>
      %84 = vector.extract_strided_slice %83 {offsets = [0, 0], sizes = [8, 32], strides = [1, 1]} : vector<8x96xf32> to vector<8x32xf32>
      %85 = vector.extract_strided_slice %83 {offsets = [0, 32], sizes = [8, 32], strides = [1, 1]} : vector<8x96xf32> to vector<8x32xf32>
      %86 = vector.extract_strided_slice %83 {offsets = [0, 64], sizes = [8, 32], strides = [1, 1]} : vector<8x96xf32> to vector<8x32xf32>
      %87 = arith.truncf %84 : vector<8x32xf32> to vector<8x32xbf16>
      %88 = arith.truncf %85 : vector<8x32xf32> to vector<8x32xbf16>
      %cst_60 = arith.constant dense<0.000000e+00> : vector<8x8xf32>
      %89 = tpu.matmul %87, %88, %cst_60 {dimension_numbers = #tpu.dot_dimension_numbers<[1], [1], [0], [0], [0, 0, 1, 0], [], []>} : vector<8x32xbf16>, vector<8x32xbf16>, vector<8x8xf32> -> vector<8x8xf32>
      %cst_61 = arith.constant 0.176776692 : f32
      %90 = vector.broadcast %cst_61 : f32 to vector<8x8xf32>
      %91 = arith.mulf %89, %90 : vector<8x8xf32>
      %cst_62 = arith.constant dense<0xFF800000> : vector<8xf32>
      %92 = vector.multi_reduction <maximumf>, %91, %cst_62 [1] : vector<8x8xf32> to vector<8xf32>
      %93 = vector.shape_cast %92 : vector<8xf32> to vector<8x1xf32>
      %94 = vector.broadcast %93 : vector<8x1xf32> to vector<8x8xf32>
      %95 = arith.subf %91, %94 : vector<8x8xf32>
      %96 = math.exp %95 : vector<8x8xf32>
      %cst_63 = arith.constant dense<0.000000e+00> : vector<8xf32>
      %97 = vector.multi_reduction <add>, %96, %cst_63 [1] : vector<8x8xf32> to vector<8xf32>
      %98 = vector.shape_cast %97 : vector<8xf32> to vector<8x1xf32>
      %99 = tpu.reciprocal %98 {approx = true} : vector<8x1xf32> -> vector<8x1xf32>
      %100 = vector.broadcast %99 : vector<8x1xf32> to vector<8x8xf32>
      %101 = arith.mulf %96, %100 : vector<8x8xf32>
      %102 = arith.truncf %101 : vector<8x8xf32> to vector<8x8xbf16>
      %103 = arith.truncf %86 : vector<8x32xf32> to vector<8x32xbf16>
      %cst_64 = arith.constant dense<0.000000e+00> : vector<8x32xf32>
      %104 = tpu.matmul %102, %103, %cst_64 {dimension_numbers = #tpu.dot_dimension_numbers<[1], [0], [0], [1], [0, 0, 1, 1], [], []>} : vector<8x8xbf16>, vector<8x32xbf16>, vector<8x32xf32> -> vector<8x32xf32>
      %c0_65 = arith.constant 0 : index
      %c0_66 = arith.constant 0 : index
      %c0_67 = arith.constant 0 : index
      %105 = vector.load %arg12[%c0_65, %c0_66, %c0_67] : memref<2x32x32xbf16, #tpu.memory_space<vmem>>, vector<1x32x32xbf16>
      %106 = vector.shape_cast %105 : vector<1x32x32xbf16> to vector<32x32xbf16>
      %cst_68 = arith.constant dense<0.000000e+00> : vector<8x32xf32>
      %107 = tpu.matmul %76, %106, %cst_68 {dimension_numbers = #tpu.dot_dimension_numbers<[1], [0], [0], [1], [0, 0, 1, 1], [], []>} : vector<8x32xbf16>, vector<32x32xbf16>, vector<8x32xf32> -> vector<8x32xf32>
      %108 = arith.truncf %104 : vector<8x32xf32> to vector<8x32xbf16>
      %c0_69 = arith.constant 0 : index
      %c0_70 = arith.constant 0 : index
      %c0_71 = arith.constant 0 : index
      %109 = vector.load %arg13[%c0_69, %c0_70, %c0_71] : memref<2x32x32xbf16, #tpu.memory_space<vmem>>, vector<1x32x32xbf16>
      %110 = vector.shape_cast %109 : vector<1x32x32xbf16> to vector<32x32xbf16>
      %cst_72 = arith.constant dense<0.000000e+00> : vector<8x32xf32>
      %111 = tpu.matmul %108, %110, %cst_72 {dimension_numbers = #tpu.dot_dimension_numbers<[1], [0], [0], [1], [0, 0, 1, 1], [], []>} : vector<8x32xbf16>, vector<32x32xbf16>, vector<8x32xf32> -> vector<8x32xf32>
      %112 = arith.addf %107, %111 : vector<8x32xf32>
      %c0_73 = arith.constant 0 : index
      %c0_74 = arith.constant 0 : index
      %c0_75 = arith.constant 0 : index
      %113 = vector.load %arg14[%c0_73, %c0_74, %c0_75] : memref<2x1x32xf32, #tpu.memory_space<vmem>>, vector<1x1x32xf32>
      %114 = vector.shape_cast %113 : vector<1x1x32xf32> to vector<1x32xf32>
      %115 = vector.broadcast %114 : vector<1x32xf32> to vector<8x32xf32>
      %116 = arith.addf %112, %115 : vector<8x32xf32>
      %117 = arith.negf %116 : vector<8x32xf32>
      %118 = math.exp %117 : vector<8x32xf32>
      %cst_76 = arith.constant 1.000000e+00 : f32
      %119 = vector.broadcast %cst_76 : f32 to vector<8x32xf32>
      %120 = arith.addf %119, %118 : vector<8x32xf32>
      %121 = arith.divf %119, %120 : vector<8x32xf32>
      %122 = arith.mulf %121, %104 : vector<8x32xf32>
      %cst_77 = arith.constant dense<0.000000e+00> : vector<8xf32>
      %123 = vector.multi_reduction <add>, %122, %cst_77 [1] : vector<8x32xf32> to vector<8xf32>
      %124 = vector.shape_cast %123 : vector<8xf32> to vector<8x1xf32>
      %cst_78 = arith.constant 3.200000e+01 : f32
      %125 = vector.broadcast %cst_78 : f32 to vector<8x1xf32>
      %126 = arith.divf %124, %125 : vector<8x1xf32>
      %127 = vector.broadcast %126 : vector<8x1xf32> to vector<8x32xf32>
      %128 = arith.subf %122, %127 : vector<8x32xf32>
      %129 = arith.mulf %128, %128 : vector<8x32xf32>
      %cst_79 = arith.constant dense<0.000000e+00> : vector<8xf32>
      %130 = vector.multi_reduction <add>, %129, %cst_79 [1] : vector<8x32xf32> to vector<8xf32>
      %131 = vector.shape_cast %130 : vector<8xf32> to vector<8x1xf32>
      %cst_80 = arith.constant 3.200000e+01 : f32
      %132 = vector.broadcast %cst_80 : f32 to vector<8x1xf32>
      %133 = arith.divf %131, %132 : vector<8x1xf32>
      %cst_81 = arith.constant 9.99999974E-6 : f32
      %134 = vector.broadcast %cst_81 : f32 to vector<8x1xf32>
      %135 = arith.addf %133, %134 : vector<8x1xf32>
      %136 = math.rsqrt %135 : vector<8x1xf32>
      %137 = vector.broadcast %136 : vector<8x1xf32> to vector<8x32xf32>
      %138 = arith.mulf %128, %137 : vector<8x32xf32>
      %c0_82 = arith.constant 0 : index
      %c0_83 = arith.constant 0 : index
      %c0_84 = arith.constant 0 : index
      %139 = vector.load %arg15[%c0_82, %c0_83, %c0_84] : memref<2x1x32xf32, #tpu.memory_space<vmem>>, vector<1x1x32xf32>
      %140 = vector.shape_cast %139 : vector<1x1x32xf32> to vector<1x32xf32>
      %141 = vector.broadcast %140 : vector<1x32xf32> to vector<8x32xf32>
      %142 = arith.mulf %138, %141 : vector<8x32xf32>
      %c0_85 = arith.constant 0 : index
      %c0_86 = arith.constant 0 : index
      %c0_87 = arith.constant 0 : index
      %143 = vector.load %arg16[%c0_85, %c0_86, %c0_87] : memref<2x1x32xf32, #tpu.memory_space<vmem>>, vector<1x1x32xf32>
      %144 = vector.shape_cast %143 : vector<1x1x32xf32> to vector<1x32xf32>
      %145 = vector.broadcast %144 : vector<1x32xf32> to vector<8x32xf32>
      %146 = arith.addf %142, %145 : vector<8x32xf32>
      %147 = vector.extract_strided_slice %41 {offsets = [0, 256], sizes = [8, 256], strides = [1, 1]} : vector<8x512xf32> to vector<8x256xf32>
      %148 = arith.truncf %147 : vector<8x256xf32> to vector<8x256xbf16>
      %c1 = arith.constant 1 : index
      %c0_88 = arith.constant 0 : index
      %c0_89 = arith.constant 0 : index
      %149 = vector.load %arg6[%c1, %c0_88, %c0_89] : memref<2x256x128xbf16, #tpu.memory_space<vmem>>, vector<1x256x128xbf16>
      %150 = vector.shape_cast %149 : vector<1x256x128xbf16> to vector<256x128xbf16>
      %cst_90 = arith.constant dense<0.000000e+00> : vector<8x128xf32>
      %151 = tpu.matmul %148, %150, %cst_90 {dimension_numbers = #tpu.dot_dimension_numbers<[1], [0], [0], [1], [0, 0, 1, 1], [], []>} : vector<8x256xbf16>, vector<256x128xbf16>, vector<8x128xf32> -> vector<8x128xf32>
      %c1_91 = arith.constant 1 : index
      %c0_92 = arith.constant 0 : index
      %c0_93 = arith.constant 0 : index
      %152 = vector.load %arg7[%c1_91, %c0_92, %c0_93] : memref<2x1x128xf32, #tpu.memory_space<vmem>>, vector<1x1x128xf32>
      %153 = vector.shape_cast %152 : vector<1x1x128xf32> to vector<1x128xf32>
      %154 = vector.broadcast %153 : vector<1x128xf32> to vector<8x128xf32>
      %155 = arith.addf %151, %154 : vector<8x128xf32>
      %156 = math.tanh %155 : vector<8x128xf32>
      %157 = arith.truncf %156 : vector<8x128xf32> to vector<8x128xbf16>
      %c1_94 = arith.constant 1 : index
      %c0_95 = arith.constant 0 : index
      %c0_96 = arith.constant 0 : index
      %158 = vector.load %arg8[%c1_94, %c0_95, %c0_96] : memref<2x128x128xbf16, #tpu.memory_space<vmem>>, vector<1x128x128xbf16>
      %159 = vector.shape_cast %158 : vector<1x128x128xbf16> to vector<128x128xbf16>
      %cst_97 = arith.constant dense<0.000000e+00> : vector<8x128xf32>
      %160 = tpu.matmul %157, %159, %cst_97 {dimension_numbers = #tpu.dot_dimension_numbers<[1], [0], [0], [1], [0, 0, 1, 1], [], []>} : vector<8x128xbf16>, vector<128x128xbf16>, vector<8x128xf32> -> vector<8x128xf32>
      %c1_98 = arith.constant 1 : index
      %c0_99 = arith.constant 0 : index
      %c0_100 = arith.constant 0 : index
      %161 = vector.load %arg9[%c1_98, %c0_99, %c0_100] : memref<2x1x128xf32, #tpu.memory_space<vmem>>, vector<1x1x128xf32>
      %162 = vector.shape_cast %161 : vector<1x1x128xf32> to vector<1x128xf32>
      %163 = vector.broadcast %162 : vector<1x128xf32> to vector<8x128xf32>
      %164 = arith.addf %160, %163 : vector<8x128xf32>
      %165 = arith.negf %164 : vector<8x128xf32>
      %166 = math.exp %165 : vector<8x128xf32>
      %cst_101 = arith.constant 1.000000e+00 : f32
      %167 = vector.broadcast %cst_101 : f32 to vector<8x128xf32>
      %168 = arith.addf %167, %166 : vector<8x128xf32>
      %169 = arith.divf %167, %168 : vector<8x128xf32>
      %170 = math.tanh %164 : vector<8x128xf32>
      %171 = vector.extract_strided_slice %164 {offsets = [0, 0], sizes = [8, 32], strides = [1, 1]} : vector<8x128xf32> to vector<8x32xf32>
      %cst_102 = arith.constant 0.000000e+00 : f32
      %172 = vector.broadcast %cst_102 : f32 to vector<8x32xf32>
      %173 = arith.maximumf %171, %172 : vector<8x32xf32>
      %174 = vector.extract_strided_slice %169 {offsets = [0, 32], sizes = [8, 32], strides = [1, 1]} : vector<8x128xf32> to vector<8x32xf32>
      %175 = vector.extract_strided_slice %170 {offsets = [0, 64], sizes = [8, 32], strides = [1, 1]} : vector<8x128xf32> to vector<8x32xf32>
      %176 = vector.extract_strided_slice %169 {offsets = [0, 96], sizes = [8, 32], strides = [1, 1]} : vector<8x128xf32> to vector<8x32xf32>
      %177 = arith.mulf %174, %175 : vector<8x32xf32>
      %178 = math.tanh %177 : vector<8x32xf32>
      %179 = arith.mulf %176, %178 : vector<8x32xf32>
      %180 = arith.addf %173, %179 : vector<8x32xf32>
      %181 = arith.truncf %180 : vector<8x32xf32> to vector<8x32xbf16>
      %c1_103 = arith.constant 1 : index
      %c0_104 = arith.constant 0 : index
      %c0_105 = arith.constant 0 : index
      %182 = vector.load %arg10[%c1_103, %c0_104, %c0_105] : memref<2x32x96xbf16, #tpu.memory_space<vmem>>, vector<1x32x96xbf16>
      %183 = vector.shape_cast %182 : vector<1x32x96xbf16> to vector<32x96xbf16>
      %cst_106 = arith.constant dense<0.000000e+00> : vector<8x96xf32>
      %184 = tpu.matmul %181, %183, %cst_106 {dimension_numbers = #tpu.dot_dimension_numbers<[1], [0], [0], [1], [0, 0, 1, 1], [], []>} : vector<8x32xbf16>, vector<32x96xbf16>, vector<8x96xf32> -> vector<8x96xf32>
      %c1_107 = arith.constant 1 : index
      %c0_108 = arith.constant 0 : index
      %c0_109 = arith.constant 0 : index
      %185 = vector.load %arg11[%c1_107, %c0_108, %c0_109] : memref<2x1x96xf32, #tpu.memory_space<vmem>>, vector<1x1x96xf32>
      %186 = vector.shape_cast %185 : vector<1x1x96xf32> to vector<1x96xf32>
      %187 = vector.broadcast %186 : vector<1x96xf32> to vector<8x96xf32>
      %188 = arith.addf %184, %187 : vector<8x96xf32>
      %189 = vector.extract_strided_slice %188 {offsets = [0, 0], sizes = [8, 32], strides = [1, 1]} : vector<8x96xf32> to vector<8x32xf32>
      %190 = vector.extract_strided_slice %188 {offsets = [0, 32], sizes = [8, 32], strides = [1, 1]} : vector<8x96xf32> to vector<8x32xf32>
      %191 = vector.extract_strided_slice %188 {offsets = [0, 64], sizes = [8, 32], strides = [1, 1]} : vector<8x96xf32> to vector<8x32xf32>
      %192 = arith.truncf %189 : vector<8x32xf32> to vector<8x32xbf16>
      %193 = arith.truncf %190 : vector<8x32xf32> to vector<8x32xbf16>
      %cst_110 = arith.constant dense<0.000000e+00> : vector<8x8xf32>
      %194 = tpu.matmul %192, %193, %cst_110 {dimension_numbers = #tpu.dot_dimension_numbers<[1], [1], [0], [0], [0, 0, 1, 0], [], []>} : vector<8x32xbf16>, vector<8x32xbf16>, vector<8x8xf32> -> vector<8x8xf32>
      %cst_111 = arith.constant 0.176776692 : f32
      %195 = vector.broadcast %cst_111 : f32 to vector<8x8xf32>
      %196 = arith.mulf %194, %195 : vector<8x8xf32>
      %cst_112 = arith.constant dense<0xFF800000> : vector<8xf32>
      %197 = vector.multi_reduction <maximumf>, %196, %cst_112 [1] : vector<8x8xf32> to vector<8xf32>
      %198 = vector.shape_cast %197 : vector<8xf32> to vector<8x1xf32>
      %199 = vector.broadcast %198 : vector<8x1xf32> to vector<8x8xf32>
      %200 = arith.subf %196, %199 : vector<8x8xf32>
      %201 = math.exp %200 : vector<8x8xf32>
      %cst_113 = arith.constant dense<0.000000e+00> : vector<8xf32>
      %202 = vector.multi_reduction <add>, %201, %cst_113 [1] : vector<8x8xf32> to vector<8xf32>
      %203 = vector.shape_cast %202 : vector<8xf32> to vector<8x1xf32>
      %204 = tpu.reciprocal %203 {approx = true} : vector<8x1xf32> -> vector<8x1xf32>
      %205 = vector.broadcast %204 : vector<8x1xf32> to vector<8x8xf32>
      %206 = arith.mulf %201, %205 : vector<8x8xf32>
      %207 = arith.truncf %206 : vector<8x8xf32> to vector<8x8xbf16>
      %208 = arith.truncf %191 : vector<8x32xf32> to vector<8x32xbf16>
      %cst_114 = arith.constant dense<0.000000e+00> : vector<8x32xf32>
      %209 = tpu.matmul %207, %208, %cst_114 {dimension_numbers = #tpu.dot_dimension_numbers<[1], [0], [0], [1], [0, 0, 1, 1], [], []>} : vector<8x8xbf16>, vector<8x32xbf16>, vector<8x32xf32> -> vector<8x32xf32>
      %c1_115 = arith.constant 1 : index
      %c0_116 = arith.constant 0 : index
      %c0_117 = arith.constant 0 : index
      %210 = vector.load %arg12[%c1_115, %c0_116, %c0_117] : memref<2x32x32xbf16, #tpu.memory_space<vmem>>, vector<1x32x32xbf16>
      %211 = vector.shape_cast %210 : vector<1x32x32xbf16> to vector<32x32xbf16>
      %cst_118 = arith.constant dense<0.000000e+00> : vector<8x32xf32>
      %212 = tpu.matmul %181, %211, %cst_118 {dimension_numbers = #tpu.dot_dimension_numbers<[1], [0], [0], [1], [0, 0, 1, 1], [], []>} : vector<8x32xbf16>, vector<32x32xbf16>, vector<8x32xf32> -> vector<8x32xf32>
      %213 = arith.truncf %209 : vector<8x32xf32> to vector<8x32xbf16>
      %c1_119 = arith.constant 1 : index
      %c0_120 = arith.constant 0 : index
      %c0_121 = arith.constant 0 : index
      %214 = vector.load %arg13[%c1_119, %c0_120, %c0_121] : memref<2x32x32xbf16, #tpu.memory_space<vmem>>, vector<1x32x32xbf16>
      %215 = vector.shape_cast %214 : vector<1x32x32xbf16> to vector<32x32xbf16>
      %cst_122 = arith.constant dense<0.000000e+00> : vector<8x32xf32>
      %216 = tpu.matmul %213, %215, %cst_122 {dimension_numbers = #tpu.dot_dimension_numbers<[1], [0], [0], [1], [0, 0, 1, 1], [], []>} : vector<8x32xbf16>, vector<32x32xbf16>, vector<8x32xf32> -> vector<8x32xf32>
      %217 = arith.addf %212, %216 : vector<8x32xf32>
      %c1_123 = arith.constant 1 : index
      %c0_124 = arith.constant 0 : index
      %c0_125 = arith.constant 0 : index
      %218 = vector.load %arg14[%c1_123, %c0_124, %c0_125] : memref<2x1x32xf32, #tpu.memory_space<vmem>>, vector<1x1x32xf32>
      %219 = vector.shape_cast %218 : vector<1x1x32xf32> to vector<1x32xf32>
      %220 = vector.broadcast %219 : vector<1x32xf32> to vector<8x32xf32>
      %221 = arith.addf %217, %220 : vector<8x32xf32>
      %222 = arith.negf %221 : vector<8x32xf32>
      %223 = math.exp %222 : vector<8x32xf32>
      %cst_126 = arith.constant 1.000000e+00 : f32
      %224 = vector.broadcast %cst_126 : f32 to vector<8x32xf32>
      %225 = arith.addf %224, %223 : vector<8x32xf32>
      %226 = arith.divf %224, %225 : vector<8x32xf32>
      %227 = arith.mulf %226, %209 : vector<8x32xf32>
      %cst_127 = arith.constant dense<0.000000e+00> : vector<8xf32>
      %228 = vector.multi_reduction <add>, %227, %cst_127 [1] : vector<8x32xf32> to vector<8xf32>
      %229 = vector.shape_cast %228 : vector<8xf32> to vector<8x1xf32>
      %cst_128 = arith.constant 3.200000e+01 : f32
      %230 = vector.broadcast %cst_128 : f32 to vector<8x1xf32>
      %231 = arith.divf %229, %230 : vector<8x1xf32>
      %232 = vector.broadcast %231 : vector<8x1xf32> to vector<8x32xf32>
      %233 = arith.subf %227, %232 : vector<8x32xf32>
      %234 = arith.mulf %233, %233 : vector<8x32xf32>
      %cst_129 = arith.constant dense<0.000000e+00> : vector<8xf32>
      %235 = vector.multi_reduction <add>, %234, %cst_129 [1] : vector<8x32xf32> to vector<8xf32>
      %236 = vector.shape_cast %235 : vector<8xf32> to vector<8x1xf32>
      %cst_130 = arith.constant 3.200000e+01 : f32
      %237 = vector.broadcast %cst_130 : f32 to vector<8x1xf32>
      %238 = arith.divf %236, %237 : vector<8x1xf32>
      %cst_131 = arith.constant 9.99999974E-6 : f32
      %239 = vector.broadcast %cst_131 : f32 to vector<8x1xf32>
      %240 = arith.addf %238, %239 : vector<8x1xf32>
      %241 = math.rsqrt %240 : vector<8x1xf32>
      %242 = vector.broadcast %241 : vector<8x1xf32> to vector<8x32xf32>
      %243 = arith.mulf %233, %242 : vector<8x32xf32>
      %c1_132 = arith.constant 1 : index
      %c0_133 = arith.constant 0 : index
      %c0_134 = arith.constant 0 : index
      %244 = vector.load %arg15[%c1_132, %c0_133, %c0_134] : memref<2x1x32xf32, #tpu.memory_space<vmem>>, vector<1x1x32xf32>
      %245 = vector.shape_cast %244 : vector<1x1x32xf32> to vector<1x32xf32>
      %246 = vector.broadcast %245 : vector<1x32xf32> to vector<8x32xf32>
      %247 = arith.mulf %243, %246 : vector<8x32xf32>
      %c1_135 = arith.constant 1 : index
      %c0_136 = arith.constant 0 : index
      %c0_137 = arith.constant 0 : index
      %248 = vector.load %arg16[%c1_135, %c0_136, %c0_137] : memref<2x1x32xf32, #tpu.memory_space<vmem>>, vector<1x1x32xf32>
      %249 = vector.shape_cast %248 : vector<1x1x32xf32> to vector<1x32xf32>
      %250 = vector.broadcast %249 : vector<1x32xf32> to vector<8x32xf32>
      %251 = arith.addf %247, %250 : vector<8x32xf32>
      %252 = tpu.concatenate %146, %251 in 1 : vector<8x32xf32>, vector<8x32xf32> -> vector<8x64xf32>
      %253 = arith.truncf %252 : vector<8x64xf32> to vector<8x64xbf16>
      %c0_138 = arith.constant 0 : index
      %c0_139 = arith.constant 0 : index
      %254 = vector.load %arg17[%c0_138, %c0_139] : memref<64x32xbf16, #tpu.memory_space<vmem>>, vector<64x32xbf16>
      %cst_140 = arith.constant dense<0.000000e+00> : vector<8x32xf32>
      %255 = tpu.matmul %253, %254, %cst_140 {dimension_numbers = #tpu.dot_dimension_numbers<[1], [0], [0], [1], [0, 0, 1, 1], [], []>} : vector<8x64xbf16>, vector<64x32xbf16>, vector<8x32xf32> -> vector<8x32xf32>
      %c0_141 = arith.constant 0 : index
      %c0_142 = arith.constant 0 : index
      %256 = vector.load %arg18[%c0_141, %c0_142] : memref<1x32xf32, #tpu.memory_space<vmem>>, vector<1x32xf32>
      %257 = vector.broadcast %256 : vector<1x32xf32> to vector<8x32xf32>
      %258 = arith.addf %255, %257 : vector<8x32xf32>
      %259 = math.tanh %258 : vector<8x32xf32>
      %260 = arith.truncf %259 : vector<8x32xf32> to vector<8x32xbf16>
      %c0_143 = arith.constant 0 : index
      %c0_144 = arith.constant 0 : index
      %261 = vector.load %arg19[%c0_143, %c0_144] : memref<32x1xbf16, #tpu.memory_space<vmem>>, vector<32x1xbf16>
      %cst_145 = arith.constant dense<0.000000e+00> : vector<8x1xf32>
      %262 = tpu.matmul %260, %261, %cst_145 {dimension_numbers = #tpu.dot_dimension_numbers<[1], [0], [0], [1], [0, 0, 1, 1], [], []>} : vector<8x32xbf16>, vector<32x1xbf16>, vector<8x1xf32> -> vector<8x1xf32>
      %c0_146 = arith.constant 0 : index
      %c0_147 = arith.constant 0 : index
      %263 = vector.load %arg20[%c0_146, %c0_147] : memref<1x1xf32, #tpu.memory_space<vmem>>, vector<1x1xf32>
      %264 = vector.broadcast %263 : vector<1x1xf32> to vector<8x1xf32>
      %265 = arith.addf %262, %264 : vector<8x1xf32>
      %266 = arith.negf %265 : vector<8x1xf32>
      %267 = math.exp %266 : vector<8x1xf32>
      %cst_148 = arith.constant 1.000000e+00 : f32
      %268 = vector.broadcast %cst_148 : f32 to vector<8x1xf32>
      %269 = arith.addf %268, %267 : vector<8x1xf32>
      %270 = arith.divf %268, %269 : vector<8x1xf32>
      %271 = vector.shape_cast %270 : vector<8x1xf32> to vector<1x8x1xf32>
      %cst_149 = arith.constant dense<0.000000e+00> : vector<1xf32>
      %272 = vector.multi_reduction <add>, %271, %cst_149 [1, 2] : vector<1x8x1xf32> to vector<1xf32>
      %273 = vector.shape_cast %272 : vector<1xf32> to vector<1x1x1xf32>
      %274 = vector.extract %273[0, 0, 0] : f32 from vector<1x1x1xf32>
      %c0_150 = arith.constant 0 : index
      %c0_151 = arith.constant 0 : index
      %275 = vector.load %arg21[%c0_150, %c0_151] : memref<8x32xf32, #tpu.memory_space<vmem>>, vector<8x32xf32>
      tpu.vector_store %arg21[%c0_150, %c0_151], %259 {strides = array<i32>} : memref<8x32xf32, #tpu.memory_space<vmem>>, vector<8x32xf32>,
      %c0_152 = arith.constant 0 : index
      %c0_153 = arith.constant 0 : index
      %276 = vector.load %arg22[%c0_152, %c0_153] : memref<8x32xf32, #tpu.memory_space<vmem>>, vector<8x32xf32>
      tpu.vector_store %arg22[%c0_152, %c0_153], %259 {strides = array<i32>} : memref<8x32xf32, #tpu.memory_space<vmem>>, vector<8x32xf32>,
      %277 = arith.cmpf oge, %274, %cst_25 : f32
      %c1_i32 = arith.constant 1 : i32
      %c0_i32_154 = arith.constant 0 : i32
      %278 = arith.select %277, %c1_i32, %c0_i32_154 : i32
      %c0_155 = arith.constant 0 : index
      %279 = memref.load %arg23[%c0_155] : memref<1xi32, #tpu.memory_space<smem>>
      memref.store %278, %arg23[%c0_155] : memref<1xi32, #tpu.memory_space<smem>>
    } else {
    }
    %c0_27 = arith.constant 0 : index
    %29 = memref.load %arg23[%c0_27] : memref<1xi32, #tpu.memory_space<smem>>
    %c0_i32_28 = arith.constant 0 : i32
    %30 = arith.cmpi eq, %29, %c0_i32_28 : i32
    %31 = arith.extui %30 : i1 to i32
    %c0_i32_29 = arith.constant 0 : i32
    %32 = arith.cmpi ne, %31, %c0_i32_29 : i32
    scf.if %32 {
      %33 = vector.extract_strided_slice %1 {offsets = [0, 0], sizes = [8, 16], strides = [1, 1]} : vector<8x48xbf16> to vector<8x16xbf16>
      %34 = vector.extract_strided_slice %2 {offsets = [0, 0], sizes = [16, 32], strides = [1, 1]} : vector<48x32xbf16> to vector<16x32xbf16>
      %cst_30 = arith.constant dense<0.000000e+00> : vector<8x32xf32>
      %35 = tpu.matmul %33, %34, %cst_30 {dimension_numbers = #tpu.dot_dimension_numbers<[1], [0], [0], [1], [0, 0, 1, 1], [], []>} : vector<8x16xbf16>, vector<16x32xbf16>, vector<8x32xf32> -> vector<8x32xf32>
      %36 = vector.broadcast %3 : vector<1x32xf32> to vector<8x32xf32>
      %37 = arith.addf %35, %36 : vector<8x32xf32>
      %c0_31 = arith.constant 0 : index
      %c0_32 = arith.constant 0 : index
      %38 = vector.load %arg21[%c0_31, %c0_32] : memref<8x32xf32, #tpu.memory_space<vmem>>, vector<8x32xf32>
      tpu.vector_store %arg21[%c0_31, %c0_32], %37 {strides = array<i32>} : memref<8x32xf32, #tpu.memory_space<vmem>>, vector<8x32xf32>,
    } else {
    }
    return
  }
}

</mosaic_0001>

<bundles_post_ra>
// kernel: _forward_impl.1
= control target key start
LH: loop header
LB: loop body
LE: loop exit
PB: predicated region body
PF: predicated region fallthrough
CT: control target
= control target key end

     0   :  { %s10517_s0 = inlined_call_operand.vmem [shape: f32[8,48], index: 0, kind: input, shape index: {}]   ;;  %s10518_s1 = inlined_call_operand.vmem [shape: bf16[48,32], index: 1, kind: input, shape index: {}]   ;;  %s10519_s2 = inlined_call_operand.hbm [shape: f32[1,32], index: 2, kind: input, shape index: {}]   ;;  %s10520_s3 = inlined_call_operand.hbm [shape: f32[1,32], index: 3, kind: input, shape index: {}]   ;;  %s10521_s4 = inlined_call_operand.hbm [shape: bf16[32,512], index: 4, kind: input, shape index: {}]   ;;  %s10522_s5 = inlined_call_operand.hbm [shape: f32[1,512], index: 5, kind: input, shape index: {}]   ;;  %s10523_s6 = inlined_call_operand.hbm [shape: bf16[2,256,128], index: 6, kind: input, shape index: {}]   ;;  %s10524_s7 = inlined_call_operand.hbm [shape: f32[2,1,128], index: 7, kind: input, shape index: {}]   ;;  %s10525_s8 = inlined_call_operand.vmem [shape: bf16[2,128,128], index: 8, kind: input, shape index: {}]   ;;  %s10526_s9 = inlined_call_operand.hbm [shape: f32[2,1,128], index: 9, kind: input, shape index: {}]   ;;  %s10527_s10 = inlined_call_operand.hbm [shape: bf16[2,32,96], index: 10, kind: input, shape index: {}]   ;;  %s10528_s11 = inlined_call_operand.hbm [shape: f32[2,1,96], index: 11, kind: input, shape index: {}]   ;;  %s10529_s12 = inlined_call_operand.hbm [shape: bf16[2,32,32], index: 12, kind: input, shape index: {}]   ;;  %s10530_s13 = inlined_call_operand.hbm [shape: bf16[2,32,32], index: 13, kind: input, shape index: {}]   ;;  %s10531_s14 = inlined_call_operand.hbm [shape: f32[2,1,32], index: 14, kind: input, shape index: {}]   ;;  %s10532_s15 = inlined_call_operand.hbm [shape: f32[2,1,32], index: 15, kind: input, shape index: {}]   ;;  %s10533_s16 = inlined_call_operand.hbm [shape: f32[2,1,32], index: 16, kind: input, shape index: {}]   ;;  %s10534_s17 = inlined_call_operand.vmem [shape: bf16[64,32], index: 17, kind: input, shape index: {}]   ;;  %s10535_s18 = inlined_call_operand.hbm [shape: f32[1,32], index: 18, kind: input, shape index: {}]   ;;  %s10536_s19 = inlined_call_operand.vmem [shape: bf16[32,1], index: 19, kind: input, shape index: {}]   ;;  %s10537_s20 = inlined_call_operand.<no memory space> [shape: f32[1,1], index: 20, kind: input, shape index: {}]   ;;  %s10538_s21 = inlined_call_operand.vmem [shape: f32[8,32], index: 21, kind: output, shape index: {}]  }
   0x1   :  { %10540 = sst [smem:[#allocation36_spill]] %s10517_s0  ;;  %v26_v0 = vstv %s10537_s20 }
   0x2   :  { %10541 = sst [smem:[#allocation37_spill]] %s10518_s1  ;;  %27 = vst [vmem:[#allocation4] sm:$0x1] %v26_v0 }
   0x3   :  { %10542 = sst [smem:[#allocation38_spill]] %s10519_s2 }
   0x4   :  { %10543 = sst [smem:[#allocation39_spill]] %s10520_s3 }
   0x5   :  { %10544 = sst [smem:[#allocation40_spill]] %s10521_s4 }
   0x6   :  { %10545 = sst [smem:[#allocation41_spill]] %s10522_s5 }
   0x7   :  { %28 = vsyncpa [#allocation6], 0 }
   0x8   :  { %29 = vsyncpa [#allocation8], 0 }
   0x9   :  { %30 = vsyncpa [#allocation11], 0 }
   0xa   :  { %31 = vsyncpa [#allocation14], 0 }
   0xb   :  { %32 = vsyncpa [#allocation17], 0 }
   0xc   :  { %33 = vsyncpa [#allocation20], 0 }
   0xd   :  { %34 = vsyncpa [#allocation23], 0 }
   0xe   :  { %35 = vsyncpa [#allocation26], 0  ;;  %s9415_s26 = smov [#allocation7]   ;;  %s9416_s3 = smov [#allocation10]  }
   0xf   :  { %s56_s27 = sshll.u32 %s9415_s26, 4  ;;  %s78_s28 = sshll.u32 %s9416_s3, 4  ;;  %s57_s27 = int_to_ptr.vmem [resolvable:$true] %s56_s27  ;;  %s79_s28 = int_to_ptr.vmem [resolvable:$true] %s78_s28 }
  0x10   :  { %s9106_s29 = scalar_lea.vmem %s57_s27, 16  ;;  %s9110_s0 = scalar_lea.vmem %s57_s27, 32 }
  0x11   :  { %p9107_p0 = scmp.ne.s32.totalorder %s57_s27, %s9106_s29  ;;  %p9111_p1 = scmp.lt.s32.totalorder %s57_s27, %s57_s27 }
  0x12   :  { %p9112_p2 = scmp.lt.s32.totalorder %s9110_s0, %s9106_s29 }
  0x14   :  { %p9113_p3 = por %p9112_p2, %p9111_p1 }
  0x16   :  { %p9114_p4 = pnand %p9113_p3, %p9107_p0 }
  0x18   :  { %9117 = shalt.err (!%p9114_p4)
}
  0x19   :  { %s10546_s30 = sld [smem:[#allocation39_spill]]  ;;  %s9126_s5 = scalar_lea.vmem %s79_s28, 64 }
  0x1a   :  { %p9127_p5 = scmp.ne.s32.totalorder %s79_s28, %s9126_s5  ;;  %p9131_p6 = scmp.lt.s32.totalorder %s79_s28, %s79_s28 }
  0x1b   :  { %p9132_p7 = scmp.lt.s32.totalorder %s9126_s5, %s9126_s5 }
  0x1d   :  { %p9133_p8 = por %p9132_p7, %p9131_p6 }
  0x1f   :  { %59 = dma.hbm_to_vmem [thread:$0]  %s10546_s30, 16, %s57_s27, [#allocation8]  }
  0x20   :  { %p9134_p9 = pnand %p9133_p8, %p9127_p5 }
  0x22   :  { %9137 = shalt.err (!%p9134_p9)
}
  0x23   :  { %s10547_s1 = sld [smem:[#allocation41_spill]]  ;;  %s9417_s24 = smov [#allocation13]  }
  0x24   :  { %s99_s2 = sshll.u32 %s9417_s24, 4  ;;  %s100_s2 = int_to_ptr.vmem [resolvable:$true] %s99_s2 }
  0x25   :  { %s9146_s25 = scalar_lea.vmem %s100_s2, 32  ;;  %p9151_p11 = scmp.lt.s32.totalorder %s100_s2, %s100_s2 }
  0x26   :  { %p9147_p10 = scmp.ne.s32.totalorder %s100_s2, %s9146_s25  ;;  %p9152_p12 = scmp.lt.s32.totalorder %s9146_s25, %s9146_s25 }
  0x28   :  { %p9153_p13 = por %p9152_p12, %p9151_p11 }
  0x29   :  { %81 = dma.hbm_to_vmem [thread:$0]  %s10547_s1, 64, %s79_s28, [#allocation11]  }
  0x2a   :  { %p9154_p0 = pnand %p9153_p13, %p9147_p10 }
  0x2c   :  { %9157 = shalt.err (!%p9154_p0)
}
  0x2d   :  { %s9418_s26 = smov 16   ;;  %s9419_s27 = smov 1  }
  0x2e   :  { %105 = dma.hbm_to_vmem [thread:$0]  %s10524_s7, 32, %s100_s2, [#allocation14], %s9418_s26, %s9418_s26, %s9419_s27  }
  0x2f   :  { %s9420_s28 = smov [#allocation16]   ;;  %s9421_s20 = smov [#allocation19]  }
  0x30   :  { %s125_s0 = sshll.u32 %s9420_s28, 4  ;;  %s149_s4 = sshll.u32 %s9421_s20, 4  ;;  %s126_s0 = int_to_ptr.vmem [resolvable:$true] %s125_s0  ;;  %s150_s4 = int_to_ptr.vmem [resolvable:$true] %s149_s4 }
  0x31   :  { %s9166_s30 = scalar_lea.vmem %s126_s0, 512  ;;  %p9171_p2 = scmp.lt.s32.totalorder %s126_s0, %s126_s0 }
  0x32   :  { %p9167_p1 = scmp.ne.s32.totalorder %s126_s0, %s9166_s30  ;;  %p9172_p3 = scmp.lt.s32.totalorder %s9166_s30, %s9166_s30 }
  0x34   :  { %p9173_p4 = por %p9172_p3, %p9171_p2 }
  0x36   :  { %p9174_p5 = pnand %p9173_p4, %p9167_p1 }
  0x38   :  { %9177 = shalt.err (!%p9174_p5)
}
  0x39   :  { %s9422_s5 = smov 64   ;;  %s9423_s22 = smov 4  }
  0x3a   :  { %131 = dma.hbm_to_vmem [thread:$0]  %s10527_s10, 512, %s126_s0, [#allocation17], %s9422_s5, %s9422_s5, %s9423_s22  }
  0x3b   :  { %s9186_s7 = scalar_lea.vmem %s150_s4, 512  ;;  %p9191_p7 = scmp.lt.s32.totalorder %s150_s4, %s150_s4 }
  0x3c   :  { %p9187_p6 = scmp.ne.s32.totalorder %s150_s4, %s9186_s7  ;;  %p9192_p8 = scmp.lt.s32.totalorder %s9186_s7, %s9186_s7 }
  0x3e   :  { %p9193_p9 = por %p9192_p8, %p9191_p7 }
  0x40   :  { %p9194_p10 = pnand %p9193_p9, %p9187_p6 }
  0x42   :  { %9197 = shalt.err (!%p9194_p10)
}
  0x43   :  { %155 = dma.hbm_to_vmem [thread:$0]  %s10529_s12, 512, %s150_s4, [#allocation20], %s9422_s5, %s9422_s5, %s9423_s22  }
  0x44   :  { %s9424_s25 = smov [#allocation22]   ;;  %s9425_s29 = smov [#allocation25]  }
  0x45   :  { %s173_s3 = sshll.u32 %s9424_s25, 4  ;;  %s197_s10 = sshll.u32 %s9425_s29, 4  ;;  %s174_s3 = int_to_ptr.vmem [resolvable:$true] %s173_s3  ;;  %s198_s10 = int_to_ptr.vmem [resolvable:$true] %s197_s10 }
  0x46   :  { %s9206_s28 = scalar_lea.vmem %s174_s3, 32  ;;  %p9211_p12 = scmp.lt.s32.totalorder %s174_s3, %s174_s3 }
  0x47   :  { %p9207_p11 = scmp.ne.s32.totalorder %s174_s3, %s9206_s28  ;;  %p9212_p13 = scmp.lt.s32.totalorder %s9206_s28, %s9206_s28 }
  0x49   :  { %p9213_p0 = por %p9212_p13, %p9211_p12 }
  0x4b   :  { %p9214_p1 = pnand %p9213_p0, %p9207_p11 }
  0x4d   :  { %9217 = shalt.err (!%p9214_p1)
}
  0x4e   :  { %179 = dma.hbm_to_vmem [thread:$0]  %s10531_s14, 32, %s174_s3, [#allocation23], %s9418_s26, %s9418_s26, %s9419_s27  }
  0x4f   :  { %s9226_s12 = scalar_lea.vmem %s198_s10, 32  ;;  %p9231_p3 = scmp.lt.s32.totalorder %s198_s10, %s198_s10 }
  0x50   :  { %p9227_p2 = scmp.ne.s32.totalorder %s198_s10, %s9226_s12  ;;  %p9232_p4 = scmp.lt.s32.totalorder %s9226_s12, %s9226_s12 }
  0x52   :  { %p9233_p5 = por %p9232_p4, %p9231_p3 }
  0x54   :  { %p9234_p6 = pnand %p9233_p5, %p9227_p2 }
  0x56   :  { %9237 = shalt.err (!%p9234_p6)
}
  0x57   :  { %203 = dma.hbm_to_vmem [thread:$0]  %s10533_s16, 32, %s198_s10, [#allocation26], %s9418_s26, %s9418_s26, %s9419_s27  }
  0x58   :  { %s9426_s23 = smov [#allocation5]   ;;  %s9427_s7 = smov [#allocation9]  }
  0x59   :  { %s46_s1 = sshll.u32 %s9426_s23, 4  ;;  %s65_s14 = sshll.u32 %s9427_s7, 4  ;;  %s47_s1 = int_to_ptr.vmem [resolvable:$true] %s46_s1  ;;  %s66_s14 = int_to_ptr.vmem [resolvable:$true] %s65_s14 }
  0x5a   :  { %s9246_s24 = scalar_lea.vmem %s47_s1, 16  ;;  %s9250_s2 = scalar_lea.vmem %s47_s1, 32 }
  0x5b   :  { %p9247_p7 = scmp.ne.s32.totalorder %s47_s1, %s9246_s24  ;;  %p9251_p8 = scmp.lt.s32.totalorder %s47_s1, %s47_s1 }
  0x5c   :  { %p9252_p9 = scmp.lt.s32.totalorder %s9250_s2, %s9246_s24 }
  0x5e   :  { %p9253_p10 = por %p9252_p9, %p9251_p8 }
  0x60   :  { %p9254_p11 = pnand %p9253_p10, %p9247_p7 }
  0x62   :  { %9257 = shalt.err (!%p9254_p11)
}
  0x63   :  { %s10548_s29 = sld [smem:[#allocation38_spill]]  ;;  %s9266_s28 = scalar_lea.vmem %s66_s14, 1024 }
  0x64   :  { %p9267_p12 = scmp.ne.s32.totalorder %s66_s14, %s9266_s28  ;;  %p9271_p13 = scmp.lt.s32.totalorder %s66_s14, %s66_s14 }
  0x65   :  { %p9272_p0 = scmp.lt.s32.totalorder %s9266_s28, %s9266_s28 }
  0x67   :  { %p9273_p1 = por %p9272_p0, %p9271_p13 }
  0x69   :  { %49 = dma.hbm_to_vmem [thread:$0]  %s10548_s29, 16, %s47_s1, [#allocation6]  }
  0x6a   :  { %p9274_p2 = pnand %p9273_p1, %p9267_p12 }
  0x6c   :  { %9277 = shalt.err (!%p9274_p2)
}
  0x6d   :  { %s9428_s16 = smov 256   ;;  %s10549_s20 = sld [smem:[#allocation40_spill]] }
  0x6e   :  { %s9429_s12 = smov [#allocation12]   ;;  %s9430_s30 = smov [#allocation15]  }
  0x6f   :  { %s87_s4 = sshll.u32 %s9429_s12, 4  ;;  %s113_s23 = sshll.u32 %s9430_s30, 4  ;;  %s88_s4 = int_to_ptr.vmem [resolvable:$true] %s87_s4  ;;  %s114_s23 = int_to_ptr.vmem [resolvable:$true] %s113_s23 }
  0x70   :  { %s9286_s1 = scalar_lea.vmem %s88_s4, 4096  ;;  %p9291_p4 = scmp.lt.s32.totalorder %s88_s4, %s88_s4 }
  0x71   :  { %p9287_p3 = scmp.ne.s32.totalorder %s88_s4, %s9286_s1  ;;  %p9292_p5 = scmp.lt.s32.totalorder %s9286_s1, %s9286_s1 }
  0x73   :  { %71 = dma.hbm_to_vmem [thread:$0]  %s10549_s20, 1024, %s66_s14, [#allocation8], %s9428_s16, %s9428_s16, %s9418_s26  }
  0x74   :  { %p9293_p6 = por %p9292_p5, %p9291_p4 }
  0x76   :  { %p9294_p7 = pnand %p9293_p6, %p9287_p3 }
  0x78   :  { %9297 = shalt.err (!%p9294_p7)
}
  0x79   :  { %93 = dma.hbm_to_vmem [thread:$0]  %s10523_s6, 4096, %s88_s4, [#allocation11], %s9422_s5, %s9422_s5, %s9423_s22  }
  0x7a   :  { %s9306_s14 = scalar_lea.vmem %s114_s23, 32  ;;  %p9311_p9 = scmp.lt.s32.totalorder %s114_s23, %s114_s23 }
  0x7b   :  { %p9307_p8 = scmp.ne.s32.totalorder %s114_s23, %s9306_s14  ;;  %p9312_p10 = scmp.lt.s32.totalorder %s9306_s14, %s9306_s14 }
  0x7d   :  { %p9313_p11 = por %p9312_p10, %p9311_p9 }
  0x7f   :  { %p9314_p12 = pnand %p9313_p11, %p9307_p8 }
  0x81   :  { %9317 = shalt.err (!%p9314_p12)
}
  0x82   :  { %119 = dma.hbm_to_vmem [thread:$0]  %s10526_s9, 32, %s114_s23, [#allocation14], %s9418_s26, %s9418_s26, %s9419_s27  }
  0x83   :  { %s9431_s3 = smov [#allocation18]   ;;  %s9432_s28 = smov [#allocation21]  }
  0x84   :  { %s137_s29 = sshll.u32 %s9431_s3, 4  ;;  %s161_s16 = sshll.u32 %s9432_s28, 4  ;;  %s138_s29 = int_to_ptr.vmem [resolvable:$true] %s137_s29  ;;  %s162_s16 = int_to_ptr.vmem [resolvable:$true] %s161_s16 }
  0x85   :  { %s9326_s6 = scalar_lea.vmem %s138_s29, 32  ;;  %p9331_p0 = scmp.lt.s32.totalorder %s138_s29, %s138_s29 }
  0x86   :  { %p9327_p13 = scmp.ne.s32.totalorder %s138_s29, %s9326_s6  ;;  %p9332_p1 = scmp.lt.s32.totalorder %s9326_s6, %s9326_s6 }
  0x88   :  { %p9333_p2 = por %p9332_p1, %p9331_p0 }
  0x8a   :  { %p9334_p3 = pnand %p9333_p2, %p9327_p13 }
  0x8c   :  { %9337 = shalt.err (!%p9334_p3)
}
  0x8d   :  { %143 = dma.hbm_to_vmem [thread:$0]  %s10528_s11, 32, %s138_s29, [#allocation17], %s9418_s26, %s9418_s26, %s9419_s27  }
  0x8e   :  { %s9346_s9 = scalar_lea.vmem %s162_s16, 512  ;;  %p9351_p5 = scmp.lt.s32.totalorder %s162_s16, %s162_s16 }
  0x8f   :  { %p9347_p4 = scmp.ne.s32.totalorder %s162_s16, %s9346_s9  ;;  %p9352_p6 = scmp.lt.s32.totalorder %s9346_s9, %s9346_s9 }
  0x91   :  { %p9353_p7 = por %p9352_p6, %p9351_p5 }
  0x93   :  { %p9354_p8 = pnand %p9353_p7, %p9347_p4 }
  0x95   :  { %9357 = shalt.err (!%p9354_p8)
}
  0x96   :  { %167 = dma.hbm_to_vmem [thread:$0]  %s10530_s13, 512, %s162_s16, [#allocation20], %s9422_s5, %s9422_s5, %s9423_s22  }
  0x97   :  { %s9433_s4 = smov [#allocation24]   ;;  %s9434_s23 = smov [#allocation27]  }
  0x98   :  { %s185_s30 = sshll.u32 %s9433_s4, 4  ;;  %s212_s1 = sshll.u32 %s9434_s23, 4  ;;  %s186_s30 = int_to_ptr.vmem [resolvable:$true] %s185_s30  ;;  %s213_s1 = int_to_ptr.vmem [resolvable:$true] %s212_s1 }
  0x99   :  { %s9366_s11 = scalar_lea.vmem %s186_s30, 32  ;;  %p9371_p10 = scmp.lt.s32.totalorder %s186_s30, %s186_s30 }
  0x9a   :  { %p9367_p9 = scmp.ne.s32.totalorder %s186_s30, %s9366_s11  ;;  %p9372_p11 = scmp.lt.s32.totalorder %s9366_s11, %s9366_s11 }
  0x9c   :  { %p9373_p12 = por %p9372_p11, %p9371_p10 }
  0x9e   :  { %p9374_p13 = pnand %p9373_p12, %p9367_p9 }
  0xa0   :  { %9377 = shalt.err (!%p9374_p13)
}
  0xa1   :  { %191 = dma.hbm_to_vmem [thread:$0]  %s10532_s15, 32, %s186_s30, [#allocation23], %s9418_s26, %s9418_s26, %s9419_s27  }
  0xa2   :  { %s9386_s13 = scalar_lea.vmem %s213_s1, 16  ;;  %s9390_s22 = scalar_lea.vmem %s213_s1, 32 }
  0xa3   :  { %p9387_p0 = scmp.ne.s32.totalorder %s213_s1, %s9386_s13  ;;  %p9391_p1 = scmp.lt.s32.totalorder %s213_s1, %s213_s1 }
  0xa4   :  { %p9392_p2 = scmp.lt.s32.totalorder %s9390_s22, %s9386_s13 }
  0xa6   :  { %p9393_p3 = por %p9392_p2, %p9391_p1 }
  0xa8   :  { %p9394_p4 = pnand %p9393_p3, %p9387_p0 }
  0xaa   :  { %9397 = shalt.err (!%p9394_p4)
}
  0xab   :  { %215 = dma.hbm_to_vmem [thread:$0]  %s10535_s18, 16, %s213_s1, [#allocation26]  }
  0xac   :  { %9399 = dma.done.wait [#allocation6], 16  }
  0xad   :  { %9400 = vsyncadd [#allocation6], 4294967280 }
  0xae   :  { %9401 = dma.done.wait [#allocation8], 1040  }
  0xaf   :  { %9402 = vsyncadd [#allocation8], 4294966256 }
  0xb0   :  { %9403 = dma.done.wait [#allocation11], 4160  }
  0xb1   :  { %9404 = vsyncadd [#allocation11], 4294963136 }
  0xb2   :  { %9405 = dma.done.wait [#allocation14], 64  }
  0xb3   :  { %9406 = vsyncadd [#allocation14], 4294967232 }
  0xb4   :  { %9407 = dma.done.wait [#allocation17], 544  }
  0xb5   :  { %9408 = vsyncadd [#allocation17], 4294966752 }
  0xb6   :  { %9409 = dma.done.wait [#allocation20], 1024  }
  0xb7   :  { %9410 = vsyncadd [#allocation20], 4294966272 }
  0xb8   :  { %9411 = dma.done.wait [#allocation23], 64  }
  0xb9   :  { %9412 = vsyncadd [#allocation23], 4294967232 }
  0xba   :  { %9413 = dma.done.wait [#allocation26], 48  }
  0xbb   :  { %9414 = vsyncadd [#allocation26], 4294967248  ;;  %vm353_vm0 = vcmask 261120   ;;  %s9435_s15 = smov 0   ;;  %v9436_v1 = vmov 0.0   ;;  %vm9437_vm1 = vmmov 0   ;;  %v373_v45 = vlaneseq }
  0xbc   :  { %352 = sst [smem:[#allocation3]] %s9435_s15  ;;  %7966 = vmatprep.subr.bf16.mxu0 %v9436_v1  ;;  %354 = vst.msk [vmem:[#allocation2] sm:$0xff] %vm353_vm0, %v9436_v1  ;;  %7972 = vmatprep.mubr.msk.bf16.mxu0 %vm9437_vm1, %v9436_v1  ;;  %vm299_vm2 = vcmask 392192   ;;  %v9675_v7 = vld [vmem:[#allocation5] ss:$0 sm:$0xff]  ;;  %v9438_v17 = vmov 0  }
  0xbd   :  { %s10550_s27 = sld [smem:[#allocation37_spill]]  ;;  %v7077_v9 = vld [vmem:[#allocation7] ss:$0 sm:$0xff]  ;;  %v8570_v15 = vld [vmem:[#allocation9 + $0x24] ss:$16 sps:$4 sm:$0xff]   ;;  %509 = vmatprep.mubr.bf16.mxu1 %v9438_v17  ;;  %v8580_v27 = vld [vmem:[#allocation12 + $0x68] sm:$0xff]  }
  0xbe   :  { %s10551_s10 = sld [smem:[#allocation36_spill]]  ;;  %v8572_v16 = vld [vmem:[#allocation9 + $0x20] ss:$16 sps:$4 sm:$0xff]   ;;  %v8573_v18 = vld [vmem:[#allocation9 + $0x4] ss:$16 sps:$4 sm:$0xff]   ;;  %v9693_v46 = vshrl.u32 %v373_v45, 7 }
  0xbf   :  { %v8575_v20 = vld [vmem:[#allocation9] ss:$16 sps:$4 sm:$0xff]   ;;  %v8578_v25 = vld [vmem:[#allocation12 + $0x70] sm:$0xff]   ;;  %v8582_v29 = vld [vmem:[#allocation12 + $0x60] sm:$0xff]   ;;  %s9439_s18 = smov 96   ;;  %s9440_s26 = smov 32  }
  0xc0   :  { %v8576_v22 = vld [vmem:[#allocation12 + $0x78] sm:$0xff]   ;;  %v8579_v26 = vld [vmem:[#allocation12 + $0x30] sm:$0xff]   ;;  %v8581_v28 = vld [vmem:[#allocation12 + $0x28] sm:$0xff]   ;;  %v9696_v47 = vsub.s32 0, %v9693_v46  ;;  %v9701_v49 = vsub.s32 1, %v9693_v46  ;;  %vm954_vm3 = vcmask 64512  }
  0xc1   :  { %v8577_v24 = vld [vmem:[#allocation12 + $0x38] sm:$0xff]   ;;  %v8583_v30 = vld [vmem:[#allocation12 + $0x20] sm:$0xff]   ;;  %v8586_v33 = vld [vmem:[#allocation12 + $0x50] sm:$0xff]   ;;  %vm972_vm4 = vcmask 1043456   ;;  %vm1885_vm5 = vcmask 523264   ;;  %vm2003_vm6 = vcmask 7168  }
  0xc2   :  { %v8584_v31 = vld [vmem:[#allocation12 + $0x58] sm:$0xff]   ;;  %v8587_v34 = vld [vmem:[#allocation12 + $0x10] sm:$0xff]   ;;  %v8588_v35 = vld [vmem:[#allocation12 + $0x48] sm:$0xff]  }
  0xc3   :  { %v8567_v2 = vld [vmem:[%s10550_s27 + $0x10] sm:$0xff]   ;;  %v8568_v3 = vld [vmem:[%s10550_s27 + $0x8] sm:$0xff]   ;;  %v9665_v4 = vld [vmem:[%s10550_s27] sm:$0xff]  }
  0xc4   :  { %7967 = vmatpush3.bf16.msra.mxu0 %v8567_v2  ;;  %v266_v5 = vld [vmem:[%s10551_s10] sm:$0xff]  ;;  %v8585_v32 = vld [vmem:[#allocation12 + $0x18] sm:$0xff]   ;;  %v8590_v37 = vld [vmem:[#allocation12 + $0x40] sm:$0xff]  }
  0xc5   :  { %7968 = vmatprep.subr.bf16.mxu0 %v9436_v1  ;;  %v9671_v6 = vpack.c.bf16 %v266_v5, %v266_v5  ;;  %v360_v19 = vld [vmem:[#allocation2] sm:$0xff]  ;;  %v8591_v38 = vld [vmem:[#allocation12] sm:$0xff]   ;;  %v8592_v39 = vld [vmem:[#allocation9 + $0x2c] ss:$16 sps:$4 sm:$0xff]  }
  0xc6   :  { %v8589_v36 = vld [vmem:[#allocation12 + $0x8] sm:$0xff]   ;;  %v8594_v40 = vld [vmem:[#allocation9 + $0x28] ss:$16 sps:$4 sm:$0xff]   ;;  %489 = vmatprep.subr.bf16.mxu1 %v8592_v39  ;;  %v9698_v48 = vld [vmem:[#allocation10] sm:$0xf] }
  0xc7   :  { %v8595_v41 = vld [vmem:[#allocation9 + $0xc] ss:$16 sps:$4 sm:$0xff]   ;;  %490 = vmatpush1.bf16.msra.mxu1 %v8594_v40  ;;  %v8597_v42 = vld [vmem:[#allocation9 + $0x8] ss:$16 sps:$4 sm:$0xff]   ;;  %v376_v50 = vrot.slane %v9698_v48, %v9696_v47  ;;  %v380_v51 = vrot.slane %v9698_v48, %v9701_v49 }
  0xc8   :  { %7969 = vmatpush3.bf16.msra.mxu0 %v8568_v3  ;;  %491 = vmatprep.subr.bf16.mxu1 %v8595_v41  ;;  %v8598_v43 = vld [vmem:[%s10525_s8 + $0x38] sm:$0xff]   ;;  %v8599_v44 = vld [vmem:[%s10525_s8 + $0x30] sm:$0xff]   ;;  %v8600_v62 = vld [vmem:[%s10525_s8 + $0x28] sm:$0xff]  }
  0xc9   :  { %7970 = vmatprep.subr.bf16.mxu0 %v9436_v1  ;;  %v8601_v63 = vld [vmem:[%s10525_s8 + $0x20] sm:$0xff]   ;;  %v8602_v0 = vld [vmem:[%s10525_s8 + $0x18] sm:$0xff]   ;;  %v8603_v2 = vld [vmem:[%s10525_s8 + $0x10] sm:$0xff]  }
  0xca   :  { %v8604_v3 = vld [vmem:[%s10525_s8 + $0x8] sm:$0xff]   ;;  %v8605_v5 = vld [vmem:[%s10525_s8] sm:$0xff]  }
  0xcb   :  { %492 = vmatpush1.bf16.msra.mxu1 %v8597_v42 }
  0xcc   :  { %7971 = vmatpush3.bf16.msra.mxu0 %v9665_v4  ;;  %7976 = vmatprep.subr.bf16.mxu1 %v9436_v1 }
  0xcd   :  { %448 = vmatprep.subr.bf16.mxu0 %v8570_v15 }
  0xcf   :  { %7973 = vmatmul.mubr.msk.bf16.vlgmr.msra.gmra.mxu0 %vm299_vm2, %v9671_v6 }
  0xd0   :  { %468 = vmatprep.mubr.bf16.mxu0 %v9438_v17  ;;  %449 = vmatpush1.bf16.msra.mxu0 %v8572_v16 }
  0xd1   :  { %450 = vmatprep.subr.bf16.mxu0 %v8573_v18 }
  0xd4   :  { %451 = vmatpush1.bf16.msra.mxu0 %v8575_v20 }
  0xd5   :  { %7580 = vmatprep.subr.bf16.mxu0 %v8576_v22  ;;  %v7106_v22 = vld [vmem:[#allocation15] ss:$0 sm:$0xff] }
 0x18f   :  { %v337_v8 = vpop.f32.mrf.mxu0 }
 0x190   :  { %v338_v10 = vadd.f32 %v9675_v7, %v337_v8 }
 0x191   :  { %v7974_v11 = vpop.f32.mrf.mxu0 }
 0x192   :  { %v9678_v12 = vadd.f32 %v7077_v9, %v338_v10 }
 0x193   :  { %v340_v13 = vpop.f32.mrf.mxu0 }
 0x194   :  { %v361_v21 = vadd.f32 %v360_v19, %v9678_v12 }
 0x195   :  { %v7975_v14 = vpop.f32.mrf.mxu0 }
 0x196   :  { %v362_v23 = vpack.c.bf16 %v361_v21, %v361_v21  ;;  %v7089_v14 = vld [vmem:[#allocation13] ss:$0 sm:$0xff] }
 0x198   :  { %7087 = vmatmul.mubr.msk.bf16.vlgmr.msra.gmra.mxu0 %vm353_vm0, %v362_v23  ;;  %7088 = vmatmul.mubr.msk.bf16.vlgmr.msra.gmra.mxu1 %vm353_vm0, %v362_v23 }
 0x199   :  { %7581 = vmatpush3.bf16.msra.mxu0 %v8577_v24  ;;  %7977 = vmatpush3.bf16.msra.mxu1 %v8598_v43 }
 0x19a   :  { %7582 = vmatprep.subr.bf16.mxu0 %v8578_v25  ;;  %7978 = vmatprep.subr.bf16.mxu1 %v9436_v1 }
 0x19b   :  { %7992 = vmatprep.mubr.msk.bf16.mxu1 %vm9437_vm1, %v9436_v1 }
 0x19d   :  { %7583 = vmatpush3.bf16.msra.mxu0 %v8579_v26  ;;  %7979 = vmatpush3.bf16.msra.mxu1 %v8599_v44  ;;  %v7116_v44 = vld [vmem:[#allocation18] ss:$0 sm:$0xff] }
 0x19e   :  { %7584 = vmatprep.subr.bf16.mxu0 %v8580_v27  ;;  %7980 = vmatprep.subr.bf16.mxu1 %v9436_v1 }
 0x1a1   :  { %7585 = vmatpush3.bf16.msra.mxu0 %v8581_v28  ;;  %7981 = vmatpush3.bf16.msra.mxu1 %v8600_v62 }
 0x1a2   :  { %7586 = vmatprep.subr.bf16.mxu0 %v8582_v29  ;;  %7982 = vmatprep.subr.bf16.mxu1 %v9436_v1 }
 0x1a5   :  { %7587 = vmatpush3.bf16.msra.mxu0 %v8583_v30  ;;  %7983 = vmatpush3.bf16.msra.mxu1 %v8601_v63 }
 0x1a6   :  { %7588 = vmatprep.subr.bf16.mxu0 %v8584_v31  ;;  %7984 = vmatprep.subr.bf16.mxu1 %v9436_v1 }
 0x1a9   :  { %7589 = vmatpush3.bf16.msra.mxu0 %v8585_v32  ;;  %7985 = vmatpush3.bf16.msra.mxu1 %v8602_v0 }
 0x1aa   :  { %7590 = vmatprep.subr.bf16.mxu0 %v8586_v33  ;;  %7986 = vmatprep.subr.bf16.mxu1 %v9436_v1 }
 0x1ad   :  { %7591 = vmatpush3.bf16.msra.mxu0 %v8587_v34  ;;  %7987 = vmatpush3.bf16.msra.mxu1 %v8603_v2 }
 0x1ae   :  { %7592 = vmatprep.subr.bf16.mxu0 %v8588_v35  ;;  %7988 = vmatprep.subr.bf16.mxu1 %v9436_v1  ;;  %v8606_v35 = vld [vmem:[#allocation16 + $0x8] sm:$0xff]  }
 0x1b1   :  { %7593 = vmatpush3.bf16.msra.mxu0 %v8589_v36  ;;  %7989 = vmatpush3.bf16.msra.mxu1 %v8604_v3 }
 0x1b2   :  { %7594 = vmatprep.subr.bf16.mxu0 %v8590_v37  ;;  %7990 = vmatprep.subr.bf16.mxu1 %v9436_v1  ;;  %v8607_v37 = vld [vmem:[#allocation16] sm:$0xff]  }
 0x1b5   :  { %7595 = vmatpush3.bf16.msra.mxu0 %v8591_v38  ;;  %7991 = vmatpush3.bf16.msra.mxu1 %v8605_v5 }
 0x1b6   :  { %7996 = vmatprep.subr.bf16.mxu0 %v9436_v1  ;;  %8004 = vmatprep.subr.bf16.mxu1 %v9436_v1 }
 0x258   :  { %v470_v52 = vpop.f32.mrf.mxu0  ;;  %v9735_v8 = vpop.f32.mrf.mxu1 }
 0x259   :  { %v471_v53 = vadd.f32 %v470_v52, %v376_v50 }
 0x25a   :  { %v472_v54 = vpop.f32.mrf.mxu0  ;;  %v9737_v9 = vpop.f32.mrf.mxu1 }
 0x25b   :  { %v473_v55 = vadd.f32 %v472_v54, %v380_v51  ;;  %8648 = vtanh.f32 %v471_v53 }
 0x25c   :  { %v474_v56 = vpop.f32.mrf.mxu0  ;;  %v515_v10 = vpop.f32.mrf.mxu1 }
 0x25d   :  { %8650 = vtanh.f32 %v473_v55 }
 0x25e   :  { %v475_v57 = vpop.f32.mrf.mxu0  ;;  %v516_v11 = vpop.f32.mrf.mxu1 }
 0x268   :  { %v8649_v58 = vpop.eup %8648 }
 0x269   :  { %v522_v61 = vpack.c.bf16 %v8649_v58, %v8649_v58 }
 0x26a   :  { %v8651_v59 = vpop.eup %8650 }
 0x26b   :  { %v523_v60 = vpack.c.bf16 %v8651_v59, %v8651_v59 }
 0x26d   :  { %691 = vmatprep.mubr.bf16.mxu0 %v523_v60 }
 0x26e   :  { %692 = vmatmul.mubr.bf16.vlgmr.msra.gmra.mxu0 %v522_v61 }
 0x26f   :  { %8000 = vmatprep.mubr.msk.bf16.mxu0 %vm9437_vm1, %v9436_v1  ;;  %7997 = vmatpush3.bf16.msra.mxu0 %v8606_v35 }
 0x270   :  { %7998 = vmatprep.subr.bf16.mxu0 %v9436_v1 }
 0x273   :  { %7999 = vmatpush3.bf16.msra.mxu0 %v8607_v37  ;;  %v8617_v37 = vld [vmem:[#allocation12 + $0xa8] sm:$0xff]  }
 0x274   :  { %8010 = vmatprep.subr.bf16.mxu0 %v9436_v1 }
 0x32e   :  { %v7596_v13 = vpop.f32.mrf.mxu0 }
 0x330   :  { %v7597_v15 = vpop.f32.mrf.mxu0 }
 0x331   :  { %v7598_v16 = vadd.f32 %v7597_v15, %v7596_v13  ;;  %v8610_v13 = vld [vmem:[#allocation21 + $0x8] sm:$0xff]  }
 0x332   :  { %v7599_v17 = vpop.f32.mrf.mxu0 }
 0x333   :  { %v694_v18 = vadd.f32 %v7598_v16, %v7089_v14  ;;  %v8611_v14 = vld [vmem:[#allocation21] sm:$0xff]  }
 0x334   :  { %v7600_v19 = vpop.f32.mrf.mxu0 }
 0x335   :  { %8652 = vtanh.f32 %v694_v18  ;;  %v8608_v18 = vld [vmem:[#allocation19 + $0x8] sm:$0xff]  }
 0x342   :  { %v8653_v20 = vpop.eup %8652 }
 0x343   :  { %v700_v21 = vpack.c.bf16 %v8653_v20, %v8653_v20  ;;  %v8609_v20 = vld [vmem:[#allocation19] sm:$0xff]  }
 0x345   :  { %7993 = vmatmul.mubr.bf16.vlgmr.msra.gmra.mxu1 %v700_v21  ;;  %v8612_v21 = vld [vmem:[#allocation12 + $0xf8] sm:$0xff]  }
 0x346   :  { %8006 = vmatprep.mubr.msk.bf16.mxu1 %vm9437_vm1, %v9436_v1 }
 0x405   :  { %v806_v23 = vpop.f32.mrf.mxu1 }
 0x406   :  { %v807_v24 = vadd.f32 %v7106_v22, %v806_v23  ;;  %v9770_v22 = vsub.s32 3, %v9693_v46 }
 0x407   :  { %v7994_v25 = vpop.f32.mrf.mxu1 }
 0x408   :  { %8654 = vtanh.f32 %v807_v24  ;;  %v7115_v29 = vmul.f32 -1.442695, %v807_v24  ;;  %v819_v40 = vmax.f32 %v807_v24, 0.0  ;;  %v388_v23 = vrot.slane %v9698_v48, %v9770_v22 }
 0x409   :  { %v809_v26 = vpop.f32.mrf.mxu1 }
 0x40a   :  { %8656 = vpow2.f32 %v7115_v29  ;;  %v514_v24 = vadd.f32 %v9737_v9, %v388_v23  ;;  %v8614_v29 = vld [vmem:[#allocation12 + $0xf0] sm:$0xff]   ;;  %v8616_v9 = vld [vmem:[#allocation12 + $0xe8] sm:$0xff]  }
 0x40b   :  { %v7995_v27 = vpop.f32.mrf.mxu1 }
 0x40c   :  { %v8613_v27 = vld [vmem:[#allocation12 + $0xb8] sm:$0xff]  }
 0x415   :  { %v8655_v28 = vpop.eup %8654 }
 0x416   :  { %821 = vrot.lane.b32.xlu0 %v8655_v28, %s9439_s18 }
 0x417   :  { %v8657_v30 = vpop.eup %8656 }
 0x418   :  { %v815_v31 = vadd.f32 1.0, %v8657_v30 }
 0x41a   :  { %8658 = vrcp.f32 %v815_v31 }
 0x427   :  { %v8659_v32 = vpop.eup %8658 }
 0x488   :  { %v822_v33 = vpop.permute.xlu0 %821 }
 0x489   :  { %v824_v34 = vmul.f32 %v8659_v32, %v822_v33  ;;  %v8615_v33 = vld [vmem:[#allocation12 + $0xb0] sm:$0xff]  }
 0x48b   :  { %8660 = vtanh.f32 %v824_v34  ;;  %v9781_v34 = vsub.s32 2, %v9693_v46  ;;  %v8620_v46 = vld [vmem:[#allocation12 + $0xd8] sm:$0xff]  }
 0x498   :  { %v8661_v36 = vpop.eup %8660 }
 0x499   :  { %827 = vrot.lane.b32.xlu0 %v8661_v36, %s9422_s5 }
 0x50b   :  { %v828_v38 = vpop.permute.xlu0 %827 }
 0x50c   :  { %v830_v39 = vmul.f32 %v8659_v32, %v828_v38  ;;  %v384_v38 = vrot.slane %v9698_v48, %v9781_v34  ;;  %v8624_v48 = vld [vmem:[#allocation12 + $0xc8] sm:$0xff]  }
 0x50e   :  { %832 = vrot.lane.b32.xlu1 %v830_v39, %s9440_s26  ;;  %v8618_v39 = vld [vmem:[#allocation12 + $0xe0] sm:$0xff]  }
 0x580   :  { %v833_v41 = vpop.permute.xlu1 %832 }
 0x581   :  { %v835_v42 = vadd.f32 %v833_v41, %v819_v40 }
 0x583   :  { %v836_v43 = vpack.c.bf16 %v835_v42, %v835_v42  ;;  %v8619_v42 = vld [vmem:[#allocation12 + $0xa0] sm:$0xff]  }
 0x585   :  { %8001 = vmatmul.mubr.msk.bf16.vlgmr.msra.gmra.mxu0 %vm353_vm0, %v836_v43 }
 0x586   :  { %8012 = vmatprep.mubr.msk.bf16.mxu0 %vm9437_vm1, %v9436_v1 }
 0x645   :  { %v897_v45 = vpop.f32.mrf.mxu0 }
 0x646   :  { %v898_v50 = vadd.f32 %v7116_v44, %v897_v45  ;;  %v8621_v45 = vld [vmem:[#allocation12 + $0x98] sm:$0xff]  }
 0x647   :  { %v8002_v51 = vpop.f32.mrf.mxu0 }
 0x648   :  { %v903_v52 = vpack.c.bf16 %v898_v50, %v898_v50  ;;  %v8622_v50 = vld [vmem:[#allocation12 + $0xd0] sm:$0xff]  }
 0x649   :  { %v900_v53 = vpop.f32.mrf.mxu0  ;;  %v8623_v51 = vld [vmem:[#allocation12 + $0x90] sm:$0xff]  }
 0x64a   :  { %905 = vrot.lane.b32.xlu1 %v903_v52, %s9439_s18  ;;  %v8626_v53 = vld [vmem:[#allocation12 + $0xc0] sm:$0xff]  }
 0x64b   :  { %v8003_v54 = vpop.f32.mrf.mxu0 }
 0x64c   :  { %v8627_v54 = vld [vmem:[#allocation12 + $0x80] sm:$0xff]  }
 0x6bc   :  { %v906_v55 = vpop.permute.xlu1 %905 }
 0x6bd   :  { %v911_v56 = vsel %vm353_vm0, %v906_v55, 0 }
 0x6be   :  { %8005 = vmatpush3.bf16.xpose.msra.mxu1 %v911_v56  ;;  %v8628_v56 = vld [vmem:[%s10525_s8 + $0x78] sm:$0xff]  }
 0x6bf   :  { %8016 = vmatprep.subr.bf16.mxu1 %v9436_v1 }
 0x6c5   :  { %8007 = vmatmul.mubr.msk.bf16.vlgmr.msra.gmra.mxu1 %vm353_vm0, %v903_v52 }
 0x6c6   :  { %8020 = vmatprep.mubr.msk.bf16.mxu1 %vm9437_vm1, %v9436_v1  ;;  %8017 = vmatpush3.bf16.msra.mxu1 %v8610_v13 }
 0x6c7   :  { %8018 = vmatprep.subr.bf16.mxu1 %v9436_v1 }
 0x6ca   :  { %8019 = vmatpush3.bf16.msra.mxu1 %v8611_v14 }
 0x6cb   :  { %7624 = vmatprep.subr.bf16.mxu1 %v8612_v21 }
 0x785   :  { %v947_v57 = vpop.f32.mrf.mxu1 }
 0x786   :  { %v953_v58 = vmul.f32 0.17677669, %v947_v57  ;;  %v8629_v57 = vld [vmem:[%s10525_s8 + $0x70] sm:$0xff]  }
 0x787   :  { %v8008_v59 = vpop.f32.mrf.mxu1 }
 0x788   :  { %v955_v60 = vsel %vm954_vm3, %v953_v58, -inf  ;;  %v8631_v59 = vld [vmem:[%s10525_s8 + $0x60] sm:$0xff]  }
 0x789   :  { %956 = vmax.xlane.f32.xlu0 %v955_v60  ;;  %v950_v61 = vpop.f32.mrf.mxu1  ;;  %v8632_v60 = vld [vmem:[%s10525_s8 + $0x58] sm:$0xff]  }
 0x78a   :  { %v8633_v61 = vld [vmem:[%s10525_s8 + $0x50] sm:$0xff]  }
 0x78b   :  { %v8009_v62 = vpop.f32.mrf.mxu1 }
 0x78c   :  { %v8634_v62 = vld [vmem:[%s10525_s8 + $0x48] sm:$0xff]  }
 0x79f   :  { %967 = vrot.lane.b32.xlu0 %v903_v52, %s9422_s5  ;;  %v8625_v52 = vld [vmem:[#allocation12 + $0x88] sm:$0xff]  }
 0x812   :  { %v957_v63 = vpop.xlane.xlu0 %956 }
 0x813   :  { %v958_v0 = vsub.f32 %v953_v58, %v957_v63  ;;  %v8630_v58 = vld [vmem:[%s10525_s8 + $0x68] sm:$0xff]   ;;  %v8635_v63 = vld [vmem:[%s10525_s8 + $0x40] sm:$0xff]  }
 0x815   :  { %v959_v2 = vmul.f32 1.442695, %v958_v0 }
 0x816   :  { %v968_v3 = vpop.permute.xlu0 %967 }
 0x817   :  { %8662 = vpow2.f32 %v959_v2  ;;  %v974_v5 = vsel %vm972_vm4, %v968_v3, 0 }
 0x818   :  { %8011 = vmatpush3.bf16.msra.mxu0 %v974_v5 }
 0x819   :  { %8024 = vmatprep.subr.bf16.mxu0 %v9436_v1 }
 0x824   :  { %v8663_v10 = vpop.eup %8662 }
 0x825   :  { %v961_v11 = vsel %vm954_vm3, %v8663_v10, 0.0 }
 0x826   :  { %962 = vadd.xlane.f32.xlu1 %v961_v11  ;;  %v7132_v11 = vld [vmem:[#allocation13 + $0x1] ss:$0 sm:$0xff] }
 0x8af   :  { %v963_v15 = vpop.xlane.xlu1 %962 }
 0x8b0   :  { %8664 = vrcp.f32 %v963_v15 }
 0x8b1   :  { %8666 = vtanh.f32 %v514_v24 }
 0x8bd   :  { %v8665_v16 = vpop.eup %8664 }
 0x8be   :  { %v965_v17 = vmul.f32 %v8665_v16, %v8663_v10  ;;  %v8667_v25 = vpop.eup %8666 }
 0x8bf   :  { %v1178_v31 = vpack.c.bf16 %v8667_v25, %v8667_v25 }
 0x8c0   :  { %v966_v19 = vpack.c.bf16 %v965_v17, %v965_v17 }
 0x8c2   :  { %8013 = vmatmul.mubr.msk.bf16.vlgmr.msra.gmra.mxu0 %vm954_vm3, %v966_v19 }
 0x8c3   :  { %8025 = vmatpush3.bf16.msra.mxu0 %v8608_v18  ;;  %8028 = vmatprep.mubr.msk.bf16.mxu0 %vm9437_vm1, %v9436_v1 }
 0x8c4   :  { %8026 = vmatprep.subr.bf16.mxu0 %v9436_v1 }
 0x8c7   :  { %8027 = vmatpush3.bf16.msra.mxu0 %v8609_v20  ;;  %v7165_v20 = vld [vmem:[#allocation15 + $0x1] ss:$0 sm:$0xff] }
 0x8c8   :  { %8032 = vmatprep.subr.bf16.mxu0 %v9436_v1 }
 0x8ca   :  { %8029 = vmatmul.mubr.msk.bf16.vlgmr.msra.gmra.mxu0 %vm353_vm0, %v836_v43  ;;  %v512_v43 = vadd.f32 %v9735_v8, %v384_v38  ;;  %v8637_v38 = vld [vmem:[#allocation16 + $0x10] sm:$0xff]  }
 0x8cb   :  { %8048 = vmatprep.mubr.msk.bf16.mxu0 %vm9437_vm1, %v9436_v1  ;;  %8033 = vmatpush3.bf16.msra.mxu0 %v8628_v56 }
 0x8cc   :  { %8668 = vtanh.f32 %v512_v43  ;;  %8034 = vmatprep.subr.bf16.mxu0 %v9436_v1 }
 0x8cf   :  { %8035 = vmatpush3.bf16.msra.mxu0 %v8629_v57 }
 0x8d0   :  { %8036 = vmatprep.subr.bf16.mxu0 %v9436_v1 }
 0x8d3   :  { %8037 = vmatpush3.bf16.msra.mxu0 %v8630_v58 }
 0x8d4   :  { %8038 = vmatprep.subr.bf16.mxu0 %v9436_v1 }
 0x8d7   :  { %8039 = vmatpush3.bf16.msra.mxu0 %v8631_v59 }
 0x8d8   :  { %8040 = vmatprep.subr.bf16.mxu0 %v9436_v1 }
 0x8d9   :  { %v8669_v8 = vpop.eup %8668 }
 0x8da   :  { %v1177_v55 = vpack.c.bf16 %v8669_v8, %v8669_v8 }
 0x8db   :  { %8041 = vmatpush3.bf16.msra.mxu0 %v8632_v60 }
 0x8dc   :  { %8042 = vmatprep.subr.bf16.mxu0 %v9436_v1 }
 0x8df   :  { %8043 = vmatpush3.bf16.msra.mxu0 %v8633_v61 }
 0x8e0   :  { %8044 = vmatprep.subr.bf16.mxu0 %v9436_v1 }
 0x8e3   :  { %8045 = vmatpush3.bf16.msra.mxu0 %v8634_v62 }
 0x8e4   :  { %8046 = vmatprep.subr.bf16.mxu0 %v9436_v1 }
 0x8e7   :  { %8047 = vmatpush3.bf16.msra.mxu0 %v8635_v63 }
 0x8e8   :  { %8060 = vmatprep.subr.bf16.mxu0 %v9436_v1 }
 0x982   :  { %v9775_v26 = vpop.f32.mrf.mxu0 }
 0x983   :  { %v1020_v28 = vpack.c.bf16 %v9775_v26, %v9775_v26 }
 0x984   :  { %v8014_v30 = vpop.f32.mrf.mxu0 }
 0x985   :  { %8021 = vmatmul.mubr.msk.bf16.vlgmr.msra.gmra.mxu1 %vm353_vm0, %v1020_v28 }
 0x986   :  { %7625 = vmatpush3.bf16.msra.mxu1 %v8613_v27  ;;  %v1013_v32 = vpop.f32.mrf.mxu0  ;;  %1348 = vmatprep.mubr.bf16.mxu1 %v1178_v31 }
 0x987   :  { %7626 = vmatprep.subr.bf16.mxu1 %v8614_v29 }
 0x988   :  { %v8015_v35 = vpop.f32.mrf.mxu0 }
 0x989   :  { %v8636_v35 = vld [vmem:[#allocation16 + $0x18] sm:$0xff]  }
 0x98a   :  { %7627 = vmatpush3.bf16.msra.mxu1 %v8615_v33  ;;  %v9783_v36 = vpop.f32.mrf.mxu0 }
 0x98b   :  { %7628 = vmatprep.subr.bf16.mxu1 %v8616_v9 }
 0x98c   :  { %v8030_v40 = vpop.f32.mrf.mxu0 }
 0x98e   :  { %7629 = vmatpush3.bf16.msra.mxu1 %v8617_v37  ;;  %v1129_v41 = vpop.f32.mrf.mxu0 }
 0x98f   :  { %7630 = vmatprep.subr.bf16.mxu1 %v8618_v39 }
 0x990   :  { %v8031_v44 = vpop.f32.mrf.mxu0 }
 0x991   :  { %v7175_v44 = vld [vmem:[#allocation18 + $0x1] ss:$0 sm:$0xff] }
 0x992   :  { %7631 = vmatpush3.bf16.msra.mxu1 %v8619_v42 }
 0x993   :  { %7632 = vmatprep.subr.bf16.mxu1 %v8620_v46 }
 0x996   :  { %7633 = vmatpush3.bf16.msra.mxu1 %v8621_v45 }
 0x997   :  { %7634 = vmatprep.subr.bf16.mxu1 %v8622_v50 }
 0x99a   :  { %7635 = vmatpush3.bf16.msra.mxu1 %v8623_v51 }
 0x99b   :  { %7636 = vmatprep.subr.bf16.mxu1 %v8624_v48 }
 0x99e   :  { %7637 = vmatpush3.bf16.msra.mxu1 %v8625_v52 }
 0x99f   :  { %7638 = vmatprep.subr.bf16.mxu1 %v8626_v53 }
 0x9a2   :  { %7639 = vmatpush3.bf16.msra.mxu1 %v8627_v54 }
 0x9a3   :  { %8052 = vmatprep.subr.bf16.mxu1 %v9436_v1 }
 0x9a5   :  { %1349 = vmatmul.mubr.bf16.vlgmr.msra.gmra.mxu1 %v1177_v55 }
 0x9a6   :  { %8056 = vmatprep.mubr.msk.bf16.mxu1 %vm9437_vm1, %v9436_v1  ;;  %8053 = vmatpush3.bf16.msra.mxu1 %v8636_v35 }
 0x9a7   :  { %8054 = vmatprep.subr.bf16.mxu1 %v9436_v1 }
 0x9aa   :  { %8055 = vmatpush3.bf16.msra.mxu1 %v8637_v38 }
 0x9ab   :  { %8066 = vmatprep.subr.bf16.mxu1 %v9436_v1 }
 0xa45   :  { %v9823_v0 = vpop.f32.mrf.mxu1 }
 0xa47   :  { %v8022_v2 = vpop.f32.mrf.mxu1 }
 0xa49   :  { %v1077_v3 = vpop.f32.mrf.mxu1 }
 0xa4b   :  { %v8023_v5 = vpop.f32.mrf.mxu1 }
 0xa4c   :  { %v8640_v5 = vld [vmem:[#allocation21 + $0x18] sm:$0xff]  }
 0xa65   :  { %v7640_v10 = vpop.f32.mrf.mxu1 }
 0xa67   :  { %v7641_v13 = vpop.f32.mrf.mxu1 }
 0xa68   :  { %v7642_v14 = vadd.f32 %v7641_v13, %v7640_v10 }
 0xa69   :  { %v7643_v15 = vpop.f32.mrf.mxu1 }
 0xa6a   :  { %v1351_v16 = vadd.f32 %v7642_v14, %v7132_v11 }
 0xa6b   :  { %v7644_v17 = vpop.f32.mrf.mxu1 }
 0xa6c   :  { %8670 = vtanh.f32 %v1351_v16  ;;  %v8638_v16 = vld [vmem:[#allocation19 + $0x18] sm:$0xff]  }
 0xa79   :  { %v8671_v18 = vpop.eup %8670 }
 0xa7a   :  { %v1357_v19 = vpack.c.bf16 %v8671_v18, %v8671_v18  ;;  %v8639_v18 = vld [vmem:[#allocation19 + $0x10] sm:$0xff]  }
 0xa7c   :  { %8049 = vmatmul.mubr.bf16.vlgmr.msra.gmra.mxu0 %v1357_v19  ;;  %v8641_v19 = vld [vmem:[#allocation21 + $0x10] sm:$0xff]  }
 0xa7d   :  { %8062 = vmatprep.mubr.msk.bf16.mxu0 %vm9437_vm1, %v9436_v1 }
 0xb3c   :  { %v1465_v21 = vpop.f32.mrf.mxu0 }
 0xb3d   :  { %v1466_v23 = vadd.f32 %v7165_v20, %v1465_v21 }
 0xb3e   :  { %v8050_v24 = vpop.f32.mrf.mxu0 }
 0xb3f   :  { %8672 = vtanh.f32 %v1466_v23  ;;  %v7174_v29 = vmul.f32 -1.442695, %v1466_v23  ;;  %v1478_v41 = vmax.f32 %v1466_v23, 0.0 }
 0xb40   :  { %v1468_v25 = vpop.f32.mrf.mxu0 }
 0xb41   :  { %8674 = vpow2.f32 %v7174_v29 }
 0xb42   :  { %v8051_v27 = vpop.f32.mrf.mxu0 }
 0xb4c   :  { %v8673_v28 = vpop.eup %8672 }
 0xb4d   :  { %1480 = vrot.lane.b32.xlu1 %v8673_v28, %s9439_s18 }
 0xb4e   :  { %v8675_v30 = vpop.eup %8674 }
 0xb4f   :  { %v1474_v31 = vadd.f32 1.0, %v8675_v30 }
 0xb51   :  { %8676 = vrcp.f32 %v1474_v31  ;;  %v1127_v31 = vadd.f32 %v9783_v36, %v9823_v0 }
 0xb5e   :  { %v8677_v32 = vpop.eup %8676 }
 0xbbf   :  { %v1481_v33 = vpop.permute.xlu1 %1480 }
 0xbc0   :  { %v1483_v9 = vmul.f32 %v8677_v32, %v1481_v33 }
 0xbc2   :  { %8678 = vtanh.f32 %v1483_v9 }
 0xbcf   :  { %v8679_v37 = vpop.eup %8678 }
 0xbd0   :  { %1486 = vrot.lane.b32.xlu0 %v8679_v37, %s9422_s5  ;;  %v7187_v37 = vld [vmem:[#allocation22 + $0x1] ss:$0 sm:$0xff] }
 0xc42   :  { %v1487_v39 = vpop.permute.xlu0 %1486 }
 0xc43   :  { %v1489_v40 = vmul.f32 %v8677_v32, %v1487_v39  ;;  %v7128_v32 = vld [vmem:[#allocation22] ss:$0 sm:$0xff] }
 0xc44   :  { %v1139_v33 = vadd.f32 %v7128_v32, %v1127_v31 }
 0xc45   :  { %1491 = vrot.lane.b32.xlu1 %v1489_v40, %s9440_s26 }
 0xc46   :  { %v7129_v9 = vmul.f32 -1.442695, %v1139_v33  ;;  %v8646_v33 = vld [vmem:[%s10536_s19 + $0x8] sm:$0xff]  }
 0xcb7   :  { %v1492_v42 = vpop.permute.xlu1 %1491 }
 0xcb8   :  { %v1494_v43 = vadd.f32 %v1492_v42, %v1478_v41 }
 0xcba   :  { %v1495_v46 = vpack.c.bf16 %v1494_v43, %v1494_v43 }
 0xcbc   :  { %8057 = vmatmul.mubr.msk.bf16.vlgmr.msra.gmra.mxu1 %vm353_vm0, %v1495_v46 }
 0xcbd   :  { %8068 = vmatprep.mubr.msk.bf16.mxu1 %vm9437_vm1, %v9436_v1 }
 0xd7c   :  { %v1558_v45 = vpop.f32.mrf.mxu1 }
 0xd7d   :  { %v1559_v50 = vadd.f32 %v7175_v44, %v1558_v45 }
 0xd7e   :  { %v8058_v51 = vpop.f32.mrf.mxu1 }
 0xd7f   :  { %v1564_v48 = vpack.c.bf16 %v1559_v50, %v1559_v50 }
 0xd80   :  { %v1561_v52 = vpop.f32.mrf.mxu1 }
 0xd81   :  { %1566 = vrot.lane.b32.xlu0 %v1564_v48, %s9439_s18 }
 0xd82   :  { %v8059_v53 = vpop.f32.mrf.mxu1 }
 0xdf3   :  { %v1567_v54 = vpop.permute.xlu0 %1566 }
 0xdf4   :  { %v1572_v8 = vsel %vm353_vm0, %v1567_v54, 0 }
 0xdf5   :  { %8061 = vmatpush3.bf16.xpose.msra.mxu0 %v1572_v8 }
 0xdf6   :  { %8072 = vmatprep.subr.bf16.mxu0 %v9436_v1 }
 0xdfc   :  { %8063 = vmatmul.mubr.msk.bf16.vlgmr.msra.gmra.mxu0 %vm353_vm0, %v1564_v48 }
 0xdfd   :  { %8076 = vmatprep.mubr.msk.bf16.mxu0 %vm9437_vm1, %v9436_v1  ;;  %8073 = vmatpush3.bf16.msra.mxu0 %v8640_v5 }
 0xdfe   :  { %8074 = vmatprep.subr.bf16.mxu0 %v9436_v1 }
 0xe01   :  { %8075 = vmatpush3.bf16.msra.mxu0 %v8641_v19 }
 0xe02   :  { %8088 = vmatprep.subr.bf16.mxu0 %v9436_v1 }
 0xebc   :  { %v1608_v55 = vpop.f32.mrf.mxu0 }
 0xebd   :  { %v1614_v56 = vmul.f32 0.17677669, %v1608_v55 }
 0xebe   :  { %v8064_v57 = vpop.f32.mrf.mxu0 }
 0xebf   :  { %v1615_v58 = vsel %vm954_vm3, %v1614_v56, -inf }
 0xec0   :  { %1616 = vmax.xlane.f32.xlu1 %v1615_v58  ;;  %v1611_v59 = vpop.f32.mrf.mxu0 }
 0xec2   :  { %v8065_v60 = vpop.f32.mrf.mxu0 }
 0xf49   :  { %v1617_v61 = vpop.xlane.xlu1 %1616 }
 0xf4a   :  { %v1618_v62 = vsub.f32 %v1614_v56, %v1617_v61 }
 0xf4c   :  { %v1619_v63 = vmul.f32 1.442695, %v1618_v62 }
 0xf4e   :  { %8680 = vpow2.f32 %v1619_v63  ;;  %v8643_v63 = vld [vmem:[%s10534_s17 + $0x10] sm:$0xff]  }
 0xf5b   :  { %v8681_v2 = vpop.eup %8680 }
 0xf5c   :  { %v1621_v3 = vsel %vm954_vm3, %v8681_v2, 0.0 }
 0xf5d   :  { %1622 = vadd.xlane.f32.xlu0 %v1621_v3 }
 0xf73   :  { %1627 = vrot.lane.b32.xlu0 %v1564_v48, %s9422_s5 }
 0xfe6   :  { %v1623_v10 = vpop.xlane.xlu0 %1622 }
 0xfe7   :  { %8682 = vrcp.f32 %v1623_v10 }
 0xfe8   :  { %8684 = vpow2.f32 %v7129_v9  ;;  %v8647_v9 = vld [vmem:[%s10536_s19] sm:$0xff]  }
 0xfea   :  { %v1628_v11 = vpop.permute.xlu0 %1627 }
 0xfeb   :  { %v1633_v13 = vsel %vm972_vm4, %v1628_v11, 0  ;;  %v8645_v11 = vld [vmem:[%s10534_s17] sm:$0xff]  }
 0xfec   :  { %8067 = vmatpush3.bf16.msra.mxu1 %v1633_v13 }
 0xfed   :  { %8080 = vmatprep.subr.bf16.mxu1 %v9436_v1 }
 0xff4   :  { %v8683_v14 = vpop.eup %8682 }
 0xff5   :  { %v1625_v15 = vmul.f32 %v8683_v14, %v8681_v2  ;;  %v8644_v2 = vld [vmem:[%s10534_s17 + $0x8] sm:$0xff]   ;;  %v7189_v14 = vld [vmem:[#allocation24 + $0x1] ss:$0 sm:$0xff] }
 0xff7   :  { %v1626_v17 = vpack.c.bf16 %v1625_v15, %v1625_v15 }
 0xff9   :  { %8069 = vmatmul.mubr.msk.bf16.vlgmr.msra.gmra.mxu1 %vm954_vm3, %v1626_v17 }
 0xffa   :  { %8081 = vmatpush3.bf16.msra.mxu1 %v8638_v16  ;;  %8084 = vmatprep.mubr.msk.bf16.mxu1 %vm9437_vm1, %v9436_v1  ;;  %v7190_v16 = vld [vmem:[#allocation25 + $0x1] ss:$0 sm:$0xff] }
 0xffb   :  { %8082 = vmatprep.subr.bf16.mxu1 %v9436_v1 }
 0xffe   :  { %8083 = vmatpush3.bf16.msra.mxu1 %v8639_v18 }
 0xfff   :  { %8100 = vmatprep.subr.bf16.mxu1 %v9436_v1 }
0x1001   :  { %8085 = vmatmul.mubr.msk.bf16.vlgmr.msra.gmra.mxu1 %vm353_vm0, %v1495_v46  ;;  %v8685_v46 = vpop.eup %8684 }
0x1002   :  { %8104 = vmatprep.mubr.msk.bf16.mxu1 %vm9437_vm1, %v9436_v1  ;;  %v1143_v44 = vadd.f32 1.0, %v8685_v46  ;;  %8101 = vmatpush3.bf16.msra.mxu1 %v8646_v33 }
0x1003   :  { %8102 = vmatprep.subr.bf16.mxu1 %v9436_v1 }
0x1006   :  { %8103 = vmatpush3.bf16.msra.mxu1 %v8647_v9 }
0x10b9   :  { %v1669_v20 = vpop.f32.mrf.mxu1 }
0x10ba   :  { %v1680_v21 = vpack.c.bf16 %v1669_v20, %v1669_v20 }
0x10bb   :  { %v8070_v23 = vpop.f32.mrf.mxu1 }
0x10bc   :  { %8077 = vmatmul.mubr.msk.bf16.vlgmr.msra.gmra.mxu0 %vm353_vm0, %v1680_v21 }
0x10bd   :  { %v1672_v24 = vpop.f32.mrf.mxu1  ;;  %8096 = vmatprep.mubr.msk.bf16.mxu0 %vm9437_vm1, %v9436_v1 }
0x10bf   :  { %v8071_v25 = vpop.f32.mrf.mxu1 }
0x10c0   :  { %v7130_v25 = vld [vmem:[#allocation24] ss:$0 sm:$0xff] }
0x10c1   :  { %v1787_v27 = vpop.f32.mrf.mxu1 }
0x10c3   :  { %v8086_v28 = vpop.f32.mrf.mxu1 }
0x10c4   :  { %v7131_v28 = vld [vmem:[#allocation25] ss:$0 sm:$0xff] }
0x10c5   :  { %v1790_v29 = vpop.f32.mrf.mxu1 }
0x10c7   :  { %v8087_v30 = vpop.f32.mrf.mxu1 }
0x117c   :  { %v1735_v35 = vpop.f32.mrf.mxu0 }
0x117d   :  { %v1788_v38 = vadd.f32 %v1787_v27, %v1735_v35  ;;  %v7191_v35 = vld [vmem:[#allocation27] ss:$0 sm:$0xff] }
0x117e   :  { %v8078_v39 = vpop.f32.mrf.mxu0 }
0x117f   :  { %v1801_v40 = vadd.f32 %v7187_v37, %v1788_v38 }
0x1180   :  { %v1738_v41 = vpop.f32.mrf.mxu0 }
0x1181   :  { %v7188_v42 = vmul.f32 -1.442695, %v1801_v40 }
0x1182   :  { %v8079_v43 = vpop.f32.mrf.mxu0 }
0x1183   :  { %8686 = vpow2.f32 %v7188_v42  ;;  %v7197_v43 = vld [vmem:[#allocation4] ss:$0 sm:$0xff] }
0x1184   :  { %8688 = vrcp.f32 %v1143_v44 }
0x1190   :  { %v8687_v45 = vpop.eup %8686 }
0x1191   :  { %v1805_v50 = vadd.f32 1.0, %v8687_v45  ;;  %v8689_v36 = vpop.eup %8688 }
0x1192   :  { %v1146_v52 = vmul.f32 %v8689_v36, %v9775_v26  ;;  %v8642_v26 = vld [vmem:[%s10534_s17 + $0x18] sm:$0xff]  }
0x1193   :  { %8690 = vrcp.f32 %v1805_v50  ;;  %8089 = vmatpush3.bf16.msra.mxu0 %v8642_v26 }
0x1194   :  { %v1147_v53 = vsel %vm353_vm0, %v1146_v52, 0.0  ;;  %8090 = vmatprep.subr.bf16.mxu0 %v9436_v1 }
0x1197   :  { %8091 = vmatpush3.bf16.msra.mxu0 %v8643_v63 }
0x1198   :  { %8092 = vmatprep.subr.bf16.mxu0 %v9436_v1 }
0x119b   :  { %8093 = vmatpush3.bf16.msra.mxu0 %v8644_v2 }
0x119c   :  { %8094 = vmatprep.subr.bf16.mxu0 %v9436_v1 }
0x119f   :  { %8095 = vmatpush3.bf16.msra.mxu0 %v8645_v11 }
0x11a0   :  { %v8691_v0 = vpop.eup %8690 }
0x11a1   :  { %v1808_v51 = vmul.f32 %v8691_v0, %v1669_v20 }
0x11a3   :  { %v1809_v48 = vsel %vm353_vm0, %v1808_v51, 0.0 }
0x11a4   :  { %1810 = vadd.xlane.f32.xlu1 %v1809_v48 }
0x11a8   :  { %1148 = vadd.xlane.f32.xlu1 %v1147_v53 }
0x122d   :  { %v1811_v54 = vpop.xlane.xlu1 %1810 }
0x122e   :  { %v1812_v8 = vmul.f32 0.03125, %v1811_v54 }
0x1230   :  { %v1813_v55 = vsub.f32 %v1808_v51, %v1812_v8 }
0x1231   :  { %v1149_v56 = vpop.xlane.xlu1 %1148 }
0x1232   :  { %v1151_v57 = vmul.f32 0.03125, %v1149_v56  ;;  %v1814_v58 = vmul.f32 %v1813_v55, %v1813_v55 }
0x1234   :  { %v1152_v59 = vsub.f32 %v1146_v52, %v1151_v57  ;;  %v1815_v60 = vsel %vm353_vm0, %v1814_v58, 0.0 }
0x1235   :  { %1816 = vadd.xlane.f32.xlu1 %v1815_v60 }
0x1236   :  { %v1153_v61 = vmul.f32 %v1152_v59, %v1152_v59 }
0x1238   :  { %v1154_v62 = vsel %vm353_vm0, %v1153_v61, 0.0 }
0x1239   :  { %1155 = vadd.xlane.f32.xlu1 %v1154_v62 }
0x12be   :  { %v1817_v3 = vpop.xlane.xlu1 %1816 }
0x12bf   :  { %v1818_v5 = vmul.f32 0.03125, %v1817_v3 }
0x12c1   :  { %v1819_v10 = vadd.f32 1e-05, %v1818_v5 }
0x12c2   :  { %v1156_v19 = vpop.xlane.xlu1 %1155 }
0x12c3   :  { %8692 = vrsqrt.f32 %v1819_v10  ;;  %v1157_v20 = vmul.f32 0.03125, %v1156_v19 }
0x12c5   :  { %v1158_v21 = vadd.f32 1e-05, %v1157_v20 }
0x12c7   :  { %8694 = vrsqrt.f32 %v1158_v21 }
0x12d0   :  { %v8693_v13 = vpop.eup %8692 }
0x12d1   :  { %v1821_v15 = vmul.f32 %v8693_v13, %v1813_v55 }
0x12d3   :  { %v1830_v17 = vmul.f32 %v7189_v14, %v1821_v15 }
0x12d4   :  { %v8695_v23 = vpop.eup %8694 }
0x12d5   :  { %v1839_v18 = vadd.f32 %v7190_v16, %v1830_v17  ;;  %v1160_v24 = vmul.f32 %v8695_v23, %v1152_v59 }
0x12d7   :  { %1841 = vrot.lane.b32.xlu1 %v1839_v18, %s9440_s26  ;;  %v1168_v27 = vmul.f32 %v7130_v25, %v1160_v24 }
0x12d9   :  { %v1176_v29 = vadd.f32 %v7131_v28, %v1168_v27 }
0x1349   :  { %v1842_v30 = vpop.permute.xlu1 %1841 }
0x134a   :  { %v1844_v31 = vsel %vm353_vm0, %v1176_v29, %v1842_v30 }
0x134b   :  { %v1845_v32 = vpack.c.bf16 %v1844_v31, %v1844_v31 }
0x134d   :  { %8097 = vmatmul.mubr.msk.bf16.vlgmr.msra.gmra.mxu0 %vm1885_vm5, %v1845_v32 }
0x140d   :  { %v1923_v37 = vpop.f32.mrf.mxu0 }
0x140e   :  { %v1924_v38 = vadd.f32 %v7191_v35, %v1923_v37 }
0x140f   :  { %v8098_v39 = vpop.f32.mrf.mxu0 }
0x1410   :  { %8696 = vtanh.f32 %v1924_v38 }
0x1411   :  { %v1926_v40 = vpop.f32.mrf.mxu0 }
0x1413   :  { %v8099_v41 = vpop.f32.mrf.mxu0 }
0x141d   :  { %v8697_v42 = vpop.eup %8696 }
0x141e   :  { %2014 = vst.msk [vmem:[%s10538_s21] sm:$0xff] %vm353_vm0, %v8697_v42  ;;  %2015 = vst.msk [vmem:[#allocation2] sm:$0xff] %vm353_vm0, %v8697_v42  ;;  %v1930_v1 = vpack.c.bf16 %v8697_v42, %v8697_v42 }
0x1420   :  { %8105 = vmatmul.mubr.msk.bf16.vlgmr.msra.gmra.mxu1 %vm353_vm0, %v1930_v1 }
0x14e0   :  { %v1991_v46 = vpop.f32.mrf.mxu1 }
0x14e1   :  { %v1992_v44 = vadd.f32 %v7197_v43, %v1991_v46 }
0x14e2   :  { %v8106_v45 = vpop.f32.mrf.mxu1 }
0x14e3   :  { %v7201_v50 = vmul.f32 -1.442695, %v1992_v44 }
0x14e4   :  { %v1994_v36 = vpop.f32.mrf.mxu1 }
0x14e5   :  { %8698 = vpow2.f32 %v7201_v50 }
0x14e6   :  { %v8107_v0 = vpop.f32.mrf.mxu1 }
0x14f2   :  { %v8699_v51 = vpop.eup %8698 }
0x14f3   :  { %v2000_v48 = vadd.f32 1.0, %v8699_v51 }
0x14f5   :  { %8700 = vrcp.f32 %v2000_v48 }
0x1502   :  { %v8701_v52 = vpop.eup %8700 }
0x1503   :  { %v2004_v53 = vsel %vm2003_vm6, %v8701_v52, 0.0 }
0x1504   :  { %2005 = vadd.xlane.f32.xlu0 %v2004_v53 }
0x158d   :  { %v2006_v54 = vpop.xlane.xlu0 %2005 }
0x158e   :  { %v2007_v8 = vrot.slane %v2006_v54, 4 }
0x1590   :  { %v2008_v55 = vadd.f32 %v2007_v8, %v2006_v54 }
0x1592   :  { %v2009_v56 = vrot.slane %v2008_v55, 2 }
0x1594   :  { %v2010_v57 = vadd.f32 %v2009_v56, %v2008_v55 }
0x1596   :  { %v2011_v58 = vrot.slane %v2010_v57, 1 }
0x1598   :  { %v2012_v59 = vadd.f32 %v2011_v58, %v2010_v57 }
0x159a   :  { %8510 = vpush %v2012_v59 }
0x15cb   :  { %s8511_s29 = spop %8510 }
0x15cc   :  { %p2016_p5 = scmp.ge.f32.partialorder %s8511_s29, 4.0 }
0x15ce   :  { %s2017_s28 = scalar_select %p2016_p5, 1, 0 }
0x15d0   :  { %2018 = sst [smem:[#allocation3]] %s2017_s28 }
0x15d1   :  { %s2019_s16 = sld [smem:[#allocation3]] }
0x15d7   :  { %p7202_p6 = scmp.ne.s32.totalorder %s2019_s16, 0 }
0x15d8   :  { %s9444_s14 = smov (!%p7202_p6), 96   ;;  %s9445_s2 = smov (!%p7202_p6), 64  }
0x15d9   :  { %2023 = sbr.rel (%p7202_p6) target bundleno = 10785 (0x2a21), region = 153  ;;  %s9446_s15 = smov (!%p7202_p6), 32  }
0x15de   :  { %v8702_v60 = vld [vmem:[#allocation9 + $0x24] ss:$16 sps:$4 sm:$0xff]   ;;  %v8704_v61 = vld [vmem:[#allocation9 + $0x20] ss:$16 sps:$4 sm:$0xff]   ;;  %v9441_v62 = vmov 0   ;;  %v9442_v32 = vmov 0.0  }
0x15df   :  { %2132 = vmatprep.mubr.bf16.mxu0 %v9441_v62  ;;  %2173 = vmatprep.mubr.bf16.mxu1 %v9441_v62  ;;  %v8705_v26 = vld [vmem:[#allocation9 + $0x4] ss:$16 sps:$4 sm:$0xff]   ;;  %v8707_v2 = vld [vmem:[#allocation9] ss:$16 sps:$4 sm:$0xff]   ;;  %v8724_v29 = vld [vmem:[#allocation9 + $0x2c] ss:$16 sps:$4 sm:$0xff]  }
0x15e0   :  { %2112 = vmatprep.subr.bf16.mxu0 %v8702_v60  ;;  %v2024_v63 = vld [vmem:[#allocation2] sm:$0xff]  ;;  %v8708_v5 = vld [vmem:[#allocation12 + $0x78] sm:$0xff]   ;;  %v8714_v17 = vld [vmem:[#allocation12 + $0x60] sm:$0xff]   ;;  %2153 = vmatprep.subr.bf16.mxu1 %v8724_v29  ;;  %vm9443_vm7 = vmmov 0  }
0x15e1   :  { %2113 = vmatpush1.bf16.msra.mxu0 %v8704_v61  ;;  %v2025_v3 = vadd.f32 %v2024_v63, %v9678_v12  ;;  %v8709_v11 = vld [vmem:[#allocation12 + $0x38] sm:$0xff]   ;;  %v8710_v13 = vld [vmem:[#allocation12 + $0x70] sm:$0xff]   ;;  %v8712_v15 = vld [vmem:[#allocation12 + $0x68] sm:$0xff]  }
0x15e2   :  { %2114 = vmatprep.subr.bf16.mxu0 %v8705_v26  ;;  %v8711_v14 = vld [vmem:[#allocation12 + $0x30] sm:$0xff]   ;;  %v8713_v16 = vld [vmem:[#allocation12 + $0x28] sm:$0xff]   ;;  %v8715_v18 = vld [vmem:[#allocation12 + $0x20] sm:$0xff]  }
0x15e3   :  { %v2026_v10 = vpack.c.bf16 %v2025_v3, %v2025_v3  ;;  %v8716_v19 = vld [vmem:[#allocation12 + $0x58] sm:$0xff]   ;;  %v8718_v21 = vld [vmem:[#allocation12 + $0x50] sm:$0xff]   ;;  %v8720_v24 = vld [vmem:[#allocation12 + $0x48] sm:$0xff]  }
0x15e4   :  { %v8717_v20 = vld [vmem:[#allocation12 + $0x18] sm:$0xff]   ;;  %v8719_v23 = vld [vmem:[#allocation12 + $0x10] sm:$0xff]   ;;  %v8721_v25 = vld [vmem:[#allocation12 + $0x8] sm:$0xff]  }
0x15e5   :  { %2115 = vmatpush1.bf16.msra.mxu0 %v8707_v2  ;;  %v8722_v27 = vld [vmem:[#allocation12 + $0x40] sm:$0xff]   ;;  %v8727_v31 = vld [vmem:[#allocation9 + $0xc] ss:$16 sps:$4 sm:$0xff]   ;;  %v9911_v37 = vld [vmem:[#allocation10] sm:$0xf] }
0x15e6   :  { %7676 = vmatprep.subr.bf16.mxu0 %v8708_v5  ;;  %v8723_v28 = vld [vmem:[#allocation12] sm:$0xff]   ;;  %v2040_v38 = vrot.slane %v9911_v37, %v9696_v47  ;;  %v2044_v39 = vrot.slane %v9911_v37, %v9701_v49  ;;  %v8732_v0 = vld [vmem:[%s10525_s8 + $0x28] sm:$0xff]   ;;  %v8733_v51 = vld [vmem:[%s10525_s8 + $0x20] sm:$0xff]  }
0x15e7   :  { %v8726_v30 = vld [vmem:[#allocation9 + $0x28] ss:$16 sps:$4 sm:$0xff]   ;;  %v7213_v59 = vld [vmem:[#allocation13] ss:$0 sm:$0xff]  ;;  %v7230_v5 = vld [vmem:[#allocation15] ss:$0 sm:$0xff] }
0x15e8   :  { %7211 = vmatmul.mubr.msk.bf16.vlgmr.msra.gmra.mxu0 %vm353_vm0, %v2026_v10  ;;  %2154 = vmatpush1.bf16.msra.mxu1 %v8726_v30  ;;  %v8729_v33 = vld [vmem:[#allocation9 + $0x8] ss:$16 sps:$4 sm:$0xff]  }
0x15e9   :  { %7677 = vmatpush3.bf16.msra.mxu0 %v8709_v11  ;;  %2155 = vmatprep.subr.bf16.mxu1 %v8727_v31  ;;  %v8730_v9 = vld [vmem:[%s10525_s8 + $0x38] sm:$0xff]   ;;  %v8731_v35 = vld [vmem:[%s10525_s8 + $0x30] sm:$0xff]   ;;  %v8736_v53 = vld [vmem:[%s10525_s8 + $0x8] sm:$0xff]  }
0x15ea   :  { %7678 = vmatprep.subr.bf16.mxu0 %v8710_v13  ;;  %v8734_v48 = vld [vmem:[%s10525_s8 + $0x18] sm:$0xff]   ;;  %v8735_v52 = vld [vmem:[%s10525_s8 + $0x10] sm:$0xff]   ;;  %v8737_v54 = vld [vmem:[%s10525_s8] sm:$0xff]  }
0x15ec   :  { %2156 = vmatpush1.bf16.msra.mxu1 %v8729_v33 }
0x15ed   :  { %7679 = vmatpush3.bf16.msra.mxu0 %v8711_v14  ;;  %8108 = vmatprep.subr.bf16.mxu1 %v9442_v32 }
0x15ee   :  { %7680 = vmatprep.subr.bf16.mxu0 %v8712_v15 }
0x15ef   :  { %7212 = vmatmul.mubr.msk.bf16.vlgmr.msra.gmra.mxu1 %vm353_vm0, %v2026_v10 }
0x15f0   :  { %8109 = vmatpush3.bf16.msra.mxu1 %v8730_v9  ;;  %8124 = vmatprep.mubr.msk.bf16.mxu1 %vm9443_vm7, %v9442_v32 }
0x15f1   :  { %7681 = vmatpush3.bf16.msra.mxu0 %v8713_v16  ;;  %8110 = vmatprep.subr.bf16.mxu1 %v9442_v32 }
0x15f2   :  { %7682 = vmatprep.subr.bf16.mxu0 %v8714_v17 }
0x15f4   :  { %8111 = vmatpush3.bf16.msra.mxu1 %v8731_v35  ;;  %v7240_v35 = vld [vmem:[#allocation18] ss:$0 sm:$0xff] }
0x15f5   :  { %7683 = vmatpush3.bf16.msra.mxu0 %v8715_v18  ;;  %8112 = vmatprep.subr.bf16.mxu1 %v9442_v32 }
0x15f6   :  { %7684 = vmatprep.subr.bf16.mxu0 %v8716_v19 }
0x15f8   :  { %8113 = vmatpush3.bf16.msra.mxu1 %v8732_v0 }
0x15f9   :  { %7685 = vmatpush3.bf16.msra.mxu0 %v8717_v20  ;;  %8114 = vmatprep.subr.bf16.mxu1 %v9442_v32 }
0x15fa   :  { %7686 = vmatprep.subr.bf16.mxu0 %v8718_v21 }
0x15fc   :  { %8115 = vmatpush3.bf16.msra.mxu1 %v8733_v51 }
0x15fd   :  { %7687 = vmatpush3.bf16.msra.mxu0 %v8719_v23  ;;  %8116 = vmatprep.subr.bf16.mxu1 %v9442_v32 }
0x15fe   :  { %7688 = vmatprep.subr.bf16.mxu0 %v8720_v24  ;;  %v8738_v24 = vld [vmem:[#allocation16 + $0x8] sm:$0xff]  }
0x1600   :  { %8117 = vmatpush3.bf16.msra.mxu1 %v8734_v48 }
0x1601   :  { %7689 = vmatpush3.bf16.msra.mxu0 %v8721_v25  ;;  %8118 = vmatprep.subr.bf16.mxu1 %v9442_v32 }
0x1602   :  { %7690 = vmatprep.subr.bf16.mxu0 %v8722_v27  ;;  %v8739_v27 = vld [vmem:[#allocation16] sm:$0xff]  }
0x1604   :  { %8119 = vmatpush3.bf16.msra.mxu1 %v8735_v52 }
0x1605   :  { %7691 = vmatpush3.bf16.msra.mxu0 %v8723_v28  ;;  %8120 = vmatprep.subr.bf16.mxu1 %v9442_v32 }
0x1606   :  { %8128 = vmatprep.subr.bf16.mxu0 %v9442_v32 }
0x1608   :  { %8121 = vmatpush3.bf16.msra.mxu1 %v8736_v53 }
0x1609   :  { %8122 = vmatprep.subr.bf16.mxu1 %v9442_v32 }
0x160c   :  { %8123 = vmatpush3.bf16.msra.mxu1 %v8737_v54 }
0x160d   :  { %8136 = vmatprep.subr.bf16.mxu1 %v9442_v32 }
0x16a8   :  { %v2134_v40 = vpop.f32.mrf.mxu0 }
0x16a9   :  { %v2135_v41 = vadd.f32 %v2134_v40, %v2040_v38 }
0x16aa   :  { %v2136_v42 = vpop.f32.mrf.mxu0 }
0x16ab   :  { %v2137_v1 = vadd.f32 %v2136_v42, %v2044_v39  ;;  %8780 = vtanh.f32 %v2135_v41 }
0x16ac   :  { %v2138_v43 = vpop.f32.mrf.mxu0 }
0x16ad   :  { %8782 = vtanh.f32 %v2137_v1 }
0x16ae   :  { %v2139_v46 = vpop.f32.mrf.mxu0 }
0x16af   :  { %v9945_v8 = vpop.f32.mrf.mxu1 }
0x16b1   :  { %v9947_v55 = vpop.f32.mrf.mxu1 }
0x16b3   :  { %v2179_v56 = vpop.f32.mrf.mxu1 }
0x16b5   :  { %v2180_v57 = vpop.f32.mrf.mxu1 }
0x16b8   :  { %v8781_v44 = vpop.eup %8780 }
0x16b9   :  { %v2186_v36 = vpack.c.bf16 %v8781_v44, %v8781_v44 }
0x16ba   :  { %v8783_v45 = vpop.eup %8782 }
0x16bb   :  { %v2187_v50 = vpack.c.bf16 %v8783_v45, %v8783_v45 }
0x16bd   :  { %2355 = vmatprep.mubr.bf16.mxu0 %v2187_v50 }
0x16be   :  { %2356 = vmatmul.mubr.bf16.vlgmr.msra.gmra.mxu0 %v2186_v36 }
0x16bf   :  { %8132 = vmatprep.mubr.msk.bf16.mxu0 %vm9443_vm7, %v9442_v32  ;;  %8129 = vmatpush3.bf16.msra.mxu0 %v8738_v24 }
0x16c0   :  { %8130 = vmatprep.subr.bf16.mxu0 %v9442_v32 }
0x16c3   :  { %8131 = vmatpush3.bf16.msra.mxu0 %v8739_v27  ;;  %v2048_v27 = vrot.slane %v9911_v37, %v9781_v34 }
0x16c4   :  { %8142 = vmatprep.subr.bf16.mxu0 %v9442_v32 }
0x177e   :  { %v7692_v58 = vpop.f32.mrf.mxu0 }
0x1780   :  { %v7693_v60 = vpop.f32.mrf.mxu0 }
0x1781   :  { %v7694_v61 = vadd.f32 %v7693_v60, %v7692_v58  ;;  %v8743_v60 = vld [vmem:[#allocation21] sm:$0xff]  }
0x1782   :  { %v7695_v62 = vpop.f32.mrf.mxu0 }
0x1783   :  { %v2358_v26 = vadd.f32 %v7694_v61, %v7213_v59  ;;  %v8742_v59 = vld [vmem:[#allocation21 + $0x8] sm:$0xff]  }
0x1784   :  { %v7696_v63 = vpop.f32.mrf.mxu0 }
0x1785   :  { %8784 = vtanh.f32 %v2358_v26  ;;  %v8740_v63 = vld [vmem:[#allocation19 + $0x8] sm:$0xff]  }
0x1792   :  { %v8785_v2 = vpop.eup %8784 }
0x1793   :  { %v2364_v3 = vpack.c.bf16 %v8785_v2, %v8785_v2 }
0x1795   :  { %8125 = vmatmul.mubr.bf16.vlgmr.msra.gmra.mxu1 %v2364_v3  ;;  %v8741_v3 = vld [vmem:[#allocation19] sm:$0xff]  }
0x1796   :  { %8138 = vmatprep.mubr.msk.bf16.mxu1 %vm9443_vm7, %v9442_v32 }
0x1855   :  { %v2470_v10 = vpop.f32.mrf.mxu1 }
0x1856   :  { %v2471_v11 = vadd.f32 %v7230_v5, %v2470_v10  ;;  %v8744_v5 = vld [vmem:[#allocation12 + $0xf8] sm:$0xff]   ;;  %v2052_v10 = vrot.slane %v9911_v37, %v9770_v22  ;;  %v8756_v37 = vld [vmem:[#allocation12 + $0xc8] sm:$0xff]  }
0x1857   :  { %v8126_v13 = vpop.f32.mrf.mxu1 }
0x1858   :  { %8786 = vtanh.f32 %v2471_v11  ;;  %v7239_v17 = vmul.f32 -1.442695, %v2471_v11  ;;  %v2483_v30 = vmax.f32 %v2471_v11, 0.0  ;;  %v2178_v11 = vadd.f32 %v9947_v55, %v2052_v10 }
0x1859   :  { %v2473_v14 = vpop.f32.mrf.mxu1 }
0x185a   :  { %8788 = vpow2.f32 %v7239_v17  ;;  %v8746_v17 = vld [vmem:[#allocation12 + $0xf0] sm:$0xff]  }
0x185b   :  { %v8127_v15 = vpop.f32.mrf.mxu1 }
0x185c   :  { %v8745_v15 = vld [vmem:[#allocation12 + $0xb8] sm:$0xff]  }
0x1865   :  { %v8787_v16 = vpop.eup %8786 }
0x1866   :  { %2485 = vrot.lane.b32.xlu0 %v8787_v16, %s9444_s14 }
0x1867   :  { %v8789_v18 = vpop.eup %8788 }
0x1868   :  { %v2479_v19 = vadd.f32 1.0, %v8789_v18 }
0x186a   :  { %8790 = vrcp.f32 %v2479_v19 }
0x1877   :  { %v8791_v20 = vpop.eup %8790 }
0x18d8   :  { %v2486_v21 = vpop.permute.xlu0 %2485 }
0x18d9   :  { %v2488_v23 = vmul.f32 %v8791_v20, %v2486_v21  ;;  %v8747_v21 = vld [vmem:[#allocation12 + $0xb0] sm:$0xff]  }
0x18db   :  { %8792 = vtanh.f32 %v2488_v23  ;;  %v8748_v23 = vld [vmem:[#allocation12 + $0xe8] sm:$0xff]  }
0x18e8   :  { %v8793_v25 = vpop.eup %8792 }
0x18e9   :  { %2491 = vrot.lane.b32.xlu0 %v8793_v25, %s9445_s2  ;;  %v8749_v25 = vld [vmem:[#allocation12 + $0xa8] sm:$0xff]  }
0x195b   :  { %v2492_v28 = vpop.permute.xlu0 %2491 }
0x195c   :  { %v2494_v29 = vmul.f32 %v8791_v20, %v2492_v28  ;;  %v8750_v28 = vld [vmem:[#allocation12 + $0xe0] sm:$0xff]  }
0x195e   :  { %2496 = vrot.lane.b32.xlu1 %v2494_v29, %s9446_s15 }
0x19d0   :  { %v2497_v31 = vpop.permute.xlu1 %2496 }
0x19d1   :  { %v2499_v33 = vadd.f32 %v2497_v31, %v2483_v30  ;;  %v8751_v31 = vld [vmem:[#allocation12 + $0xa0] sm:$0xff]  }
0x19d3   :  { %v2500_v9 = vpack.c.bf16 %v2499_v33, %v2499_v33  ;;  %v2176_v33 = vadd.f32 %v9945_v8, %v2048_v27  ;;  %v8769_v27 = vld [vmem:[#allocation16 + $0x10] sm:$0xff]  }
0x19d5   :  { %8133 = vmatmul.mubr.msk.bf16.vlgmr.msra.gmra.mxu0 %vm353_vm0, %v2500_v9 }
0x19d6   :  { %8144 = vmatprep.mubr.msk.bf16.mxu0 %vm9443_vm7, %v9442_v32 }
0x1a95   :  { %v2561_v38 = vpop.f32.mrf.mxu0 }
0x1a96   :  { %v2562_v39 = vadd.f32 %v7240_v35, %v2561_v38  ;;  %v8753_v38 = vld [vmem:[#allocation12 + $0x98] sm:$0xff]  }
0x1a97   :  { %v8134_v40 = vpop.f32.mrf.mxu0 }
0x1a98   :  { %v2567_v41 = vpack.c.bf16 %v2562_v39, %v2562_v39  ;;  %v8754_v39 = vld [vmem:[#allocation12 + $0xd0] sm:$0xff]  }
0x1a99   :  { %v2564_v42 = vpop.f32.mrf.mxu0  ;;  %v8755_v40 = vld [vmem:[#allocation12 + $0x90] sm:$0xff]  }
0x1a9a   :  { %2569 = vrot.lane.b32.xlu1 %v2567_v41, %s9444_s14  ;;  %v8758_v42 = vld [vmem:[#allocation12 + $0xc0] sm:$0xff]  }
0x1a9b   :  { %v8135_v1 = vpop.f32.mrf.mxu0 }
0x1a9c   :  { %v8759_v1 = vld [vmem:[#allocation12 + $0x80] sm:$0xff]  }
0x1b0c   :  { %v2570_v43 = vpop.permute.xlu1 %2569 }
0x1b0d   :  { %v2575_v46 = vsel %vm353_vm0, %v2570_v43, 0 }
0x1b0e   :  { %8137 = vmatpush3.bf16.xpose.msra.mxu1 %v2575_v46  ;;  %v8760_v46 = vld [vmem:[%s10525_s8 + $0x78] sm:$0xff]  }
0x1b0f   :  { %8148 = vmatprep.subr.bf16.mxu1 %v9442_v32 }
0x1b15   :  { %8139 = vmatmul.mubr.msk.bf16.vlgmr.msra.gmra.mxu1 %vm353_vm0, %v2567_v41 }
0x1b16   :  { %8152 = vmatprep.mubr.msk.bf16.mxu1 %vm9443_vm7, %v9442_v32  ;;  %8149 = vmatpush3.bf16.msra.mxu1 %v8742_v59 }
0x1b17   :  { %8150 = vmatprep.subr.bf16.mxu1 %v9442_v32 }
0x1b1a   :  { %8151 = vmatpush3.bf16.msra.mxu1 %v8743_v60 }
0x1b1b   :  { %7720 = vmatprep.subr.bf16.mxu1 %v8744_v5 }
0x1bd5   :  { %v2611_v44 = vpop.f32.mrf.mxu1 }
0x1bd6   :  { %v2617_v45 = vmul.f32 0.17677669, %v2611_v44  ;;  %v8761_v44 = vld [vmem:[%s10525_s8 + $0x70] sm:$0xff]  }
0x1bd7   :  { %v8140_v50 = vpop.f32.mrf.mxu1 }
0x1bd8   :  { %v2619_v36 = vsel %vm954_vm3, %v2617_v45, -inf  ;;  %v8763_v50 = vld [vmem:[%s10525_s8 + $0x60] sm:$0xff]  }
0x1bd9   :  { %2620 = vmax.xlane.f32.xlu0 %v2619_v36  ;;  %v2614_v0 = vpop.f32.mrf.mxu1  ;;  %v8764_v36 = vld [vmem:[%s10525_s8 + $0x58] sm:$0xff]  }
0x1bda   :  { %v8765_v0 = vld [vmem:[%s10525_s8 + $0x50] sm:$0xff]  }
0x1bdb   :  { %v8141_v51 = vpop.f32.mrf.mxu1 }
0x1bdc   :  { %v8766_v51 = vld [vmem:[%s10525_s8 + $0x48] sm:$0xff]  }
0x1bef   :  { %2631 = vrot.lane.b32.xlu0 %v2567_v41, %s9445_s2  ;;  %v8757_v41 = vld [vmem:[#allocation12 + $0x88] sm:$0xff]  }
0x1c62   :  { %v2621_v48 = vpop.xlane.xlu0 %2620 }
0x1c63   :  { %v2622_v52 = vsub.f32 %v2617_v45, %v2621_v48  ;;  %v8762_v45 = vld [vmem:[%s10525_s8 + $0x68] sm:$0xff]   ;;  %v8767_v48 = vld [vmem:[%s10525_s8 + $0x40] sm:$0xff]  }
0x1c65   :  { %v2623_v53 = vmul.f32 1.442695, %v2622_v52 }
0x1c66   :  { %v2632_v54 = vpop.permute.xlu0 %2631 }
0x1c67   :  { %8794 = vpow2.f32 %v2623_v53  ;;  %v2638_v56 = vsel %vm972_vm4, %v2632_v54, 0 }
0x1c68   :  { %8143 = vmatpush3.bf16.msra.mxu0 %v2638_v56 }
0x1c69   :  { %8156 = vmatprep.subr.bf16.mxu0 %v9442_v32 }
0x1c74   :  { %v8795_v57 = vpop.eup %8794 }
0x1c75   :  { %v2625_v58 = vsel %vm954_vm3, %v8795_v57, 0.0 }
0x1c76   :  { %2626 = vadd.xlane.f32.xlu1 %v2625_v58  ;;  %v7256_v58 = vld [vmem:[#allocation13 + $0x1] ss:$0 sm:$0xff] }
0x1cff   :  { %v2627_v61 = vpop.xlane.xlu1 %2626 }
0x1d00   :  { %8796 = vrcp.f32 %v2627_v61 }
0x1d01   :  { %8798 = vtanh.f32 %v2178_v11 }
0x1d02   :  { %8800 = vtanh.f32 %v2176_v33 }
0x1d0d   :  { %v8797_v62 = vpop.eup %8796 }
0x1d0e   :  { %v2629_v26 = vmul.f32 %v8797_v62, %v8795_v57  ;;  %v8799_v13 = vpop.eup %8798 }
0x1d0f   :  { %v2842_v19 = vpack.c.bf16 %v8799_v13, %v8799_v13  ;;  %v8801_v8 = vpop.eup %8800 }
0x1d10   :  { %v2630_v2 = vpack.c.bf16 %v2629_v26, %v2629_v26  ;;  %v2841_v43 = vpack.c.bf16 %v8801_v8, %v8801_v8 }
0x1d12   :  { %8145 = vmatmul.mubr.msk.bf16.vlgmr.msra.gmra.mxu0 %vm954_vm3, %v2630_v2 }
0x1d13   :  { %8157 = vmatpush3.bf16.msra.mxu0 %v8740_v63  ;;  %8160 = vmatprep.mubr.msk.bf16.mxu0 %vm9443_vm7, %v9442_v32 }
0x1d14   :  { %8158 = vmatprep.subr.bf16.mxu0 %v9442_v32 }
0x1d17   :  { %8159 = vmatpush3.bf16.msra.mxu0 %v8741_v3  ;;  %v7289_v3 = vld [vmem:[#allocation15 + $0x1] ss:$0 sm:$0xff] }
0x1d18   :  { %8164 = vmatprep.subr.bf16.mxu0 %v9442_v32 }
0x1d1a   :  { %8161 = vmatmul.mubr.msk.bf16.vlgmr.msra.gmra.mxu0 %vm353_vm0, %v2500_v9  ;;  %v8752_v9 = vld [vmem:[#allocation12 + $0xd8] sm:$0xff]  }
0x1d1b   :  { %8180 = vmatprep.mubr.msk.bf16.mxu0 %vm9443_vm7, %v9442_v32  ;;  %8165 = vmatpush3.bf16.msra.mxu0 %v8760_v46 }
0x1d1c   :  { %8166 = vmatprep.subr.bf16.mxu0 %v9442_v32 }
0x1d1f   :  { %8167 = vmatpush3.bf16.msra.mxu0 %v8761_v44 }
0x1d20   :  { %8168 = vmatprep.subr.bf16.mxu0 %v9442_v32 }
0x1d23   :  { %8169 = vmatpush3.bf16.msra.mxu0 %v8762_v45 }
0x1d24   :  { %8170 = vmatprep.subr.bf16.mxu0 %v9442_v32 }
0x1d27   :  { %8171 = vmatpush3.bf16.msra.mxu0 %v8763_v50 }
0x1d28   :  { %8172 = vmatprep.subr.bf16.mxu0 %v9442_v32 }
0x1d2b   :  { %8173 = vmatpush3.bf16.msra.mxu0 %v8764_v36 }
0x1d2c   :  { %8174 = vmatprep.subr.bf16.mxu0 %v9442_v32 }
0x1d2f   :  { %8175 = vmatpush3.bf16.msra.mxu0 %v8765_v0 }
0x1d30   :  { %8176 = vmatprep.subr.bf16.mxu0 %v9442_v32 }
0x1d33   :  { %8177 = vmatpush3.bf16.msra.mxu0 %v8766_v51 }
0x1d34   :  { %8178 = vmatprep.subr.bf16.mxu0 %v9442_v32 }
0x1d37   :  { %8179 = vmatpush3.bf16.msra.mxu0 %v8767_v48 }
0x1d38   :  { %8192 = vmatprep.subr.bf16.mxu0 %v9442_v32 }
0x1dd2   :  { %v9982_v14 = vpop.f32.mrf.mxu0 }
0x1dd3   :  { %v2684_v16 = vpack.c.bf16 %v9982_v14, %v9982_v14 }
0x1dd4   :  { %v8146_v18 = vpop.f32.mrf.mxu0 }
0x1dd5   :  { %8153 = vmatmul.mubr.msk.bf16.vlgmr.msra.gmra.mxu1 %vm353_vm0, %v2684_v16 }
0x1dd6   :  { %7721 = vmatpush3.bf16.msra.mxu1 %v8745_v15  ;;  %v2677_v20 = vpop.f32.mrf.mxu0  ;;  %3012 = vmatprep.mubr.bf16.mxu1 %v2842_v19 }
0x1dd7   :  { %7722 = vmatprep.subr.bf16.mxu1 %v8746_v17 }
0x1dd8   :  { %v8147_v55 = vpop.f32.mrf.mxu0 }
0x1dd9   :  { %v8768_v55 = vld [vmem:[#allocation16 + $0x18] sm:$0xff]  }
0x1dda   :  { %7723 = vmatpush3.bf16.msra.mxu1 %v8747_v21  ;;  %v9987_v24 = vpop.f32.mrf.mxu0 }
0x1ddb   :  { %7724 = vmatprep.subr.bf16.mxu1 %v8748_v23 }
0x1ddc   :  { %v8162_v29 = vpop.f32.mrf.mxu0 }
0x1dde   :  { %7725 = vmatpush3.bf16.msra.mxu1 %v8749_v25  ;;  %v2793_v30 = vpop.f32.mrf.mxu0 }
0x1ddf   :  { %7726 = vmatprep.subr.bf16.mxu1 %v8750_v28 }
0x1de0   :  { %v8163_v35 = vpop.f32.mrf.mxu0 }
0x1de1   :  { %v7299_v35 = vld [vmem:[#allocation18 + $0x1] ss:$0 sm:$0xff] }
0x1de2   :  { %7727 = vmatpush3.bf16.msra.mxu1 %v8751_v31 }
0x1de3   :  { %7728 = vmatprep.subr.bf16.mxu1 %v8752_v9 }
0x1de6   :  { %7729 = vmatpush3.bf16.msra.mxu1 %v8753_v38 }
0x1de7   :  { %7730 = vmatprep.subr.bf16.mxu1 %v8754_v39 }
0x1dea   :  { %7731 = vmatpush3.bf16.msra.mxu1 %v8755_v40 }
0x1deb   :  { %7732 = vmatprep.subr.bf16.mxu1 %v8756_v37 }
0x1dee   :  { %7733 = vmatpush3.bf16.msra.mxu1 %v8757_v41 }
0x1def   :  { %7734 = vmatprep.subr.bf16.mxu1 %v8758_v42 }
0x1df2   :  { %7735 = vmatpush3.bf16.msra.mxu1 %v8759_v1 }
0x1df3   :  { %8184 = vmatprep.subr.bf16.mxu1 %v9442_v32 }
0x1df5   :  { %3013 = vmatmul.mubr.bf16.vlgmr.msra.gmra.mxu1 %v2841_v43 }
0x1df6   :  { %8188 = vmatprep.mubr.msk.bf16.mxu1 %vm9443_vm7, %v9442_v32  ;;  %8185 = vmatpush3.bf16.msra.mxu1 %v8768_v55 }
0x1df7   :  { %8186 = vmatprep.subr.bf16.mxu1 %v9442_v32 }
0x1dfa   :  { %8187 = vmatpush3.bf16.msra.mxu1 %v8769_v27 }
0x1dfb   :  { %8198 = vmatprep.subr.bf16.mxu1 %v9442_v32 }
0x1e95   :  { %v10027_v52 = vpop.f32.mrf.mxu1 }
0x1e97   :  { %v8154_v53 = vpop.f32.mrf.mxu1 }
0x1e99   :  { %v2741_v54 = vpop.f32.mrf.mxu1 }
0x1e9b   :  { %v8155_v56 = vpop.f32.mrf.mxu1 }
0x1e9c   :  { %v8772_v56 = vld [vmem:[#allocation21 + $0x18] sm:$0xff]  }
0x1eb5   :  { %v7736_v57 = vpop.f32.mrf.mxu1 }
0x1eb7   :  { %v7737_v59 = vpop.f32.mrf.mxu1 }
0x1eb8   :  { %v7738_v60 = vadd.f32 %v7737_v59, %v7736_v57 }
0x1eb9   :  { %v7739_v61 = vpop.f32.mrf.mxu1 }
0x1eba   :  { %v3015_v62 = vadd.f32 %v7738_v60, %v7256_v58 }
0x1ebb   :  { %v7740_v26 = vpop.f32.mrf.mxu1 }
0x1ebc   :  { %8802 = vtanh.f32 %v3015_v62  ;;  %v8770_v62 = vld [vmem:[#allocation19 + $0x18] sm:$0xff]  }
0x1ec9   :  { %v8803_v63 = vpop.eup %8802 }
0x1eca   :  { %v3021_v2 = vpack.c.bf16 %v8803_v63, %v8803_v63  ;;  %v8771_v63 = vld [vmem:[#allocation19 + $0x10] sm:$0xff]  }
0x1ecc   :  { %8181 = vmatmul.mubr.bf16.vlgmr.msra.gmra.mxu0 %v3021_v2  ;;  %v8773_v2 = vld [vmem:[#allocation21 + $0x10] sm:$0xff]  }
0x1ecd   :  { %8194 = vmatprep.mubr.msk.bf16.mxu0 %vm9443_vm7, %v9442_v32 }
0x1f8c   :  { %v3129_v5 = vpop.f32.mrf.mxu0 }
0x1f8d   :  { %v3130_v10 = vadd.f32 %v7289_v3, %v3129_v5 }
0x1f8e   :  { %v8182_v11 = vpop.f32.mrf.mxu0 }
0x1f8f   :  { %8804 = vtanh.f32 %v3130_v10  ;;  %v7298_v17 = vmul.f32 -1.442695, %v3130_v10  ;;  %v3142_v30 = vmax.f32 %v3130_v10, 0.0 }
0x1f90   :  { %v3132_v13 = vpop.f32.mrf.mxu0 }
0x1f91   :  { %8806 = vpow2.f32 %v7298_v17 }
0x1f92   :  { %v8183_v15 = vpop.f32.mrf.mxu0 }
0x1f9c   :  { %v8805_v16 = vpop.eup %8804 }
0x1f9d   :  { %3144 = vrot.lane.b32.xlu1 %v8805_v16, %s9444_s14 }
0x1f9e   :  { %v8807_v18 = vpop.eup %8806 }
0x1f9f   :  { %v3138_v19 = vadd.f32 1.0, %v8807_v18 }
0x1fa1   :  { %8808 = vrcp.f32 %v3138_v19  ;;  %v2791_v19 = vadd.f32 %v9987_v24, %v10027_v52 }
0x1fae   :  { %v8809_v20 = vpop.eup %8808 }
0x200f   :  { %v3145_v21 = vpop.permute.xlu1 %3144 }
0x2010   :  { %v3147_v23 = vmul.f32 %v8809_v20, %v3145_v21 }
0x2012   :  { %8810 = vtanh.f32 %v3147_v23 }
0x201f   :  { %v8811_v25 = vpop.eup %8810 }
0x2020   :  { %3150 = vrot.lane.b32.xlu0 %v8811_v25, %s9445_s2  ;;  %v7311_v25 = vld [vmem:[#allocation22 + $0x1] ss:$0 sm:$0xff] }
0x2092   :  { %v3151_v28 = vpop.permute.xlu0 %3150 }
0x2093   :  { %v3153_v29 = vmul.f32 %v8809_v20, %v3151_v28  ;;  %v7252_v20 = vld [vmem:[#allocation22] ss:$0 sm:$0xff] }
0x2094   :  { %v2803_v21 = vadd.f32 %v7252_v20, %v2791_v19 }
0x2095   :  { %3155 = vrot.lane.b32.xlu1 %v3153_v29, %s9446_s15 }
0x2096   :  { %v7253_v23 = vmul.f32 -1.442695, %v2803_v21  ;;  %v8778_v21 = vld [vmem:[%s10536_s19 + $0x8] sm:$0xff]  }
0x2107   :  { %v3156_v31 = vpop.permute.xlu1 %3155 }
0x2108   :  { %v3158_v33 = vadd.f32 %v3156_v31, %v3142_v30 }
0x210a   :  { %v3159_v9 = vpack.c.bf16 %v3158_v33, %v3158_v33 }
0x210c   :  { %8189 = vmatmul.mubr.msk.bf16.vlgmr.msra.gmra.mxu1 %vm353_vm0, %v3159_v9 }
0x210d   :  { %8200 = vmatprep.mubr.msk.bf16.mxu1 %vm9443_vm7, %v9442_v32 }
0x21cc   :  { %v3222_v38 = vpop.f32.mrf.mxu1 }
0x21cd   :  { %v3223_v39 = vadd.f32 %v7299_v35, %v3222_v38 }
0x21ce   :  { %v8190_v40 = vpop.f32.mrf.mxu1 }
0x21cf   :  { %v3228_v37 = vpack.c.bf16 %v3223_v39, %v3223_v39 }
0x21d0   :  { %v3225_v41 = vpop.f32.mrf.mxu1 }
0x21d1   :  { %3230 = vrot.lane.b32.xlu0 %v3228_v37, %s9444_s14 }
0x21d2   :  { %v8191_v42 = vpop.f32.mrf.mxu1 }
0x2243   :  { %v3231_v1 = vpop.permute.xlu0 %3230 }
0x2244   :  { %v3236_v8 = vsel %vm353_vm0, %v3231_v1, 0 }
0x2245   :  { %8193 = vmatpush3.bf16.xpose.msra.mxu0 %v3236_v8 }
0x2246   :  { %8204 = vmatprep.subr.bf16.mxu0 %v9442_v32 }
0x224c   :  { %8195 = vmatmul.mubr.msk.bf16.vlgmr.msra.gmra.mxu0 %vm353_vm0, %v3228_v37 }
0x224d   :  { %8208 = vmatprep.mubr.msk.bf16.mxu0 %vm9443_vm7, %v9442_v32  ;;  %8205 = vmatpush3.bf16.msra.mxu0 %v8772_v56 }
0x224e   :  { %8206 = vmatprep.subr.bf16.mxu0 %v9442_v32 }
0x2251   :  { %8207 = vmatpush3.bf16.msra.mxu0 %v8773_v2 }
0x2252   :  { %8220 = vmatprep.subr.bf16.mxu0 %v9442_v32 }
0x230c   :  { %v3272_v43 = vpop.f32.mrf.mxu0 }
0x230d   :  { %v3278_v46 = vmul.f32 0.17677669, %v3272_v43 }
0x230e   :  { %v8196_v44 = vpop.f32.mrf.mxu0 }
0x230f   :  { %v3279_v45 = vsel %vm954_vm3, %v3278_v46, -inf }
0x2310   :  { %3280 = vmax.xlane.f32.xlu1 %v3279_v45  ;;  %v3275_v50 = vpop.f32.mrf.mxu0 }
0x2312   :  { %v8197_v36 = vpop.f32.mrf.mxu0 }
0x2399   :  { %v3281_v0 = vpop.xlane.xlu1 %3280 }
0x239a   :  { %v3282_v51 = vsub.f32 %v3278_v46, %v3281_v0 }
0x239c   :  { %v3283_v48 = vmul.f32 1.442695, %v3282_v51 }
0x239e   :  { %8812 = vpow2.f32 %v3283_v48  ;;  %v8775_v48 = vld [vmem:[%s10534_s17 + $0x10] sm:$0xff]  }
0x23ab   :  { %v8813_v53 = vpop.eup %8812 }
0x23ac   :  { %v3285_v54 = vsel %vm954_vm3, %v8813_v53, 0.0 }
0x23ad   :  { %3286 = vadd.xlane.f32.xlu0 %v3285_v54 }
0x23c3   :  { %3291 = vrot.lane.b32.xlu0 %v3228_v37, %s9445_s2 }
0x2436   :  { %v3287_v57 = vpop.xlane.xlu0 %3286 }
0x2437   :  { %8814 = vrcp.f32 %v3287_v57 }
0x2438   :  { %8816 = vpow2.f32 %v7253_v23  ;;  %v8779_v23 = vld [vmem:[%s10536_s19] sm:$0xff]  }
0x243a   :  { %v3292_v58 = vpop.permute.xlu0 %3291 }
0x243b   :  { %v3297_v59 = vsel %vm972_vm4, %v3292_v58, 0  ;;  %v8777_v58 = vld [vmem:[%s10534_s17] sm:$0xff]  }
0x243c   :  { %8199 = vmatpush3.bf16.msra.mxu1 %v3297_v59 }
0x243d   :  { %8212 = vmatprep.subr.bf16.mxu1 %v9442_v32 }
0x2444   :  { %v8815_v60 = vpop.eup %8814 }
0x2445   :  { %v3289_v61 = vmul.f32 %v8815_v60, %v8813_v53  ;;  %v8776_v53 = vld [vmem:[%s10534_s17 + $0x8] sm:$0xff]   ;;  %v7313_v60 = vld [vmem:[#allocation24 + $0x1] ss:$0 sm:$0xff] }
0x2447   :  { %v3290_v26 = vpack.c.bf16 %v3289_v61, %v3289_v61 }
0x2449   :  { %8201 = vmatmul.mubr.msk.bf16.vlgmr.msra.gmra.mxu1 %vm954_vm3, %v3290_v26 }
0x244a   :  { %8213 = vmatpush3.bf16.msra.mxu1 %v8770_v62  ;;  %8216 = vmatprep.mubr.msk.bf16.mxu1 %vm9443_vm7, %v9442_v32  ;;  %v7314_v62 = vld [vmem:[#allocation25 + $0x1] ss:$0 sm:$0xff] }
0x244b   :  { %8214 = vmatprep.subr.bf16.mxu1 %v9442_v32 }
0x244e   :  { %8215 = vmatpush3.bf16.msra.mxu1 %v8771_v63 }
0x244f   :  { %8232 = vmatprep.subr.bf16.mxu1 %v9442_v32 }
0x2451   :  { %8217 = vmatmul.mubr.msk.bf16.vlgmr.msra.gmra.mxu1 %vm353_vm0, %v3159_v9  ;;  %v8817_v9 = vpop.eup %8816 }
0x2452   :  { %8236 = vmatprep.mubr.msk.bf16.mxu1 %vm9443_vm7, %v9442_v32  ;;  %v2807_v35 = vadd.f32 1.0, %v8817_v9  ;;  %8233 = vmatpush3.bf16.msra.mxu1 %v8778_v21 }
0x2453   :  { %8234 = vmatprep.subr.bf16.mxu1 %v9442_v32 }
0x2456   :  { %8235 = vmatpush3.bf16.msra.mxu1 %v8779_v23 }
0x2509   :  { %v3333_v3 = vpop.f32.mrf.mxu1 }
0x250a   :  { %v3344_v5 = vpack.c.bf16 %v3333_v3, %v3333_v3 }
0x250b   :  { %v8202_v10 = vpop.f32.mrf.mxu1 }
0x250c   :  { %8209 = vmatmul.mubr.msk.bf16.vlgmr.msra.gmra.mxu0 %vm353_vm0, %v3344_v5 }
0x250d   :  { %v3336_v11 = vpop.f32.mrf.mxu1  ;;  %8228 = vmatprep.mubr.msk.bf16.mxu0 %vm9443_vm7, %v9442_v32 }
0x250f   :  { %v8203_v13 = vpop.f32.mrf.mxu1 }
0x2510   :  { %v7254_v13 = vld [vmem:[#allocation24] ss:$0 sm:$0xff] }
0x2511   :  { %v3451_v15 = vpop.f32.mrf.mxu1 }
0x2513   :  { %v8218_v16 = vpop.f32.mrf.mxu1 }
0x2514   :  { %v7255_v16 = vld [vmem:[#allocation25] ss:$0 sm:$0xff] }
0x2515   :  { %v3454_v17 = vpop.f32.mrf.mxu1 }
0x2517   :  { %v8219_v18 = vpop.f32.mrf.mxu1 }
0x25cc   :  { %v3399_v55 = vpop.f32.mrf.mxu0 }
0x25cd   :  { %v3452_v27 = vadd.f32 %v3451_v15, %v3399_v55  ;;  %v7315_v55 = vld [vmem:[#allocation27] ss:$0 sm:$0xff] }
0x25ce   :  { %v8210_v28 = vpop.f32.mrf.mxu0 }
0x25cf   :  { %v3465_v29 = vadd.f32 %v7311_v25, %v3452_v27 }
0x25d0   :  { %v3402_v30 = vpop.f32.mrf.mxu0 }
0x25d1   :  { %v7312_v31 = vmul.f32 -1.442695, %v3465_v29 }
0x25d2   :  { %v8211_v33 = vpop.f32.mrf.mxu0 }
0x25d3   :  { %8818 = vpow2.f32 %v7312_v31  ;;  %v7321_v33 = vld [vmem:[#allocation4] ss:$0 sm:$0xff] }
0x25d4   :  { %8820 = vrcp.f32 %v2807_v35 }
0x25e0   :  { %v8819_v38 = vpop.eup %8818 }
0x25e1   :  { %v3469_v39 = vadd.f32 1.0, %v8819_v38  ;;  %v8821_v24 = vpop.eup %8820 }
0x25e2   :  { %v2810_v41 = vmul.f32 %v8821_v24, %v9982_v14  ;;  %v8774_v14 = vld [vmem:[%s10534_s17 + $0x18] sm:$0xff]  }
0x25e3   :  { %8822 = vrcp.f32 %v3469_v39  ;;  %8221 = vmatpush3.bf16.msra.mxu0 %v8774_v14 }
0x25e4   :  { %v2811_v42 = vsel %vm353_vm0, %v2810_v41, 0.0  ;;  %8222 = vmatprep.subr.bf16.mxu0 %v9442_v32 }
0x25e7   :  { %8223 = vmatpush3.bf16.msra.mxu0 %v8775_v48 }
0x25e8   :  { %8224 = vmatprep.subr.bf16.mxu0 %v9442_v32 }
0x25eb   :  { %8225 = vmatpush3.bf16.msra.mxu0 %v8776_v53 }
0x25ec   :  { %8226 = vmatprep.subr.bf16.mxu0 %v9442_v32 }
0x25ef   :  { %8227 = vmatpush3.bf16.msra.mxu0 %v8777_v58 }
0x25f0   :  { %v8823_v52 = vpop.eup %8822 }
0x25f1   :  { %v3472_v40 = vmul.f32 %v8823_v52, %v3333_v3 }
0x25f3   :  { %v3473_v37 = vsel %vm353_vm0, %v3472_v40, 0.0 }
0x25f4   :  { %3474 = vadd.xlane.f32.xlu1 %v3473_v37 }
0x25f8   :  { %2812 = vadd.xlane.f32.xlu1 %v2811_v42 }
0x267d   :  { %v3475_v1 = vpop.xlane.xlu1 %3474 }
0x267e   :  { %v3476_v8 = vmul.f32 0.03125, %v3475_v1 }
0x2680   :  { %v3477_v43 = vsub.f32 %v3472_v40, %v3476_v8 }
0x2681   :  { %v2813_v46 = vpop.xlane.xlu1 %2812 }
0x2682   :  { %v2815_v44 = vmul.f32 0.03125, %v2813_v46  ;;  %v3478_v45 = vmul.f32 %v3477_v43, %v3477_v43 }
0x2684   :  { %v2816_v50 = vsub.f32 %v2810_v41, %v2815_v44  ;;  %v3479_v36 = vsel %vm353_vm0, %v3478_v45, 0.0 }
0x2685   :  { %3480 = vadd.xlane.f32.xlu1 %v3479_v36 }
0x2686   :  { %v2817_v0 = vmul.f32 %v2816_v50, %v2816_v50 }
0x2688   :  { %v2818_v51 = vsel %vm353_vm0, %v2817_v0, 0.0 }
0x2689   :  { %2819 = vadd.xlane.f32.xlu1 %v2818_v51 }
0x270e   :  { %v3481_v54 = vpop.xlane.xlu1 %3480 }
0x270f   :  { %v3482_v56 = vmul.f32 0.03125, %v3481_v54 }
0x2711   :  { %v3483_v57 = vadd.f32 1e-05, %v3482_v56 }
0x2712   :  { %v2820_v2 = vpop.xlane.xlu1 %2819 }
0x2713   :  { %8824 = vrsqrt.f32 %v3483_v57  ;;  %v2821_v3 = vmul.f32 0.03125, %v2820_v2 }
0x2715   :  { %v2822_v5 = vadd.f32 1e-05, %v2821_v3 }
0x2717   :  { %8826 = vrsqrt.f32 %v2822_v5 }
0x2720   :  { %v8825_v59 = vpop.eup %8824 }
0x2721   :  { %v3485_v61 = vmul.f32 %v8825_v59, %v3477_v43 }
0x2723   :  { %v3494_v26 = vmul.f32 %v7313_v60, %v3485_v61 }
0x2724   :  { %v8827_v10 = vpop.eup %8826 }
0x2725   :  { %v3503_v63 = vadd.f32 %v7314_v62, %v3494_v26  ;;  %v2824_v11 = vmul.f32 %v8827_v10, %v2816_v50 }
0x2727   :  { %3505 = vrot.lane.b32.xlu1 %v3503_v63, %s9446_s15  ;;  %v2832_v15 = vmul.f32 %v7254_v13, %v2824_v11 }
0x2729   :  { %v2840_v17 = vadd.f32 %v7255_v16, %v2832_v15 }
0x2799   :  { %v3506_v18 = vpop.permute.xlu1 %3505 }
0x279a   :  { %v3508_v19 = vsel %vm353_vm0, %v2840_v17, %v3506_v18 }
0x279b   :  { %v3509_v20 = vpack.c.bf16 %v3508_v19, %v3508_v19 }
0x279d   :  { %8229 = vmatmul.mubr.msk.bf16.vlgmr.msra.gmra.mxu0 %vm1885_vm5, %v3509_v20 }
0x285d   :  { %v3587_v25 = vpop.f32.mrf.mxu0 }
0x285e   :  { %v3588_v27 = vadd.f32 %v7315_v55, %v3587_v25 }
0x285f   :  { %v8230_v28 = vpop.f32.mrf.mxu0 }
0x2860   :  { %8828 = vtanh.f32 %v3588_v27 }
0x2861   :  { %v3590_v29 = vpop.f32.mrf.mxu0 }
0x2863   :  { %v8231_v30 = vpop.f32.mrf.mxu0 }
0x286d   :  { %v8829_v31 = vpop.eup %8828 }
0x286e   :  { %3678 = vst.msk [vmem:[%s10538_s21] sm:$0xff] %vm353_vm0, %v8829_v31  ;;  %3679 = vst.msk [vmem:[#allocation2] sm:$0xff] %vm353_vm0, %v8829_v31  ;;  %v3594_v32 = vpack.c.bf16 %v8829_v31, %v8829_v31 }
0x2870   :  { %8237 = vmatmul.mubr.msk.bf16.vlgmr.msra.gmra.mxu1 %vm353_vm0, %v3594_v32 }
0x2930   :  { %v3655_v9 = vpop.f32.mrf.mxu1 }
0x2931   :  { %v3656_v35 = vadd.f32 %v7321_v33, %v3655_v9 }
0x2932   :  { %v8238_v38 = vpop.f32.mrf.mxu1 }
0x2933   :  { %v7325_v39 = vmul.f32 -1.442695, %v3656_v35 }
0x2934   :  { %v3658_v24 = vpop.f32.mrf.mxu1 }
0x2935   :  { %8830 = vpow2.f32 %v7325_v39 }
0x2936   :  { %v8239_v52 = vpop.f32.mrf.mxu1 }
0x2942   :  { %v8831_v40 = vpop.eup %8830 }
0x2943   :  { %v3664_v37 = vadd.f32 1.0, %v8831_v40 }
0x2945   :  { %8832 = vrcp.f32 %v3664_v37 }
0x2952   :  { %v8833_v41 = vpop.eup %8832 }
0x2953   :  { %v3668_v42 = vsel %vm2003_vm6, %v8833_v41, 0.0 }
0x2954   :  { %3669 = vadd.xlane.f32.xlu0 %v3668_v42 }
0x29dd   :  { %v3670_v1 = vpop.xlane.xlu0 %3669 }
0x29de   :  { %v3671_v8 = vrot.slane %v3670_v1, 4 }
0x29e0   :  { %v3672_v43 = vadd.f32 %v3671_v8, %v3670_v1 }
0x29e2   :  { %v3673_v46 = vrot.slane %v3672_v43, 2 }
0x29e4   :  { %v3674_v44 = vadd.f32 %v3673_v46, %v3672_v43 }
0x29e6   :  { %v3675_v45 = vrot.slane %v3674_v44, 1 }
0x29e8   :  { %v3676_v50 = vadd.f32 %v3675_v45, %v3674_v44 }
0x29ea   :  { %8512 = vpush %v3676_v50 }
0x2a1b   :  { %s8513_s25 = spop %8512 }
0x2a1c   :  { %p3680_p7 = scmp.ge.f32.partialorder %s8513_s25, 4.0 }
0x2a1e   :  { %s3681_s3 = scalar_select %p3680_p7, 1, 0 }
0x2a20   :  { %3682 = sst [smem:[#allocation3]] %s3681_s3 }
0x2a21 PF:  { %s3683_s29 = sld [smem:[#allocation3]] }
0x2a27   :  { %p7326_p8 = scmp.ne.s32.totalorder %s3683_s29, 0 }
0x2a28   :  { %s9450_s13 = smov (!%p7326_p8), 96   ;;  %s9451_s22 = smov (!%p7326_p8), 64  }
0x2a29   :  { %3687 = sbr.rel (%p7326_p8) target bundleno = 15985 (0x3e71), region = 157  ;;  %s9452_s14 = smov (!%p7326_p8), 32  }
0x2a2e   :  { %v8834_v36 = vld [vmem:[#allocation9 + $0x24] ss:$16 sps:$4 sm:$0xff]   ;;  %v8836_v0 = vld [vmem:[#allocation9 + $0x20] ss:$16 sps:$4 sm:$0xff]   ;;  %v9447_v51 = vmov 0   ;;  %v9448_v20 = vmov 0.0  }
0x2a2f   :  { %3796 = vmatprep.mubr.bf16.mxu0 %v9447_v51  ;;  %3837 = vmatprep.mubr.bf16.mxu1 %v9447_v51  ;;  %v8837_v14 = vld [vmem:[#allocation9 + $0x4] ss:$16 sps:$4 sm:$0xff]   ;;  %v8839_v53 = vld [vmem:[#allocation9] ss:$16 sps:$4 sm:$0xff]   ;;  %v8856_v17 = vld [vmem:[#allocation9 + $0x2c] ss:$16 sps:$4 sm:$0xff]  }
0x2a30   :  { %3776 = vmatprep.subr.bf16.mxu0 %v8834_v36  ;;  %v3688_v48 = vld [vmem:[#allocation2] sm:$0xff]  ;;  %v8840_v56 = vld [vmem:[#allocation12 + $0x78] sm:$0xff]   ;;  %v8846_v26 = vld [vmem:[#allocation12 + $0x60] sm:$0xff]   ;;  %3817 = vmatprep.subr.bf16.mxu1 %v8856_v17  ;;  %vm9449_vm8 = vmmov 0  }
0x2a31   :  { %3777 = vmatpush1.bf16.msra.mxu0 %v8836_v0  ;;  %v3689_v54 = vadd.f32 %v3688_v48, %v9678_v12  ;;  %v8841_v58 = vld [vmem:[#allocation12 + $0x38] sm:$0xff]   ;;  %v8842_v59 = vld [vmem:[#allocation12 + $0x70] sm:$0xff]   ;;  %v8844_v61 = vld [vmem:[#allocation12 + $0x68] sm:$0xff]  }
0x2a32   :  { %3778 = vmatprep.subr.bf16.mxu0 %v8837_v14  ;;  %v8843_v60 = vld [vmem:[#allocation12 + $0x30] sm:$0xff]   ;;  %v8845_v62 = vld [vmem:[#allocation12 + $0x28] sm:$0xff]   ;;  %v8847_v63 = vld [vmem:[#allocation12 + $0x20] sm:$0xff]  }
0x2a33   :  { %v3690_v57 = vpack.c.bf16 %v3689_v54, %v3689_v54  ;;  %v8848_v2 = vld [vmem:[#allocation12 + $0x58] sm:$0xff]   ;;  %v8850_v5 = vld [vmem:[#allocation12 + $0x50] sm:$0xff]   ;;  %v8852_v11 = vld [vmem:[#allocation12 + $0x48] sm:$0xff]  }
0x2a34   :  { %v8849_v3 = vld [vmem:[#allocation12 + $0x18] sm:$0xff]   ;;  %v8851_v10 = vld [vmem:[#allocation12 + $0x10] sm:$0xff]   ;;  %v8853_v13 = vld [vmem:[#allocation12 + $0x8] sm:$0xff]  }
0x2a35   :  { %3779 = vmatpush1.bf16.msra.mxu0 %v8839_v53  ;;  %v8854_v15 = vld [vmem:[#allocation12 + $0x40] sm:$0xff]   ;;  %v8859_v19 = vld [vmem:[#allocation9 + $0xc] ss:$16 sps:$4 sm:$0xff]   ;;  %v10115_v25 = vld [vmem:[#allocation10] sm:$0xf] }
0x2a36   :  { %7772 = vmatprep.subr.bf16.mxu0 %v8840_v56  ;;  %v8855_v16 = vld [vmem:[#allocation12] sm:$0xff]   ;;  %v3704_v27 = vrot.slane %v10115_v25, %v9696_v47  ;;  %v3708_v28 = vrot.slane %v10115_v25, %v9701_v49  ;;  %v8864_v52 = vld [vmem:[%s10525_s8 + $0x28] sm:$0xff]   ;;  %v8865_v40 = vld [vmem:[%s10525_s8 + $0x20] sm:$0xff]  }
0x2a37   :  { %v8858_v18 = vld [vmem:[#allocation9 + $0x28] ss:$16 sps:$4 sm:$0xff]   ;;  %v7337_v50 = vld [vmem:[#allocation13] ss:$0 sm:$0xff]  ;;  %v7354_v56 = vld [vmem:[#allocation15] ss:$0 sm:$0xff] }
0x2a38   :  { %7335 = vmatmul.mubr.msk.bf16.vlgmr.msra.gmra.mxu0 %vm353_vm0, %v3690_v57  ;;  %3818 = vmatpush1.bf16.msra.mxu1 %v8858_v18  ;;  %v8861_v21 = vld [vmem:[#allocation9 + $0x8] ss:$16 sps:$4 sm:$0xff]  }
0x2a39   :  { %7773 = vmatpush3.bf16.msra.mxu0 %v8841_v58  ;;  %3819 = vmatprep.subr.bf16.mxu1 %v8859_v19  ;;  %v8862_v23 = vld [vmem:[%s10525_s8 + $0x38] sm:$0xff]   ;;  %v8863_v55 = vld [vmem:[%s10525_s8 + $0x30] sm:$0xff]   ;;  %v8868_v42 = vld [vmem:[%s10525_s8 + $0x8] sm:$0xff]  }
0x2a3a   :  { %7774 = vmatprep.subr.bf16.mxu0 %v8842_v59  ;;  %v8866_v37 = vld [vmem:[%s10525_s8 + $0x18] sm:$0xff]   ;;  %v8867_v41 = vld [vmem:[%s10525_s8 + $0x10] sm:$0xff]   ;;  %v8869_v1 = vld [vmem:[%s10525_s8] sm:$0xff]  }
0x2a3c   :  { %3820 = vmatpush1.bf16.msra.mxu1 %v8861_v21 }
0x2a3d   :  { %7775 = vmatpush3.bf16.msra.mxu0 %v8843_v60  ;;  %8240 = vmatprep.subr.bf16.mxu1 %v9448_v20 }
0x2a3e   :  { %7776 = vmatprep.subr.bf16.mxu0 %v8844_v61 }
0x2a3f   :  { %7336 = vmatmul.mubr.msk.bf16.vlgmr.msra.gmra.mxu1 %vm353_vm0, %v3690_v57 }
0x2a40   :  { %8241 = vmatpush3.bf16.msra.mxu1 %v8862_v23  ;;  %8256 = vmatprep.mubr.msk.bf16.mxu1 %vm9449_vm8, %v9448_v20 }
0x2a41   :  { %7777 = vmatpush3.bf16.msra.mxu0 %v8845_v62  ;;  %8242 = vmatprep.subr.bf16.mxu1 %v9448_v20 }
0x2a42   :  { %7778 = vmatprep.subr.bf16.mxu0 %v8846_v26 }
0x2a44   :  { %8243 = vmatpush3.bf16.msra.mxu1 %v8863_v55  ;;  %v7364_v55 = vld [vmem:[#allocation18] ss:$0 sm:$0xff] }
0x2a45   :  { %7779 = vmatpush3.bf16.msra.mxu0 %v8847_v63  ;;  %8244 = vmatprep.subr.bf16.mxu1 %v9448_v20 }
0x2a46   :  { %7780 = vmatprep.subr.bf16.mxu0 %v8848_v2 }
0x2a48   :  { %8245 = vmatpush3.bf16.msra.mxu1 %v8864_v52 }
0x2a49   :  { %7781 = vmatpush3.bf16.msra.mxu0 %v8849_v3  ;;  %8246 = vmatprep.subr.bf16.mxu1 %v9448_v20 }
0x2a4a   :  { %7782 = vmatprep.subr.bf16.mxu0 %v8850_v5 }
0x2a4c   :  { %8247 = vmatpush3.bf16.msra.mxu1 %v8865_v40 }
0x2a4d   :  { %7783 = vmatpush3.bf16.msra.mxu0 %v8851_v10  ;;  %8248 = vmatprep.subr.bf16.mxu1 %v9448_v20 }
0x2a4e   :  { %7784 = vmatprep.subr.bf16.mxu0 %v8852_v11  ;;  %v8870_v11 = vld [vmem:[#allocation16 + $0x8] sm:$0xff]  }
0x2a50   :  { %8249 = vmatpush3.bf16.msra.mxu1 %v8866_v37 }
0x2a51   :  { %7785 = vmatpush3.bf16.msra.mxu0 %v8853_v13  ;;  %8250 = vmatprep.subr.bf16.mxu1 %v9448_v20 }
0x2a52   :  { %7786 = vmatprep.subr.bf16.mxu0 %v8854_v15  ;;  %v8871_v15 = vld [vmem:[#allocation16] sm:$0xff]  }
0x2a54   :  { %8251 = vmatpush3.bf16.msra.mxu1 %v8867_v41 }
0x2a55   :  { %7787 = vmatpush3.bf16.msra.mxu0 %v8855_v16  ;;  %8252 = vmatprep.subr.bf16.mxu1 %v9448_v20 }
0x2a56   :  { %8260 = vmatprep.subr.bf16.mxu0 %v9448_v20 }
0x2a58   :  { %8253 = vmatpush3.bf16.msra.mxu1 %v8868_v42 }
0x2a59   :  { %8254 = vmatprep.subr.bf16.mxu1 %v9448_v20 }
0x2a5c   :  { %8255 = vmatpush3.bf16.msra.mxu1 %v8869_v1 }
0x2a5d   :  { %8268 = vmatprep.subr.bf16.mxu1 %v9448_v20 }
0x2af8   :  { %v3798_v29 = vpop.f32.mrf.mxu0 }
0x2af9   :  { %v3799_v30 = vadd.f32 %v3798_v29, %v3704_v27 }
0x2afa   :  { %v3800_v31 = vpop.f32.mrf.mxu0 }
0x2afb   :  { %v3801_v32 = vadd.f32 %v3800_v31, %v3708_v28  ;;  %8912 = vtanh.f32 %v3799_v30 }
0x2afc   :  { %v3802_v33 = vpop.f32.mrf.mxu0 }
0x2afd   :  { %8914 = vtanh.f32 %v3801_v32 }
0x2afe   :  { %v3803_v9 = vpop.f32.mrf.mxu0 }
0x2aff   :  { %v10149_v8 = vpop.f32.mrf.mxu1 }
0x2b01   :  { %v10151_v43 = vpop.f32.mrf.mxu1 }
0x2b03   :  { %v3843_v46 = vpop.f32.mrf.mxu1 }
0x2b05   :  { %v3844_v44 = vpop.f32.mrf.mxu1 }
0x2b08   :  { %v8913_v35 = vpop.eup %8912 }
0x2b09   :  { %v3850_v24 = vpack.c.bf16 %v8913_v35, %v8913_v35 }
0x2b0a   :  { %v8915_v38 = vpop.eup %8914 }
0x2b0b   :  { %v3851_v39 = vpack.c.bf16 %v8915_v38, %v8915_v38 }
0x2b0d   :  { %4019 = vmatprep.mubr.bf16.mxu0 %v3851_v39 }
0x2b0e   :  { %4020 = vmatmul.mubr.bf16.vlgmr.msra.gmra.mxu0 %v3850_v24 }
0x2b0f   :  { %8264 = vmatprep.mubr.msk.bf16.mxu0 %vm9449_vm8, %v9448_v20  ;;  %8261 = vmatpush3.bf16.msra.mxu0 %v8870_v11 }
0x2b10   :  { %8262 = vmatprep.subr.bf16.mxu0 %v9448_v20 }
0x2b13   :  { %8263 = vmatpush3.bf16.msra.mxu0 %v8871_v15  ;;  %v3712_v15 = vrot.slane %v10115_v25, %v9781_v34 }
0x2b14   :  { %8274 = vmatprep.subr.bf16.mxu0 %v9448_v20 }
0x2bce   :  { %v7788_v45 = vpop.f32.mrf.mxu0 }
0x2bd0   :  { %v7789_v36 = vpop.f32.mrf.mxu0 }
0x2bd1   :  { %v7790_v0 = vadd.f32 %v7789_v36, %v7788_v45  ;;  %v8875_v36 = vld [vmem:[#allocation21] sm:$0xff]  }
0x2bd2   :  { %v7791_v51 = vpop.f32.mrf.mxu0 }
0x2bd3   :  { %v4022_v14 = vadd.f32 %v7790_v0, %v7337_v50  ;;  %v8874_v50 = vld [vmem:[#allocation21 + $0x8] sm:$0xff]  }
0x2bd4   :  { %v7792_v48 = vpop.f32.mrf.mxu0 }
0x2bd5   :  { %8916 = vtanh.f32 %v4022_v14  ;;  %v8872_v48 = vld [vmem:[#allocation19 + $0x8] sm:$0xff]  }
0x2be2   :  { %v8917_v53 = vpop.eup %8916 }
0x2be3   :  { %v4028_v54 = vpack.c.bf16 %v8917_v53, %v8917_v53 }
0x2be5   :  { %8257 = vmatmul.mubr.bf16.vlgmr.msra.gmra.mxu1 %v4028_v54  ;;  %v8873_v54 = vld [vmem:[#allocation19] sm:$0xff]  }
0x2be6   :  { %8270 = vmatprep.mubr.msk.bf16.mxu1 %vm9449_vm8, %v9448_v20 }
0x2ca5   :  { %v4134_v57 = vpop.f32.mrf.mxu1 }
0x2ca6   :  { %v4135_v58 = vadd.f32 %v7354_v56, %v4134_v57  ;;  %v8876_v56 = vld [vmem:[#allocation12 + $0xf8] sm:$0xff]   ;;  %v3716_v57 = vrot.slane %v10115_v25, %v9770_v22  ;;  %v8888_v25 = vld [vmem:[#allocation12 + $0xc8] sm:$0xff]  }
0x2ca7   :  { %v8258_v59 = vpop.f32.mrf.mxu1 }
0x2ca8   :  { %8918 = vtanh.f32 %v4135_v58  ;;  %v7363_v26 = vmul.f32 -1.442695, %v4135_v58  ;;  %v4147_v18 = vmax.f32 %v4135_v58, 0.0  ;;  %v3842_v58 = vadd.f32 %v10151_v43, %v3716_v57 }
0x2ca9   :  { %v4137_v60 = vpop.f32.mrf.mxu1 }
0x2caa   :  { %8920 = vpow2.f32 %v7363_v26  ;;  %v8878_v26 = vld [vmem:[#allocation12 + $0xf0] sm:$0xff]  }
0x2cab   :  { %v8259_v61 = vpop.f32.mrf.mxu1 }
0x2cac   :  { %v8877_v61 = vld [vmem:[#allocation12 + $0xb8] sm:$0xff]  }
0x2cb5   :  { %v8919_v62 = vpop.eup %8918 }
0x2cb6   :  { %4149 = vrot.lane.b32.xlu0 %v8919_v62, %s9450_s13 }
0x2cb7   :  { %v8921_v63 = vpop.eup %8920 }
0x2cb8   :  { %v4143_v2 = vadd.f32 1.0, %v8921_v63 }
0x2cba   :  { %8922 = vrcp.f32 %v4143_v2 }
0x2cc7   :  { %v8923_v3 = vpop.eup %8922 }
0x2d28   :  { %v4150_v5 = vpop.permute.xlu0 %4149 }
0x2d29   :  { %v4152_v10 = vmul.f32 %v8923_v3, %v4150_v5  ;;  %v8879_v5 = vld [vmem:[#allocation12 + $0xb0] sm:$0xff]  }
0x2d2b   :  { %8924 = vtanh.f32 %v4152_v10  ;;  %v8880_v10 = vld [vmem:[#allocation12 + $0xe8] sm:$0xff]  }
0x2d38   :  { %v8925_v13 = vpop.eup %8924 }
0x2d39   :  { %4155 = vrot.lane.b32.xlu0 %v8925_v13, %s9451_s22  ;;  %v8881_v13 = vld [vmem:[#allocation12 + $0xa8] sm:$0xff]  }
0x2dab   :  { %v4156_v16 = vpop.permute.xlu0 %4155 }
0x2dac   :  { %v4158_v17 = vmul.f32 %v8923_v3, %v4156_v16  ;;  %v8882_v16 = vld [vmem:[#allocation12 + $0xe0] sm:$0xff]  }
0x2dae   :  { %4160 = vrot.lane.b32.xlu1 %v4158_v17, %s9452_s14 }
0x2e20   :  { %v4161_v19 = vpop.permute.xlu1 %4160 }
0x2e21   :  { %v4163_v21 = vadd.f32 %v4161_v19, %v4147_v18  ;;  %v8883_v19 = vld [vmem:[#allocation12 + $0xa0] sm:$0xff]  }
0x2e23   :  { %v4164_v23 = vpack.c.bf16 %v4163_v21, %v4163_v21  ;;  %v3840_v21 = vadd.f32 %v10149_v8, %v3712_v15  ;;  %v8901_v15 = vld [vmem:[#allocation16 + $0x10] sm:$0xff]  }
0x2e25   :  { %8265 = vmatmul.mubr.msk.bf16.vlgmr.msra.gmra.mxu0 %vm353_vm0, %v4164_v23 }
0x2e26   :  { %8276 = vmatprep.mubr.msk.bf16.mxu0 %vm9449_vm8, %v9448_v20 }
0x2ee5   :  { %v4225_v27 = vpop.f32.mrf.mxu0 }
0x2ee6   :  { %v4226_v28 = vadd.f32 %v7364_v55, %v4225_v27  ;;  %v8885_v27 = vld [vmem:[#allocation12 + $0x98] sm:$0xff]  }
0x2ee7   :  { %v8266_v29 = vpop.f32.mrf.mxu0 }
0x2ee8   :  { %v4231_v30 = vpack.c.bf16 %v4226_v28, %v4226_v28  ;;  %v8886_v28 = vld [vmem:[#allocation12 + $0xd0] sm:$0xff]  }
0x2ee9   :  { %v4228_v31 = vpop.f32.mrf.mxu0  ;;  %v8887_v29 = vld [vmem:[#allocation12 + $0x90] sm:$0xff]  }
0x2eea   :  { %4233 = vrot.lane.b32.xlu1 %v4231_v30, %s9450_s13  ;;  %v8890_v31 = vld [vmem:[#allocation12 + $0xc0] sm:$0xff]  }
0x2eeb   :  { %v8267_v32 = vpop.f32.mrf.mxu0 }
0x2eec   :  { %v8891_v32 = vld [vmem:[#allocation12 + $0x80] sm:$0xff]  }
0x2f5c   :  { %v4234_v33 = vpop.permute.xlu1 %4233 }
0x2f5d   :  { %v4239_v9 = vsel %vm353_vm0, %v4234_v33, 0 }
0x2f5e   :  { %8269 = vmatpush3.bf16.xpose.msra.mxu1 %v4239_v9  ;;  %v8892_v9 = vld [vmem:[%s10525_s8 + $0x78] sm:$0xff]  }
0x2f5f   :  { %8280 = vmatprep.subr.bf16.mxu1 %v9448_v20 }
0x2f65   :  { %8271 = vmatmul.mubr.msk.bf16.vlgmr.msra.gmra.mxu1 %vm353_vm0, %v4231_v30 }
0x2f66   :  { %8284 = vmatprep.mubr.msk.bf16.mxu1 %vm9449_vm8, %v9448_v20  ;;  %8281 = vmatpush3.bf16.msra.mxu1 %v8874_v50 }
0x2f67   :  { %8282 = vmatprep.subr.bf16.mxu1 %v9448_v20 }
0x2f6a   :  { %8283 = vmatpush3.bf16.msra.mxu1 %v8875_v36 }
0x2f6b   :  { %7816 = vmatprep.subr.bf16.mxu1 %v8876_v56 }
0x3025   :  { %v4275_v35 = vpop.f32.mrf.mxu1 }
0x3026   :  { %v4281_v38 = vmul.f32 0.17677669, %v4275_v35  ;;  %v8893_v35 = vld [vmem:[%s10525_s8 + $0x70] sm:$0xff]  }
0x3027   :  { %v8272_v39 = vpop.f32.mrf.mxu1 }
0x3028   :  { %v4283_v24 = vsel %vm954_vm3, %v4281_v38, -inf  ;;  %v8895_v39 = vld [vmem:[%s10525_s8 + $0x60] sm:$0xff]  }
0x3029   :  { %4284 = vmax.xlane.f32.xlu0 %v4283_v24  ;;  %v4278_v52 = vpop.f32.mrf.mxu1  ;;  %v8896_v24 = vld [vmem:[%s10525_s8 + $0x58] sm:$0xff]  }
0x302a   :  { %v8897_v52 = vld [vmem:[%s10525_s8 + $0x50] sm:$0xff]  }
0x302b   :  { %v8273_v40 = vpop.f32.mrf.mxu1 }
0x302c   :  { %v8898_v40 = vld [vmem:[%s10525_s8 + $0x48] sm:$0xff]  }
0x303f   :  { %4295 = vrot.lane.b32.xlu0 %v4231_v30, %s9451_s22  ;;  %v8889_v30 = vld [vmem:[#allocation12 + $0x88] sm:$0xff]  }
0x30b2   :  { %v4285_v37 = vpop.xlane.xlu0 %4284 }
0x30b3   :  { %v4286_v41 = vsub.f32 %v4281_v38, %v4285_v37  ;;  %v8894_v38 = vld [vmem:[%s10525_s8 + $0x68] sm:$0xff]   ;;  %v8899_v37 = vld [vmem:[%s10525_s8 + $0x40] sm:$0xff]  }
0x30b5   :  { %v4287_v42 = vmul.f32 1.442695, %v4286_v41 }
0x30b6   :  { %v4296_v1 = vpop.permute.xlu0 %4295 }
0x30b7   :  { %8926 = vpow2.f32 %v4287_v42  ;;  %v4302_v46 = vsel %vm972_vm4, %v4296_v1, 0 }
0x30b8   :  { %8275 = vmatpush3.bf16.msra.mxu0 %v4302_v46 }
0x30b9   :  { %8288 = vmatprep.subr.bf16.mxu0 %v9448_v20 }
0x30c4   :  { %v8927_v44 = vpop.eup %8926 }
0x30c5   :  { %v4289_v45 = vsel %vm954_vm3, %v8927_v44, 0.0 }
0x30c6   :  { %4290 = vadd.xlane.f32.xlu1 %v4289_v45  ;;  %v7380_v45 = vld [vmem:[#allocation13 + $0x1] ss:$0 sm:$0xff] }
0x314f   :  { %v4291_v0 = vpop.xlane.xlu1 %4290 }
0x3150   :  { %8928 = vrcp.f32 %v4291_v0 }
0x3151   :  { %8930 = vtanh.f32 %v3842_v58 }
0x3152   :  { %8932 = vtanh.f32 %v3840_v21 }
0x315d   :  { %v8929_v51 = vpop.eup %8928 }
0x315e   :  { %v4293_v14 = vmul.f32 %v8929_v51, %v8927_v44  ;;  %v8931_v59 = vpop.eup %8930 }
0x315f   :  { %v4506_v2 = vpack.c.bf16 %v8931_v59, %v8931_v59  ;;  %v8933_v8 = vpop.eup %8932 }
0x3160   :  { %v4294_v53 = vpack.c.bf16 %v4293_v14, %v4293_v14  ;;  %v4505_v33 = vpack.c.bf16 %v8933_v8, %v8933_v8 }
0x3162   :  { %8277 = vmatmul.mubr.msk.bf16.vlgmr.msra.gmra.mxu0 %vm954_vm3, %v4294_v53 }
0x3163   :  { %8289 = vmatpush3.bf16.msra.mxu0 %v8872_v48  ;;  %8292 = vmatprep.mubr.msk.bf16.mxu0 %vm9449_vm8, %v9448_v20 }
0x3164   :  { %8290 = vmatprep.subr.bf16.mxu0 %v9448_v20 }
0x3167   :  { %8291 = vmatpush3.bf16.msra.mxu0 %v8873_v54  ;;  %v7413_v54 = vld [vmem:[#allocation15 + $0x1] ss:$0 sm:$0xff] }
0x3168   :  { %8296 = vmatprep.subr.bf16.mxu0 %v9448_v20 }
0x316a   :  { %8293 = vmatmul.mubr.msk.bf16.vlgmr.msra.gmra.mxu0 %vm353_vm0, %v4164_v23  ;;  %v8884_v23 = vld [vmem:[#allocation12 + $0xd8] sm:$0xff]  }
0x316b   :  { %8312 = vmatprep.mubr.msk.bf16.mxu0 %vm9449_vm8, %v9448_v20  ;;  %8297 = vmatpush3.bf16.msra.mxu0 %v8892_v9 }
0x316c   :  { %8298 = vmatprep.subr.bf16.mxu0 %v9448_v20 }
0x316f   :  { %8299 = vmatpush3.bf16.msra.mxu0 %v8893_v35 }
0x3170   :  { %8300 = vmatprep.subr.bf16.mxu0 %v9448_v20 }
0x3173   :  { %8301 = vmatpush3.bf16.msra.mxu0 %v8894_v38 }
0x3174   :  { %8302 = vmatprep.subr.bf16.mxu0 %v9448_v20 }
0x3177   :  { %8303 = vmatpush3.bf16.msra.mxu0 %v8895_v39 }
0x3178   :  { %8304 = vmatprep.subr.bf16.mxu0 %v9448_v20 }
0x317b   :  { %8305 = vmatpush3.bf16.msra.mxu0 %v8896_v24 }
0x317c   :  { %8306 = vmatprep.subr.bf16.mxu0 %v9448_v20 }
0x317f   :  { %8307 = vmatpush3.bf16.msra.mxu0 %v8897_v52 }
0x3180   :  { %8308 = vmatprep.subr.bf16.mxu0 %v9448_v20 }
0x3183   :  { %8309 = vmatpush3.bf16.msra.mxu0 %v8898_v40 }
0x3184   :  { %8310 = vmatprep.subr.bf16.mxu0 %v9448_v20 }
0x3187   :  { %8311 = vmatpush3.bf16.msra.mxu0 %v8899_v37 }
0x3188   :  { %8324 = vmatprep.subr.bf16.mxu0 %v9448_v20 }
0x3222   :  { %v10186_v60 = vpop.f32.mrf.mxu0 }
0x3223   :  { %v4348_v62 = vpack.c.bf16 %v10186_v60, %v10186_v60 }
0x3224   :  { %v8278_v63 = vpop.f32.mrf.mxu0 }
0x3225   :  { %8285 = vmatmul.mubr.msk.bf16.vlgmr.msra.gmra.mxu1 %vm353_vm0, %v4348_v62 }
0x3226   :  { %7817 = vmatpush3.bf16.msra.mxu1 %v8877_v61  ;;  %v4341_v3 = vpop.f32.mrf.mxu0  ;;  %4676 = vmatprep.mubr.bf16.mxu1 %v4506_v2 }
0x3227   :  { %7818 = vmatprep.subr.bf16.mxu1 %v8878_v26 }
0x3228   :  { %v8279_v43 = vpop.f32.mrf.mxu0 }
0x3229   :  { %v8900_v43 = vld [vmem:[#allocation16 + $0x18] sm:$0xff]  }
0x322a   :  { %7819 = vmatpush3.bf16.msra.mxu1 %v8879_v5  ;;  %v10191_v11 = vpop.f32.mrf.mxu0 }
0x322b   :  { %7820 = vmatprep.subr.bf16.mxu1 %v8880_v10 }
0x322c   :  { %v8294_v17 = vpop.f32.mrf.mxu0 }
0x322e   :  { %7821 = vmatpush3.bf16.msra.mxu1 %v8881_v13  ;;  %v4457_v18 = vpop.f32.mrf.mxu0 }
0x322f   :  { %7822 = vmatprep.subr.bf16.mxu1 %v8882_v16 }
0x3230   :  { %v8295_v55 = vpop.f32.mrf.mxu0 }
0x3231   :  { %v7423_v55 = vld [vmem:[#allocation18 + $0x1] ss:$0 sm:$0xff] }
0x3232   :  { %7823 = vmatpush3.bf16.msra.mxu1 %v8883_v19 }
0x3233   :  { %7824 = vmatprep.subr.bf16.mxu1 %v8884_v23 }
0x3236   :  { %7825 = vmatpush3.bf16.msra.mxu1 %v8885_v27 }
0x3237   :  { %7826 = vmatprep.subr.bf16.mxu1 %v8886_v28 }
0x323a   :  { %7827 = vmatpush3.bf16.msra.mxu1 %v8887_v29 }
0x323b   :  { %7828 = vmatprep.subr.bf16.mxu1 %v8888_v25 }
0x323e   :  { %7829 = vmatpush3.bf16.msra.mxu1 %v8889_v30 }
0x323f   :  { %7830 = vmatprep.subr.bf16.mxu1 %v8890_v31 }
0x3242   :  { %7831 = vmatpush3.bf16.msra.mxu1 %v8891_v32 }
0x3243   :  { %8316 = vmatprep.subr.bf16.mxu1 %v9448_v20 }
0x3245   :  { %4677 = vmatmul.mubr.bf16.vlgmr.msra.gmra.mxu1 %v4505_v33 }
0x3246   :  { %8320 = vmatprep.mubr.msk.bf16.mxu1 %vm9449_vm8, %v9448_v20  ;;  %8317 = vmatpush3.bf16.msra.mxu1 %v8900_v43 }
0x3247   :  { %8318 = vmatprep.subr.bf16.mxu1 %v9448_v20 }
0x324a   :  { %8319 = vmatpush3.bf16.msra.mxu1 %v8901_v15 }
0x324b   :  { %8330 = vmatprep.subr.bf16.mxu1 %v9448_v20 }
0x32e5   :  { %v10231_v41 = vpop.f32.mrf.mxu1 }
0x32e7   :  { %v8286_v42 = vpop.f32.mrf.mxu1 }
0x32e9   :  { %v4405_v1 = vpop.f32.mrf.mxu1 }
0x32eb   :  { %v8287_v46 = vpop.f32.mrf.mxu1 }
0x32ec   :  { %v8904_v46 = vld [vmem:[#allocation21 + $0x18] sm:$0xff]  }
0x3305   :  { %v7832_v44 = vpop.f32.mrf.mxu1 }
0x3307   :  { %v7833_v50 = vpop.f32.mrf.mxu1 }
0x3308   :  { %v7834_v36 = vadd.f32 %v7833_v50, %v7832_v44 }
0x3309   :  { %v7835_v0 = vpop.f32.mrf.mxu1 }
0x330a   :  { %v4679_v51 = vadd.f32 %v7834_v36, %v7380_v45 }
0x330b   :  { %v7836_v14 = vpop.f32.mrf.mxu1 }
0x330c   :  { %8934 = vtanh.f32 %v4679_v51  ;;  %v8902_v51 = vld [vmem:[#allocation19 + $0x18] sm:$0xff]  }
0x3319   :  { %v8935_v48 = vpop.eup %8934 }
0x331a   :  { %v4685_v53 = vpack.c.bf16 %v8935_v48, %v8935_v48  ;;  %v8903_v48 = vld [vmem:[#allocation19 + $0x10] sm:$0xff]  }
0x331c   :  { %8313 = vmatmul.mubr.bf16.vlgmr.msra.gmra.mxu0 %v4685_v53  ;;  %v8905_v53 = vld [vmem:[#allocation21 + $0x10] sm:$0xff]  }
0x331d   :  { %8326 = vmatprep.mubr.msk.bf16.mxu0 %vm9449_vm8, %v9448_v20 }
0x33dc   :  { %v4793_v56 = vpop.f32.mrf.mxu0 }
0x33dd   :  { %v4794_v57 = vadd.f32 %v7413_v54, %v4793_v56 }
0x33de   :  { %v8314_v58 = vpop.f32.mrf.mxu0 }
0x33df   :  { %8936 = vtanh.f32 %v4794_v57  ;;  %v7422_v26 = vmul.f32 -1.442695, %v4794_v57  ;;  %v4806_v18 = vmax.f32 %v4794_v57, 0.0 }
0x33e0   :  { %v4796_v59 = vpop.f32.mrf.mxu0 }
0x33e1   :  { %8938 = vpow2.f32 %v7422_v26 }
0x33e2   :  { %v8315_v61 = vpop.f32.mrf.mxu0 }
0x33ec   :  { %v8937_v62 = vpop.eup %8936 }
0x33ed   :  { %4808 = vrot.lane.b32.xlu1 %v8937_v62, %s9450_s13 }
0x33ee   :  { %v8939_v63 = vpop.eup %8938 }
0x33ef   :  { %v4802_v2 = vadd.f32 1.0, %v8939_v63 }
0x33f1   :  { %8940 = vrcp.f32 %v4802_v2  ;;  %v4455_v2 = vadd.f32 %v10191_v11, %v10231_v41 }
0x33fe   :  { %v8941_v3 = vpop.eup %8940 }
0x345f   :  { %v4809_v5 = vpop.permute.xlu1 %4808 }
0x3460   :  { %v4811_v10 = vmul.f32 %v8941_v3, %v4809_v5 }
0x3462   :  { %8942 = vtanh.f32 %v4811_v10 }
0x346f   :  { %v8943_v13 = vpop.eup %8942 }
0x3470   :  { %4814 = vrot.lane.b32.xlu0 %v8943_v13, %s9451_s22  ;;  %v7435_v13 = vld [vmem:[#allocation22 + $0x1] ss:$0 sm:$0xff] }
0x34e2   :  { %v4815_v16 = vpop.permute.xlu0 %4814 }
0x34e3   :  { %v4817_v17 = vmul.f32 %v8941_v3, %v4815_v16  ;;  %v7376_v3 = vld [vmem:[#allocation22] ss:$0 sm:$0xff] }
0x34e4   :  { %v4467_v5 = vadd.f32 %v7376_v3, %v4455_v2 }
0x34e5   :  { %4819 = vrot.lane.b32.xlu1 %v4817_v17, %s9452_s14 }
0x34e6   :  { %v7377_v10 = vmul.f32 -1.442695, %v4467_v5  ;;  %v8910_v5 = vld [vmem:[%s10536_s19 + $0x8] sm:$0xff]  }
0x3557   :  { %v4820_v19 = vpop.permute.xlu1 %4819 }
0x3558   :  { %v4822_v21 = vadd.f32 %v4820_v19, %v4806_v18 }
0x355a   :  { %v4823_v23 = vpack.c.bf16 %v4822_v21, %v4822_v21 }
0x355c   :  { %8321 = vmatmul.mubr.msk.bf16.vlgmr.msra.gmra.mxu1 %vm353_vm0, %v4823_v23 }
0x355d   :  { %8332 = vmatprep.mubr.msk.bf16.mxu1 %vm9449_vm8, %v9448_v20 }
0x361c   :  { %v4886_v27 = vpop.f32.mrf.mxu1 }
0x361d   :  { %v4887_v28 = vadd.f32 %v7423_v55, %v4886_v27 }
0x361e   :  { %v8322_v29 = vpop.f32.mrf.mxu1 }
0x361f   :  { %v4892_v25 = vpack.c.bf16 %v4887_v28, %v4887_v28 }
0x3620   :  { %v4889_v30 = vpop.f32.mrf.mxu1 }
0x3621   :  { %4894 = vrot.lane.b32.xlu0 %v4892_v25, %s9450_s13 }
0x3622   :  { %v8323_v31 = vpop.f32.mrf.mxu1 }
0x3693   :  { %v4895_v32 = vpop.permute.xlu0 %4894 }
0x3694   :  { %v4900_v8 = vsel %vm353_vm0, %v4895_v32, 0 }
0x3695   :  { %8325 = vmatpush3.bf16.xpose.msra.mxu0 %v4900_v8 }
0x3696   :  { %8336 = vmatprep.subr.bf16.mxu0 %v9448_v20 }
0x369c   :  { %8327 = vmatmul.mubr.msk.bf16.vlgmr.msra.gmra.mxu0 %vm353_vm0, %v4892_v25 }
0x369d   :  { %8340 = vmatprep.mubr.msk.bf16.mxu0 %vm9449_vm8, %v9448_v20  ;;  %8337 = vmatpush3.bf16.msra.mxu0 %v8904_v46 }
0x369e   :  { %8338 = vmatprep.subr.bf16.mxu0 %v9448_v20 }
0x36a1   :  { %8339 = vmatpush3.bf16.msra.mxu0 %v8905_v53 }
0x36a2   :  { %8352 = vmatprep.subr.bf16.mxu0 %v9448_v20 }
0x375c   :  { %v4936_v33 = vpop.f32.mrf.mxu0 }
0x375d   :  { %v4942_v9 = vmul.f32 0.17677669, %v4936_v33 }
0x375e   :  { %v8328_v35 = vpop.f32.mrf.mxu0 }
0x375f   :  { %v4943_v38 = vsel %vm954_vm3, %v4942_v9, -inf }
0x3760   :  { %4944 = vmax.xlane.f32.xlu1 %v4943_v38  ;;  %v4939_v39 = vpop.f32.mrf.mxu0 }
0x3762   :  { %v8329_v24 = vpop.f32.mrf.mxu0 }
0x37e9   :  { %v4945_v52 = vpop.xlane.xlu1 %4944 }
0x37ea   :  { %v4946_v40 = vsub.f32 %v4942_v9, %v4945_v52 }
0x37ec   :  { %v4947_v37 = vmul.f32 1.442695, %v4946_v40 }
0x37ee   :  { %8944 = vpow2.f32 %v4947_v37  ;;  %v8907_v37 = vld [vmem:[%s10534_s17 + $0x10] sm:$0xff]  }
0x37fb   :  { %v8945_v42 = vpop.eup %8944 }
0x37fc   :  { %v4949_v1 = vsel %vm954_vm3, %v8945_v42, 0.0 }
0x37fd   :  { %4950 = vadd.xlane.f32.xlu0 %v4949_v1 }
0x3813   :  { %4955 = vrot.lane.b32.xlu0 %v4892_v25, %s9451_s22 }
0x3886   :  { %v4951_v44 = vpop.xlane.xlu0 %4950 }
0x3887   :  { %8946 = vrcp.f32 %v4951_v44 }
0x3888   :  { %8948 = vpow2.f32 %v7377_v10  ;;  %v8911_v10 = vld [vmem:[%s10536_s19] sm:$0xff]  }
0x388a   :  { %v4956_v45 = vpop.permute.xlu0 %4955 }
0x388b   :  { %v4961_v50 = vsel %vm972_vm4, %v4956_v45, 0  ;;  %v8909_v45 = vld [vmem:[%s10534_s17] sm:$0xff]  }
0x388c   :  { %8331 = vmatpush3.bf16.msra.mxu1 %v4961_v50 }
0x388d   :  { %8344 = vmatprep.subr.bf16.mxu1 %v9448_v20 }
0x3894   :  { %v8947_v36 = vpop.eup %8946 }
0x3895   :  { %v4953_v0 = vmul.f32 %v8947_v36, %v8945_v42  ;;  %v8908_v42 = vld [vmem:[%s10534_s17 + $0x8] sm:$0xff]   ;;  %v7437_v36 = vld [vmem:[#allocation24 + $0x1] ss:$0 sm:$0xff] }
0x3897   :  { %v4954_v14 = vpack.c.bf16 %v4953_v0, %v4953_v0 }
0x3899   :  { %8333 = vmatmul.mubr.msk.bf16.vlgmr.msra.gmra.mxu1 %vm954_vm3, %v4954_v14 }
0x389a   :  { %8345 = vmatpush3.bf16.msra.mxu1 %v8902_v51  ;;  %8348 = vmatprep.mubr.msk.bf16.mxu1 %vm9449_vm8, %v9448_v20  ;;  %v7438_v51 = vld [vmem:[#allocation25 + $0x1] ss:$0 sm:$0xff] }
0x389b   :  { %8346 = vmatprep.subr.bf16.mxu1 %v9448_v20 }
0x389e   :  { %8347 = vmatpush3.bf16.msra.mxu1 %v8903_v48 }
0x389f   :  { %8364 = vmatprep.subr.bf16.mxu1 %v9448_v20 }
0x38a1   :  { %8349 = vmatmul.mubr.msk.bf16.vlgmr.msra.gmra.mxu1 %vm353_vm0, %v4823_v23  ;;  %v8949_v23 = vpop.eup %8948 }
0x38a2   :  { %8368 = vmatprep.mubr.msk.bf16.mxu1 %vm9449_vm8, %v9448_v20  ;;  %v4471_v55 = vadd.f32 1.0, %v8949_v23  ;;  %8365 = vmatpush3.bf16.msra.mxu1 %v8910_v5 }
0x38a3   :  { %8366 = vmatprep.subr.bf16.mxu1 %v9448_v20 }
0x38a6   :  { %8367 = vmatpush3.bf16.msra.mxu1 %v8911_v10 }
0x3959   :  { %v4997_v54 = vpop.f32.mrf.mxu1 }
0x395a   :  { %v5008_v56 = vpack.c.bf16 %v4997_v54, %v4997_v54 }
0x395b   :  { %v8334_v57 = vpop.f32.mrf.mxu1 }
0x395c   :  { %8341 = vmatmul.mubr.msk.bf16.vlgmr.msra.gmra.mxu0 %vm353_vm0, %v5008_v56 }
0x395d   :  { %v5000_v58 = vpop.f32.mrf.mxu1  ;;  %8360 = vmatprep.mubr.msk.bf16.mxu0 %vm9449_vm8, %v9448_v20 }
0x395f   :  { %v8335_v59 = vpop.f32.mrf.mxu1 }
0x3960   :  { %v7378_v59 = vld [vmem:[#allocation24] ss:$0 sm:$0xff] }
0x3961   :  { %v5115_v61 = vpop.f32.mrf.mxu1 }
0x3963   :  { %v8350_v62 = vpop.f32.mrf.mxu1 }
0x3964   :  { %v7379_v62 = vld [vmem:[#allocation25] ss:$0 sm:$0xff] }
0x3965   :  { %v5118_v26 = vpop.f32.mrf.mxu1 }
0x3967   :  { %v8351_v63 = vpop.f32.mrf.mxu1 }
0x3a1c   :  { %v5063_v43 = vpop.f32.mrf.mxu0 }
0x3a1d   :  { %v5116_v15 = vadd.f32 %v5115_v61, %v5063_v43  ;;  %v7439_v43 = vld [vmem:[#allocation27] ss:$0 sm:$0xff] }
0x3a1e   :  { %v8342_v16 = vpop.f32.mrf.mxu0 }
0x3a1f   :  { %v5129_v17 = vadd.f32 %v7435_v13, %v5116_v15 }
0x3a20   :  { %v5066_v18 = vpop.f32.mrf.mxu0 }
0x3a21   :  { %v7436_v19 = vmul.f32 -1.442695, %v5129_v17 }
0x3a22   :  { %v8343_v21 = vpop.f32.mrf.mxu0 }
0x3a23   :  { %8950 = vpow2.f32 %v7436_v19  ;;  %v7445_v21 = vld [vmem:[#allocation4] ss:$0 sm:$0xff] }
0x3a24   :  { %8952 = vrcp.f32 %v4471_v55 }
0x3a30   :  { %v8951_v27 = vpop.eup %8950 }
0x3a31   :  { %v5133_v28 = vadd.f32 1.0, %v8951_v27  ;;  %v8953_v11 = vpop.eup %8952 }
0x3a32   :  { %v4474_v30 = vmul.f32 %v8953_v11, %v10186_v60  ;;  %v8906_v60 = vld [vmem:[%s10534_s17 + $0x18] sm:$0xff]  }
0x3a33   :  { %8954 = vrcp.f32 %v5133_v28  ;;  %8353 = vmatpush3.bf16.msra.mxu0 %v8906_v60 }
0x3a34   :  { %v4475_v31 = vsel %vm353_vm0, %v4474_v30, 0.0  ;;  %8354 = vmatprep.subr.bf16.mxu0 %v9448_v20 }
0x3a37   :  { %8355 = vmatpush3.bf16.msra.mxu0 %v8907_v37 }
0x3a38   :  { %8356 = vmatprep.subr.bf16.mxu0 %v9448_v20 }
0x3a3b   :  { %8357 = vmatpush3.bf16.msra.mxu0 %v8908_v42 }
0x3a3c   :  { %8358 = vmatprep.subr.bf16.mxu0 %v9448_v20 }
0x3a3f   :  { %8359 = vmatpush3.bf16.msra.mxu0 %v8909_v45 }
0x3a40   :  { %v8955_v41 = vpop.eup %8954 }
0x3a41   :  { %v5136_v29 = vmul.f32 %v8955_v41, %v4997_v54 }
0x3a43   :  { %v5137_v25 = vsel %vm353_vm0, %v5136_v29, 0.0 }
0x3a44   :  { %5138 = vadd.xlane.f32.xlu1 %v5137_v25 }
0x3a48   :  { %4476 = vadd.xlane.f32.xlu1 %v4475_v31 }
0x3acd   :  { %v5139_v32 = vpop.xlane.xlu1 %5138 }
0x3ace   :  { %v5140_v8 = vmul.f32 0.03125, %v5139_v32 }
0x3ad0   :  { %v5141_v33 = vsub.f32 %v5136_v29, %v5140_v8 }
0x3ad1   :  { %v4477_v9 = vpop.xlane.xlu1 %4476 }
0x3ad2   :  { %v4479_v35 = vmul.f32 0.03125, %v4477_v9  ;;  %v5142_v38 = vmul.f32 %v5141_v33, %v5141_v33 }
0x3ad4   :  { %v4480_v39 = vsub.f32 %v4474_v30, %v4479_v35  ;;  %v5143_v24 = vsel %vm353_vm0, %v5142_v38, 0.0 }
0x3ad5   :  { %5144 = vadd.xlane.f32.xlu1 %v5143_v24 }
0x3ad6   :  { %v4481_v52 = vmul.f32 %v4480_v39, %v4480_v39 }
0x3ad8   :  { %v4482_v40 = vsel %vm353_vm0, %v4481_v52, 0.0 }
0x3ad9   :  { %4483 = vadd.xlane.f32.xlu1 %v4482_v40 }
0x3b5e   :  { %v5145_v1 = vpop.xlane.xlu1 %5144 }
0x3b5f   :  { %v5146_v46 = vmul.f32 0.03125, %v5145_v1 }
0x3b61   :  { %v5147_v44 = vadd.f32 1e-05, %v5146_v46 }
0x3b62   :  { %v4484_v53 = vpop.xlane.xlu1 %4483 }
0x3b63   :  { %8956 = vrsqrt.f32 %v5147_v44  ;;  %v4485_v54 = vmul.f32 0.03125, %v4484_v53 }
0x3b65   :  { %v4486_v56 = vadd.f32 1e-05, %v4485_v54 }
0x3b67   :  { %8958 = vrsqrt.f32 %v4486_v56 }
0x3b70   :  { %v8957_v50 = vpop.eup %8956 }
0x3b71   :  { %v5149_v0 = vmul.f32 %v8957_v50, %v5141_v33 }
0x3b73   :  { %v5158_v14 = vmul.f32 %v7437_v36, %v5149_v0 }
0x3b74   :  { %v8959_v57 = vpop.eup %8958 }
0x3b75   :  { %v5167_v48 = vadd.f32 %v7438_v51, %v5158_v14  ;;  %v4488_v58 = vmul.f32 %v8959_v57, %v4480_v39 }
0x3b77   :  { %5169 = vrot.lane.b32.xlu1 %v5167_v48, %s9452_s14  ;;  %v4496_v61 = vmul.f32 %v7378_v59, %v4488_v58 }
0x3b79   :  { %v4504_v26 = vadd.f32 %v7379_v62, %v4496_v61 }
0x3be9   :  { %v5170_v63 = vpop.permute.xlu1 %5169 }
0x3bea   :  { %v5172_v2 = vsel %vm353_vm0, %v4504_v26, %v5170_v63 }
0x3beb   :  { %v5173_v3 = vpack.c.bf16 %v5172_v2, %v5172_v2 }
0x3bed   :  { %8361 = vmatmul.mubr.msk.bf16.vlgmr.msra.gmra.mxu0 %vm1885_vm5, %v5173_v3 }
0x3cad   :  { %v5251_v13 = vpop.f32.mrf.mxu0 }
0x3cae   :  { %v5252_v15 = vadd.f32 %v7439_v43, %v5251_v13 }
0x3caf   :  { %v8362_v16 = vpop.f32.mrf.mxu0 }
0x3cb0   :  { %8960 = vtanh.f32 %v5252_v15 }
0x3cb1   :  { %v5254_v17 = vpop.f32.mrf.mxu0 }
0x3cb3   :  { %v8363_v18 = vpop.f32.mrf.mxu0 }
0x3cbd   :  { %v8961_v19 = vpop.eup %8960 }
0x3cbe   :  { %5342 = vst.msk [vmem:[%s10538_s21] sm:$0xff] %vm353_vm0, %v8961_v19  ;;  %5343 = vst.msk [vmem:[#allocation2] sm:$0xff] %vm353_vm0, %v8961_v19  ;;  %v5258_v20 = vpack.c.bf16 %v8961_v19, %v8961_v19 }
0x3cc0   :  { %8369 = vmatmul.mubr.msk.bf16.vlgmr.msra.gmra.mxu1 %vm353_vm0, %v5258_v20 }
0x3d80   :  { %v5319_v23 = vpop.f32.mrf.mxu1 }
0x3d81   :  { %v5320_v55 = vadd.f32 %v7445_v21, %v5319_v23 }
0x3d82   :  { %v8370_v27 = vpop.f32.mrf.mxu1 }
0x3d83   :  { %v7449_v28 = vmul.f32 -1.442695, %v5320_v55 }
0x3d84   :  { %v5322_v11 = vpop.f32.mrf.mxu1 }
0x3d85   :  { %8962 = vpow2.f32 %v7449_v28 }
0x3d86   :  { %v8371_v41 = vpop.f32.mrf.mxu1 }
0x3d92   :  { %v8963_v29 = vpop.eup %8962 }
0x3d93   :  { %v5328_v25 = vadd.f32 1.0, %v8963_v29 }
0x3d95   :  { %8964 = vrcp.f32 %v5328_v25 }
0x3da2   :  { %v8965_v30 = vpop.eup %8964 }
0x3da3   :  { %v5332_v31 = vsel %vm2003_vm6, %v8965_v30, 0.0 }
0x3da4   :  { %5333 = vadd.xlane.f32.xlu0 %v5332_v31 }
0x3e2d   :  { %v5334_v32 = vpop.xlane.xlu0 %5333 }
0x3e2e   :  { %v5335_v8 = vrot.slane %v5334_v32, 4 }
0x3e30   :  { %v5336_v33 = vadd.f32 %v5335_v8, %v5334_v32 }
0x3e32   :  { %v5337_v9 = vrot.slane %v5336_v33, 2 }
0x3e34   :  { %v5338_v35 = vadd.f32 %v5337_v9, %v5336_v33 }
0x3e36   :  { %v5339_v38 = vrot.slane %v5338_v35, 1 }
0x3e38   :  { %v5340_v39 = vadd.f32 %v5339_v38, %v5338_v35 }
0x3e3a   :  { %8514 = vpush %v5340_v39 }
0x3e6b   :  { %s8515_s26 = spop %8514 }
0x3e6c   :  { %p5344_p9 = scmp.ge.f32.partialorder %s8515_s26, 4.0 }
0x3e6e   :  { %s5345_s27 = scalar_select %p5344_p9, 1, 0 }
0x3e70   :  { %5346 = sst [smem:[#allocation3]] %s5345_s27 }
0x3e71 PF:  { %s5347_s25 = sld [smem:[#allocation3]] }
0x3e77   :  { %p7450_p10 = scmp.ne.s32.totalorder %s5347_s25, 0 }
0x3e78   :  { %s9456_s7 = smov (!%p7450_p10), 96   ;;  %s9457_s24 = smov (!%p7450_p10), 64  }
0x3e79   :  { %5351 = sbr.rel (%p7450_p10) target bundleno = 21185 (0x52c1), region = 161  ;;  %s9458_s13 = smov (!%p7450_p10), 32  }
0x3e7e   :  { %v8966_v24 = vld [vmem:[#allocation9 + $0x24] ss:$16 sps:$4 sm:$0xff]   ;;  %v8968_v52 = vld [vmem:[#allocation9 + $0x20] ss:$16 sps:$4 sm:$0xff]   ;;  %v9453_v40 = vmov 0   ;;  %v9454_v2 = vmov 0.0  }
0x3e7f   :  { %5460 = vmatprep.mubr.bf16.mxu0 %v9453_v40  ;;  %5501 = vmatprep.mubr.bf16.mxu1 %v9453_v40  ;;  %v8969_v60 = vld [vmem:[#allocation9 + $0x4] ss:$16 sps:$4 sm:$0xff]   ;;  %v8971_v42 = vld [vmem:[#allocation9] ss:$16 sps:$4 sm:$0xff]   ;;  %v8988_v62 = vld [vmem:[#allocation9 + $0x2c] ss:$16 sps:$4 sm:$0xff]  }
0x3e80   :  { %5440 = vmatprep.subr.bf16.mxu0 %v8966_v24  ;;  %v5352_v37 = vld [vmem:[#allocation2] sm:$0xff]  ;;  %v8972_v46 = vld [vmem:[#allocation12 + $0x78] sm:$0xff]   ;;  %v8978_v14 = vld [vmem:[#allocation12 + $0x60] sm:$0xff]   ;;  %5481 = vmatprep.subr.bf16.mxu1 %v8988_v62  ;;  %vm9455_vm9 = vmmov 0  }
0x3e81   :  { %5441 = vmatpush1.bf16.msra.mxu0 %v8968_v52  ;;  %v5353_v1 = vadd.f32 %v5352_v37, %v9678_v12  ;;  %v8973_v45 = vld [vmem:[#allocation12 + $0x38] sm:$0xff]   ;;  %v8974_v50 = vld [vmem:[#allocation12 + $0x70] sm:$0xff]   ;;  %v8976_v0 = vld [vmem:[#allocation12 + $0x68] sm:$0xff]  }
0x3e82   :  { %5442 = vmatprep.subr.bf16.mxu0 %v8969_v60  ;;  %v8975_v36 = vld [vmem:[#allocation12 + $0x30] sm:$0xff]   ;;  %v8977_v51 = vld [vmem:[#allocation12 + $0x28] sm:$0xff]   ;;  %v8979_v48 = vld [vmem:[#allocation12 + $0x20] sm:$0xff]  }
0x3e83   :  { %v5354_v44 = vpack.c.bf16 %v5353_v1, %v5353_v1  ;;  %v8980_v12 = vld [vmem:[#allocation12 + $0x58] sm:$0xff]   ;;  %v8982_v54 = vld [vmem:[#allocation12 + $0x50] sm:$0xff]   ;;  %v8984_v57 = vld [vmem:[#allocation12 + $0x48] sm:$0xff]  }
0x3e84   :  { %v8981_v53 = vld [vmem:[#allocation12 + $0x18] sm:$0xff]   ;;  %v8983_v56 = vld [vmem:[#allocation12 + $0x10] sm:$0xff]   ;;  %v8985_v58 = vld [vmem:[#allocation12 + $0x8] sm:$0xff]  }
0x3e85   :  { %5443 = vmatpush1.bf16.msra.mxu0 %v8971_v42  ;;  %v8986_v59 = vld [vmem:[#allocation12 + $0x40] sm:$0xff]   ;;  %v8991_v63 = vld [vmem:[#allocation9 + $0xc] ss:$16 sps:$4 sm:$0xff]   ;;  %v10319_v43 = vld [vmem:[#allocation10] sm:$0xf] }
0x3e86   :  { %7868 = vmatprep.subr.bf16.mxu0 %v8972_v46  ;;  %v8987_v61 = vld [vmem:[#allocation12] sm:$0xff]   ;;  %v5368_v13 = vrot.slane %v10319_v43, %v9696_v47  ;;  %v5372_v15 = vrot.slane %v10319_v43, %v9701_v49  ;;  %v8996_v47 = vld [vmem:[%s10525_s8 + $0x28] sm:$0xff]   ;;  %v8997_v49 = vld [vmem:[%s10525_s8 + $0x20] sm:$0xff]  }
0x3e87   :  { %v8990_v26 = vld [vmem:[#allocation9 + $0x28] ss:$16 sps:$4 sm:$0xff]   ;;  %v7461_v9 = vld [vmem:[#allocation13] ss:$0 sm:$0xff]  ;;  %v7478_v37 = vld [vmem:[#allocation15] ss:$0 sm:$0xff] }
0x3e88   :  { %7459 = vmatmul.mubr.msk.bf16.vlgmr.msra.gmra.mxu0 %vm353_vm0, %v5354_v44  ;;  %5482 = vmatpush1.bf16.msra.mxu1 %v8990_v26  ;;  %v8993_v3 = vld [vmem:[#allocation9 + $0x8] ss:$16 sps:$4 sm:$0xff]  }
0x3e89   :  { %7869 = vmatpush3.bf16.msra.mxu0 %v8973_v45  ;;  %5483 = vmatprep.subr.bf16.mxu1 %v8991_v63  ;;  %v8994_v5 = vld [vmem:[%s10525_s8 + $0x38] sm:$0xff]   ;;  %v8995_v10 = vld [vmem:[%s10525_s8 + $0x30] sm:$0xff]   ;;  %v9000_v29 = vld [vmem:[%s10525_s8 + $0x8] sm:$0xff]  }
0x3e8a   :  { %7870 = vmatprep.subr.bf16.mxu0 %v8974_v50  ;;  %v8998_v11 = vld [vmem:[%s10525_s8 + $0x18] sm:$0xff]   ;;  %v8999_v41 = vld [vmem:[%s10525_s8 + $0x10] sm:$0xff]   ;;  %v9001_v25 = vld [vmem:[%s10525_s8] sm:$0xff]  }
0x3e8b   :  { %v7488_v63 = vld [vmem:[#allocation18] ss:$0 sm:$0xff] }
0x3e8c   :  { %5484 = vmatpush1.bf16.msra.mxu1 %v8993_v3 }
0x3e8d   :  { %7871 = vmatpush3.bf16.msra.mxu0 %v8975_v36  ;;  %8372 = vmatprep.subr.bf16.mxu1 %v9454_v2 }
0x3e8e   :  { %7872 = vmatprep.subr.bf16.mxu0 %v8976_v0 }
0x3e8f   :  { %7460 = vmatmul.mubr.msk.bf16.vlgmr.msra.gmra.mxu1 %vm353_vm0, %v5354_v44 }
0x3e90   :  { %8373 = vmatpush3.bf16.msra.mxu1 %v8994_v5  ;;  %8388 = vmatprep.mubr.msk.bf16.mxu1 %vm9455_vm9, %v9454_v2 }
0x3e91   :  { %7873 = vmatpush3.bf16.msra.mxu0 %v8977_v51  ;;  %8374 = vmatprep.subr.bf16.mxu1 %v9454_v2 }
0x3e92   :  { %7874 = vmatprep.subr.bf16.mxu0 %v8978_v14 }
0x3e94   :  { %8375 = vmatpush3.bf16.msra.mxu1 %v8995_v10 }
0x3e95   :  { %7875 = vmatpush3.bf16.msra.mxu0 %v8979_v48  ;;  %8376 = vmatprep.subr.bf16.mxu1 %v9454_v2 }
0x3e96   :  { %7876 = vmatprep.subr.bf16.mxu0 %v8980_v12 }
0x3e98   :  { %8377 = vmatpush3.bf16.msra.mxu1 %v8996_v47 }
0x3e99   :  { %7877 = vmatpush3.bf16.msra.mxu0 %v8981_v53  ;;  %8378 = vmatprep.subr.bf16.mxu1 %v9454_v2  ;;  %v9002_v53 = vld [vmem:[#allocation16 + $0x8] sm:$0xff]  }
0x3e9a   :  { %7878 = vmatprep.subr.bf16.mxu0 %v8982_v54 }
0x3e9c   :  { %8379 = vmatpush3.bf16.msra.mxu1 %v8997_v49 }
0x3e9d   :  { %7879 = vmatpush3.bf16.msra.mxu0 %v8983_v56  ;;  %8380 = vmatprep.subr.bf16.mxu1 %v9454_v2  ;;  %v9003_v56 = vld [vmem:[#allocation16] sm:$0xff]  }
0x3e9e   :  { %7880 = vmatprep.subr.bf16.mxu0 %v8984_v57 }
0x3ea0   :  { %8381 = vmatpush3.bf16.msra.mxu1 %v8998_v11 }
0x3ea1   :  { %7881 = vmatpush3.bf16.msra.mxu0 %v8985_v58  ;;  %8382 = vmatprep.subr.bf16.mxu1 %v9454_v2 }
0x3ea2   :  { %7882 = vmatprep.subr.bf16.mxu0 %v8986_v59 }
0x3ea4   :  { %8383 = vmatpush3.bf16.msra.mxu1 %v8999_v41 }
0x3ea5   :  { %7883 = vmatpush3.bf16.msra.mxu0 %v8987_v61  ;;  %8384 = vmatprep.subr.bf16.mxu1 %v9454_v2 }
0x3ea6   :  { %8392 = vmatprep.subr.bf16.mxu0 %v9454_v2 }
0x3ea8   :  { %8385 = vmatpush3.bf16.msra.mxu1 %v9000_v29 }
0x3ea9   :  { %8386 = vmatprep.subr.bf16.mxu1 %v9454_v2 }
0x3eac   :  { %8387 = vmatpush3.bf16.msra.mxu1 %v9001_v25 }
0x3ead   :  { %8400 = vmatprep.subr.bf16.mxu1 %v9454_v2 }
0x3f48   :  { %v5462_v16 = vpop.f32.mrf.mxu0 }
0x3f49   :  { %v5463_v17 = vadd.f32 %v5462_v16, %v5368_v13 }
0x3f4a   :  { %v5464_v18 = vpop.f32.mrf.mxu0 }
0x3f4b   :  { %v5465_v19 = vadd.f32 %v5464_v18, %v5372_v15  ;;  %9044 = vtanh.f32 %v5463_v17 }
0x3f4c   :  { %v5466_v20 = vpop.f32.mrf.mxu0 }
0x3f4d   :  { %9046 = vtanh.f32 %v5465_v19 }
0x3f4e   :  { %v5467_v21 = vpop.f32.mrf.mxu0 }
0x3f4f   :  { %v10353_v30 = vpop.f32.mrf.mxu1 }
0x3f51   :  { %v10355_v31 = vpop.f32.mrf.mxu1 }
0x3f53   :  { %v5507_v32 = vpop.f32.mrf.mxu1 }
0x3f54   :  { %v9006_v32 = vld [vmem:[#allocation21 + $0x8] sm:$0xff]  }
0x3f55   :  { %v5508_v8 = vpop.f32.mrf.mxu1 }
0x3f56   :  { %v9007_v8 = vld [vmem:[#allocation21] sm:$0xff]  }
0x3f58   :  { %v9045_v23 = vpop.eup %9044 }
0x3f59   :  { %v5514_v28 = vpack.c.bf16 %v9045_v23, %v9045_v23 }
0x3f5a   :  { %v9047_v55 = vpop.eup %9046 }
0x3f5b   :  { %v5515_v27 = vpack.c.bf16 %v9047_v55, %v9047_v55 }
0x3f5d   :  { %5683 = vmatprep.mubr.bf16.mxu0 %v5515_v27 }
0x3f5e   :  { %5684 = vmatmul.mubr.bf16.vlgmr.msra.gmra.mxu0 %v5514_v28 }
0x3f5f   :  { %8396 = vmatprep.mubr.msk.bf16.mxu0 %vm9455_vm9, %v9454_v2  ;;  %8393 = vmatpush3.bf16.msra.mxu0 %v9002_v53 }
0x3f60   :  { %8394 = vmatprep.subr.bf16.mxu0 %v9454_v2 }
0x3f63   :  { %8395 = vmatpush3.bf16.msra.mxu0 %v9003_v56  ;;  %v9015_v56 = vld [vmem:[#allocation12 + $0xa0] sm:$0xff]  }
0x3f64   :  { %8406 = vmatprep.subr.bf16.mxu0 %v9454_v2 }
0x401e   :  { %v7884_v33 = vpop.f32.mrf.mxu0 }
0x4020   :  { %v7885_v35 = vpop.f32.mrf.mxu0 }
0x4021   :  { %v7886_v38 = vadd.f32 %v7885_v35, %v7884_v33 }
0x4022   :  { %v7887_v39 = vpop.f32.mrf.mxu0 }
0x4023   :  { %v5686_v24 = vadd.f32 %v7886_v38, %v7461_v9  ;;  %v9004_v38 = vld [vmem:[#allocation19 + $0x8] sm:$0xff]  }
0x4024   :  { %v7888_v52 = vpop.f32.mrf.mxu0 }
0x4025   :  { %9048 = vtanh.f32 %v5686_v24  ;;  %v9005_v24 = vld [vmem:[#allocation19] sm:$0xff]   ;;  %v9008_v52 = vld [vmem:[#allocation12 + $0xf8] sm:$0xff]  }
0x4032   :  { %v9049_v40 = vpop.eup %9048 }
0x4033   :  { %v5692_v60 = vpack.c.bf16 %v9049_v40, %v9049_v40  ;;  %v5380_v40 = vrot.slane %v10319_v43, %v9770_v22  ;;  %v9012_v22 = vld [vmem:[#allocation12 + $0xe8] sm:$0xff]  }
0x4035   :  { %8389 = vmatmul.mubr.bf16.vlgmr.msra.gmra.mxu1 %v5692_v60  ;;  %v5506_v60 = vadd.f32 %v10355_v31, %v5380_v40 }
0x4036   :  { %8402 = vmatprep.mubr.msk.bf16.mxu1 %vm9455_vm9, %v9454_v2 }
0x40f5   :  { %v5798_v42 = vpop.f32.mrf.mxu1 }
0x40f6   :  { %v5799_v1 = vadd.f32 %v7478_v37, %v5798_v42 }
0x40f7   :  { %v8390_v46 = vpop.f32.mrf.mxu1 }
0x40f8   :  { %9050 = vtanh.f32 %v5799_v1  ;;  %v7487_v36 = vmul.f32 -1.442695, %v5799_v1  ;;  %v5811_v59 = vmax.f32 %v5799_v1, 0.0  ;;  %v9009_v1 = vld [vmem:[#allocation12 + $0xb8] sm:$0xff]  }
0x40f9   :  { %v5801_v44 = vpop.f32.mrf.mxu1 }
0x40fa   :  { %9052 = vpow2.f32 %v7487_v36  ;;  %v9010_v44 = vld [vmem:[#allocation12 + $0xf0] sm:$0xff]  }
0x40fb   :  { %v8391_v45 = vpop.f32.mrf.mxu1 }
0x4105   :  { %v9051_v50 = vpop.eup %9050 }
0x4106   :  { %5813 = vrot.lane.b32.xlu0 %v9051_v50, %s9456_s7 }
0x4107   :  { %v9053_v0 = vpop.eup %9052 }
0x4108   :  { %v5807_v51 = vadd.f32 1.0, %v9053_v0  ;;  %v9011_v0 = vld [vmem:[#allocation12 + $0xb0] sm:$0xff]  }
0x410a   :  { %9054 = vrcp.f32 %v5807_v51 }
0x4117   :  { %v9055_v14 = vpop.eup %9054 }
0x4178   :  { %v5814_v48 = vpop.permute.xlu0 %5813 }
0x4179   :  { %v5816_v12 = vmul.f32 %v9055_v14, %v5814_v48  ;;  %v5376_v48 = vrot.slane %v10319_v43, %v9781_v34  ;;  %v9020_v34 = vld [vmem:[#allocation12 + $0xc8] sm:$0xff]  }
0x417a   :  { %v9021_v43 = vld [vmem:[#allocation12 + $0x88] sm:$0xff]  }
0x417b   :  { %9056 = vtanh.f32 %v5816_v12  ;;  %v9014_v12 = vld [vmem:[#allocation12 + $0xe0] sm:$0xff]  }
0x4188   :  { %v9057_v54 = vpop.eup %9056 }
0x4189   :  { %5819 = vrot.lane.b32.xlu0 %v9057_v54, %s9457_s24 }
0x41fb   :  { %v5820_v57 = vpop.permute.xlu0 %5819 }
0x41fc   :  { %v5822_v58 = vmul.f32 %v9055_v14, %v5820_v57  ;;  %v9013_v14 = vld [vmem:[#allocation12 + $0xa8] sm:$0xff]   ;;  %v5504_v57 = vadd.f32 %v10353_v30, %v5376_v48 }
0x41fe   :  { %5824 = vrot.lane.b32.xlu1 %v5822_v58, %s9458_s13  ;;  %v9016_v58 = vld [vmem:[#allocation12 + $0xd8] sm:$0xff]  }
0x4270   :  { %v5825_v61 = vpop.permute.xlu1 %5824 }
0x4271   :  { %v5827_v62 = vadd.f32 %v5825_v61, %v5811_v59  ;;  %v9017_v61 = vld [vmem:[#allocation12 + $0x98] sm:$0xff]  }
0x4273   :  { %v5828_v26 = vpack.c.bf16 %v5827_v62, %v5827_v62  ;;  %v9018_v62 = vld [vmem:[#allocation12 + $0xd0] sm:$0xff]  }
0x4275   :  { %8397 = vmatmul.mubr.msk.bf16.vlgmr.msra.gmra.mxu0 %vm353_vm0, %v5828_v26 }
0x4276   :  { %8408 = vmatprep.mubr.msk.bf16.mxu0 %vm9455_vm9, %v9454_v2 }
0x4335   :  { %v5889_v3 = vpop.f32.mrf.mxu0 }
0x4336   :  { %v5890_v5 = vadd.f32 %v7488_v63, %v5889_v3  ;;  %v9022_v63 = vld [vmem:[#allocation12 + $0xc0] sm:$0xff]  }
0x4337   :  { %v8398_v10 = vpop.f32.mrf.mxu0  ;;  %v9023_v3 = vld [vmem:[#allocation12 + $0x80] sm:$0xff]  }
0x4338   :  { %v5895_v13 = vpack.c.bf16 %v5890_v5, %v5890_v5  ;;  %v9024_v10 = vld [vmem:[%s10525_s8 + $0x78] sm:$0xff]  }
0x4339   :  { %v5892_v15 = vpop.f32.mrf.mxu0 }
0x433a   :  { %5897 = vrot.lane.b32.xlu1 %v5895_v13, %s9456_s7  ;;  %v9026_v15 = vld [vmem:[%s10525_s8 + $0x68] sm:$0xff]  }
0x433b   :  { %v8399_v16 = vpop.f32.mrf.mxu0 }
0x433c   :  { %v9027_v16 = vld [vmem:[%s10525_s8 + $0x60] sm:$0xff]  }
0x43ac   :  { %v5898_v17 = vpop.permute.xlu1 %5897 }
0x43ad   :  { %v5903_v18 = vsel %vm353_vm0, %v5898_v17, 0  ;;  %v9028_v17 = vld [vmem:[%s10525_s8 + $0x58] sm:$0xff]  }
0x43ae   :  { %8401 = vmatpush3.bf16.xpose.msra.mxu1 %v5903_v18  ;;  %v9029_v18 = vld [vmem:[%s10525_s8 + $0x50] sm:$0xff]  }
0x43af   :  { %8412 = vmatprep.subr.bf16.mxu1 %v9454_v2 }
0x43b5   :  { %8403 = vmatmul.mubr.msk.bf16.vlgmr.msra.gmra.mxu1 %vm353_vm0, %v5895_v13 }
0x43b6   :  { %8416 = vmatprep.mubr.msk.bf16.mxu1 %vm9455_vm9, %v9454_v2  ;;  %8413 = vmatpush3.bf16.msra.mxu1 %v9006_v32 }
0x43b7   :  { %8414 = vmatprep.subr.bf16.mxu1 %v9454_v2 }
0x43ba   :  { %8415 = vmatpush3.bf16.msra.mxu1 %v9007_v8 }
0x43bb   :  { %7912 = vmatprep.subr.bf16.mxu1 %v9008_v52 }
0x4475   :  { %v5939_v19 = vpop.f32.mrf.mxu1 }
0x4476   :  { %v5945_v20 = vmul.f32 0.17677669, %v5939_v19  ;;  %v9030_v19 = vld [vmem:[%s10525_s8 + $0x48] sm:$0xff]  }
0x4477   :  { %v8404_v21 = vpop.f32.mrf.mxu1 }
0x4478   :  { %v5947_v23 = vsel %vm954_vm3, %v5945_v20, -inf }
0x4479   :  { %5948 = vmax.xlane.f32.xlu0 %v5947_v23  ;;  %v5942_v55 = vpop.f32.mrf.mxu1 }
0x447b   :  { %v8405_v27 = vpop.f32.mrf.mxu1 }
0x448f   :  { %5959 = vrot.lane.b32.xlu0 %v5895_v13, %s9457_s24  ;;  %v9025_v13 = vld [vmem:[%s10525_s8 + $0x70] sm:$0xff]  }
0x4502   :  { %v5949_v28 = vpop.xlane.xlu0 %5948 }
0x4503   :  { %v5950_v47 = vsub.f32 %v5945_v20, %v5949_v28  ;;  %v9031_v20 = vld [vmem:[%s10525_s8 + $0x40] sm:$0xff]  }
0x4505   :  { %v5951_v49 = vmul.f32 1.442695, %v5950_v47  ;;  %v7504_v47 = vld [vmem:[#allocation13 + $0x1] ss:$0 sm:$0xff] }
0x4506   :  { %v5960_v11 = vpop.permute.xlu0 %5959 }
0x4507   :  { %9058 = vpow2.f32 %v5951_v49  ;;  %v5966_v41 = vsel %vm972_vm4, %v5960_v11, 0 }
0x4508   :  { %8407 = vmatpush3.bf16.msra.mxu0 %v5966_v41 }
0x4509   :  { %8420 = vmatprep.subr.bf16.mxu0 %v9454_v2 }
0x4514   :  { %v9059_v29 = vpop.eup %9058 }
0x4515   :  { %v5953_v25 = vsel %vm954_vm3, %v9059_v29, 0.0 }
0x4516   :  { %5954 = vadd.xlane.f32.xlu1 %v5953_v25 }
0x459f   :  { %v5955_v33 = vpop.xlane.xlu1 %5954 }
0x45a0   :  { %9060 = vrcp.f32 %v5955_v33  ;;  %v7537_v33 = vld [vmem:[#allocation15 + $0x1] ss:$0 sm:$0xff] }
0x45a1   :  { %9062 = vtanh.f32 %v5506_v60 }
0x45a2   :  { %9064 = vtanh.f32 %v5504_v57 }
0x45ad   :  { %v9061_v9 = vpop.eup %9060 }
0x45ae   :  { %v5957_v35 = vmul.f32 %v9061_v9, %v9059_v29  ;;  %v9063_v37 = vpop.eup %9062 }
0x45af   :  { %v6170_v50 = vpack.c.bf16 %v9063_v37, %v9063_v37  ;;  %v9065_v30 = vpop.eup %9064 }
0x45b0   :  { %v5958_v39 = vpack.c.bf16 %v5957_v35, %v5957_v35  ;;  %v6169_v5 = vpack.c.bf16 %v9065_v30, %v9065_v30 }
0x45b2   :  { %8409 = vmatmul.mubr.msk.bf16.vlgmr.msra.gmra.mxu0 %vm954_vm3, %v5958_v39 }
0x45b3   :  { %8421 = vmatpush3.bf16.msra.mxu0 %v9004_v38  ;;  %8424 = vmatprep.mubr.msk.bf16.mxu0 %vm9455_vm9, %v9454_v2 }
0x45b4   :  { %8422 = vmatprep.subr.bf16.mxu0 %v9454_v2 }
0x45b7   :  { %8423 = vmatpush3.bf16.msra.mxu0 %v9005_v24 }
0x45b8   :  { %8428 = vmatprep.subr.bf16.mxu0 %v9454_v2 }
0x45ba   :  { %8425 = vmatmul.mubr.msk.bf16.vlgmr.msra.gmra.mxu0 %vm353_vm0, %v5828_v26  ;;  %v9019_v26 = vld [vmem:[#allocation12 + $0x90] sm:$0xff]  }
0x45bb   :  { %8444 = vmatprep.mubr.msk.bf16.mxu0 %vm9455_vm9, %v9454_v2  ;;  %8429 = vmatpush3.bf16.msra.mxu0 %v9024_v10 }
0x45bc   :  { %8430 = vmatprep.subr.bf16.mxu0 %v9454_v2 }
0x45bf   :  { %8431 = vmatpush3.bf16.msra.mxu0 %v9025_v13 }
0x45c0   :  { %8432 = vmatprep.subr.bf16.mxu0 %v9454_v2 }
0x45c3   :  { %8433 = vmatpush3.bf16.msra.mxu0 %v9026_v15 }
0x45c4   :  { %8434 = vmatprep.subr.bf16.mxu0 %v9454_v2 }
0x45c7   :  { %8435 = vmatpush3.bf16.msra.mxu0 %v9027_v16 }
0x45c8   :  { %8436 = vmatprep.subr.bf16.mxu0 %v9454_v2 }
0x45cb   :  { %8437 = vmatpush3.bf16.msra.mxu0 %v9028_v17 }
0x45cc   :  { %8438 = vmatprep.subr.bf16.mxu0 %v9454_v2 }
0x45cf   :  { %8439 = vmatpush3.bf16.msra.mxu0 %v9029_v18  ;;  %v9036_v18 = vld [vmem:[#allocation21 + $0x18] sm:$0xff]  }
0x45d0   :  { %8440 = vmatprep.subr.bf16.mxu0 %v9454_v2 }
0x45d3   :  { %8441 = vmatpush3.bf16.msra.mxu0 %v9030_v19 }
0x45d4   :  { %8442 = vmatprep.subr.bf16.mxu0 %v9454_v2 }
0x45d7   :  { %8443 = vmatpush3.bf16.msra.mxu0 %v9031_v20 }
0x45d8   :  { %8456 = vmatprep.subr.bf16.mxu0 %v9454_v2 }
0x4672   :  { %v10390_v42 = vpop.f32.mrf.mxu0 }
0x4673   :  { %v6012_v46 = vpack.c.bf16 %v10390_v42, %v10390_v42 }
0x4674   :  { %v8410_v45 = vpop.f32.mrf.mxu0 }
0x4675   :  { %8417 = vmatmul.mubr.msk.bf16.vlgmr.msra.gmra.mxu1 %vm353_vm0, %v6012_v46  ;;  %v9032_v45 = vld [vmem:[#allocation16 + $0x18] sm:$0xff]  }
0x4676   :  { %7913 = vmatpush3.bf16.msra.mxu1 %v9009_v1  ;;  %v6005_v36 = vpop.f32.mrf.mxu0  ;;  %6340 = vmatprep.mubr.bf16.mxu1 %v6170_v50 }
0x4677   :  { %7914 = vmatprep.subr.bf16.mxu1 %v9010_v44  ;;  %v9033_v36 = vld [vmem:[#allocation16 + $0x10] sm:$0xff]  }
0x4678   :  { %v8411_v31 = vpop.f32.mrf.mxu0 }
0x467a   :  { %7915 = vmatpush3.bf16.msra.mxu1 %v9011_v0  ;;  %v10395_v51 = vpop.f32.mrf.mxu0 }
0x467b   :  { %7916 = vmatprep.subr.bf16.mxu1 %v9012_v22 }
0x467c   :  { %v8426_v53 = vpop.f32.mrf.mxu0 }
0x467d   :  { %v7547_v53 = vld [vmem:[#allocation18 + $0x1] ss:$0 sm:$0xff] }
0x467e   :  { %7917 = vmatpush3.bf16.msra.mxu1 %v9013_v14  ;;  %v6121_v54 = vpop.f32.mrf.mxu0 }
0x467f   :  { %7918 = vmatprep.subr.bf16.mxu1 %v9014_v12 }
0x4680   :  { %v8427_v59 = vpop.f32.mrf.mxu0 }
0x4682   :  { %7919 = vmatpush3.bf16.msra.mxu1 %v9015_v56 }
0x4683   :  { %7920 = vmatprep.subr.bf16.mxu1 %v9016_v58 }
0x4686   :  { %7921 = vmatpush3.bf16.msra.mxu1 %v9017_v61 }
0x4687   :  { %7922 = vmatprep.subr.bf16.mxu1 %v9018_v62 }
0x468a   :  { %7923 = vmatpush3.bf16.msra.mxu1 %v9019_v26 }
0x468b   :  { %7924 = vmatprep.subr.bf16.mxu1 %v9020_v34 }
0x468e   :  { %7925 = vmatpush3.bf16.msra.mxu1 %v9021_v43 }
0x468f   :  { %7926 = vmatprep.subr.bf16.mxu1 %v9022_v63 }
0x4692   :  { %7927 = vmatpush3.bf16.msra.mxu1 %v9023_v3 }
0x4693   :  { %8448 = vmatprep.subr.bf16.mxu1 %v9454_v2 }
0x4695   :  { %6341 = vmatmul.mubr.bf16.vlgmr.msra.gmra.mxu1 %v6169_v5 }
0x4696   :  { %8452 = vmatprep.mubr.msk.bf16.mxu1 %vm9455_vm9, %v9454_v2  ;;  %8449 = vmatpush3.bf16.msra.mxu1 %v9032_v45 }
0x4697   :  { %8450 = vmatprep.subr.bf16.mxu1 %v9454_v2 }
0x469a   :  { %8451 = vmatpush3.bf16.msra.mxu1 %v9033_v36 }
0x469b   :  { %8462 = vmatprep.subr.bf16.mxu1 %v9454_v2 }
0x4735   :  { %v10435_v21 = vpop.f32.mrf.mxu1 }
0x4737   :  { %v8418_v23 = vpop.f32.mrf.mxu1 }
0x4739   :  { %v6069_v55 = vpop.f32.mrf.mxu1 }
0x473b   :  { %v8419_v27 = vpop.f32.mrf.mxu1 }
0x4755   :  { %v7928_v28 = vpop.f32.mrf.mxu1 }
0x4757   :  { %v7929_v49 = vpop.f32.mrf.mxu1 }
0x4758   :  { %v7930_v11 = vadd.f32 %v7929_v49, %v7928_v28  ;;  %v9034_v28 = vld [vmem:[#allocation19 + $0x18] sm:$0xff]   ;;  %v9035_v49 = vld [vmem:[#allocation19 + $0x10] sm:$0xff]  }
0x4759   :  { %v7931_v41 = vpop.f32.mrf.mxu1 }
0x475a   :  { %v6343_v29 = vadd.f32 %v7930_v11, %v7504_v47  ;;  %v9037_v11 = vld [vmem:[#allocation21 + $0x10] sm:$0xff]  }
0x475b   :  { %v7932_v25 = vpop.f32.mrf.mxu1 }
0x475c   :  { %9066 = vtanh.f32 %v6343_v29 }
0x4769   :  { %v9067_v32 = vpop.eup %9066 }
0x476a   :  { %v6349_v8 = vpack.c.bf16 %v9067_v32, %v9067_v32 }
0x476c   :  { %8445 = vmatmul.mubr.bf16.vlgmr.msra.gmra.mxu0 %v6349_v8 }
0x476d   :  { %8458 = vmatprep.mubr.msk.bf16.mxu0 %vm9455_vm9, %v9454_v2 }
0x482c   :  { %v6457_v9 = vpop.f32.mrf.mxu0 }
0x482d   :  { %v6458_v35 = vadd.f32 %v7537_v33, %v6457_v9 }
0x482e   :  { %v8446_v38 = vpop.f32.mrf.mxu0 }
0x482f   :  { %9068 = vtanh.f32 %v6458_v35  ;;  %v7546_v40 = vmul.f32 -1.442695, %v6458_v35  ;;  %v6470_v31 = vmax.f32 %v6458_v35, 0.0 }
0x4830   :  { %v6460_v39 = vpop.f32.mrf.mxu0 }
0x4831   :  { %9070 = vpow2.f32 %v7546_v40  ;;  %v6119_v39 = vadd.f32 %v10395_v51, %v10435_v21 }
0x4832   :  { %v8447_v24 = vpop.f32.mrf.mxu0 }
0x4833   :  { %v7500_v24 = vld [vmem:[#allocation22] ss:$0 sm:$0xff] }
0x483c   :  { %v9069_v52 = vpop.eup %9068 }
0x483d   :  { %6472 = vrot.lane.b32.xlu1 %v9069_v52, %s9456_s7  ;;  %v6131_v52 = vadd.f32 %v7500_v24, %v6119_v39 }
0x483e   :  { %v9071_v60 = vpop.eup %9070 }
0x483f   :  { %v6466_v37 = vadd.f32 1.0, %v9071_v60  ;;  %v7501_v40 = vmul.f32 -1.442695, %v6131_v52 }
0x4841   :  { %9072 = vrcp.f32 %v6466_v37  ;;  %v7559_v37 = vld [vmem:[#allocation22 + $0x1] ss:$0 sm:$0xff] }
0x484e   :  { %v9073_v1 = vpop.eup %9072 }
0x48af   :  { %v6473_v46 = vpop.permute.xlu1 %6472 }
0x48b0   :  { %v6475_v44 = vmul.f32 %v9073_v1, %v6473_v46 }
0x48b2   :  { %9074 = vtanh.f32 %v6475_v44 }
0x48bf   :  { %v9075_v50 = vpop.eup %9074 }
0x48c0   :  { %6478 = vrot.lane.b32.xlu0 %v9075_v50, %s9457_s24 }
0x4932   :  { %v6479_v0 = vpop.permute.xlu0 %6478 }
0x4933   :  { %v6481_v22 = vmul.f32 %v9073_v1, %v6479_v0 }
0x4935   :  { %6483 = vrot.lane.b32.xlu1 %v6481_v22, %s9458_s13 }
0x49a7   :  { %v6484_v14 = vpop.permute.xlu1 %6483 }
0x49a8   :  { %v6486_v48 = vadd.f32 %v6484_v14, %v6470_v31 }
0x49aa   :  { %v6487_v12 = vpack.c.bf16 %v6486_v48, %v6486_v48 }
0x49ac   :  { %8453 = vmatmul.mubr.msk.bf16.vlgmr.msra.gmra.mxu1 %vm353_vm0, %v6487_v12 }
0x49ad   :  { %8464 = vmatprep.mubr.msk.bf16.mxu1 %vm9455_vm9, %v9454_v2 }
0x4a6c   :  { %v6550_v54 = vpop.f32.mrf.mxu1 }
0x4a6d   :  { %v6551_v56 = vadd.f32 %v7547_v53, %v6550_v54 }
0x4a6e   :  { %v8454_v57 = vpop.f32.mrf.mxu1 }
0x4a6f   :  { %v6556_v58 = vpack.c.bf16 %v6551_v56, %v6551_v56 }
0x4a70   :  { %v6553_v59 = vpop.f32.mrf.mxu1 }
0x4a71   :  { %6558 = vrot.lane.b32.xlu0 %v6556_v58, %s9456_s7 }
0x4a72   :  { %v8455_v61 = vpop.f32.mrf.mxu1 }
0x4ae3   :  { %v6559_v62 = vpop.permute.xlu0 %6558 }
0x4ae4   :  { %v6564_v26 = vsel %vm353_vm0, %v6559_v62, 0 }
0x4ae5   :  { %8457 = vmatpush3.bf16.xpose.msra.mxu0 %v6564_v26 }
0x4ae6   :  { %8468 = vmatprep.subr.bf16.mxu0 %v9454_v2 }
0x4aec   :  { %8459 = vmatmul.mubr.msk.bf16.vlgmr.msra.gmra.mxu0 %vm353_vm0, %v6556_v58 }
0x4aed   :  { %8472 = vmatprep.mubr.msk.bf16.mxu0 %vm9455_vm9, %v9454_v2  ;;  %8469 = vmatpush3.bf16.msra.mxu0 %v9036_v18 }
0x4aee   :  { %8470 = vmatprep.subr.bf16.mxu0 %v9454_v2 }
0x4af1   :  { %8471 = vmatpush3.bf16.msra.mxu0 %v9037_v11  ;;  %v7502_v11 = vld [vmem:[#allocation24] ss:$0 sm:$0xff] }
0x4af2   :  { %8484 = vmatprep.subr.bf16.mxu0 %v9454_v2 }
0x4bac   :  { %v6600_v34 = vpop.f32.mrf.mxu0 }
0x4bad   :  { %v6606_v43 = vmul.f32 0.17677669, %v6600_v34 }
0x4bae   :  { %v8460_v63 = vpop.f32.mrf.mxu0 }
0x4baf   :  { %v6607_v3 = vsel %vm954_vm3, %v6606_v43, -inf }
0x4bb0   :  { %6608 = vmax.xlane.f32.xlu1 %v6607_v3  ;;  %v6603_v30 = vpop.f32.mrf.mxu0  ;;  %v9039_v3 = vld [vmem:[%s10534_s17 + $0x10] sm:$0xff]  }
0x4bb1   :  { %v9040_v30 = vld [vmem:[%s10534_s17 + $0x8] sm:$0xff]  }
0x4bb2   :  { %v8461_v5 = vpop.f32.mrf.mxu0 }
0x4c39   :  { %v6609_v10 = vpop.xlane.xlu1 %6608 }
0x4c3a   :  { %v6610_v13 = vsub.f32 %v6606_v43, %v6609_v10 }
0x4c3c   :  { %v6611_v15 = vmul.f32 1.442695, %v6610_v13 }
0x4c3e   :  { %9076 = vpow2.f32 %v6611_v15  ;;  %v9041_v15 = vld [vmem:[%s10534_s17] sm:$0xff]  }
0x4c4b   :  { %v9077_v16 = vpop.eup %9076 }
0x4c4c   :  { %v6613_v17 = vsel %vm954_vm3, %v9077_v16, 0.0 }
0x4c4d   :  { %6614 = vadd.xlane.f32.xlu0 %v6613_v17  ;;  %v7561_v17 = vld [vmem:[#allocation24 + $0x1] ss:$0 sm:$0xff] }
0x4c63   :  { %6619 = vrot.lane.b32.xlu0 %v6556_v58, %s9457_s24 }
0x4cd6   :  { %v6615_v19 = vpop.xlane.xlu0 %6614 }
0x4cd7   :  { %9078 = vrcp.f32 %v6615_v19  ;;  %v7562_v19 = vld [vmem:[#allocation25 + $0x1] ss:$0 sm:$0xff] }
0x4cd8   :  { %9080 = vpow2.f32 %v7501_v40 }
0x4cda   :  { %v6620_v20 = vpop.permute.xlu0 %6619 }
0x4cdb   :  { %v6625_v23 = vsel %vm972_vm4, %v6620_v20, 0 }
0x4cdc   :  { %8463 = vmatpush3.bf16.msra.mxu1 %v6625_v23 }
0x4cdd   :  { %8476 = vmatprep.subr.bf16.mxu1 %v9454_v2 }
0x4ce4   :  { %v9079_v55 = vpop.eup %9078 }
0x4ce5   :  { %v6617_v27 = vmul.f32 %v9079_v55, %v9077_v16  ;;  %v9081_v0 = vpop.eup %9080 }
0x4ce6   :  { %v6135_v22 = vadd.f32 1.0, %v9081_v0 }
0x4ce7   :  { %v6618_v47 = vpack.c.bf16 %v6617_v27, %v6617_v27 }
0x4ce9   :  { %8465 = vmatmul.mubr.msk.bf16.vlgmr.msra.gmra.mxu1 %vm954_vm3, %v6618_v47 }
0x4cea   :  { %8477 = vmatpush3.bf16.msra.mxu1 %v9034_v28  ;;  %8480 = vmatprep.mubr.msk.bf16.mxu1 %vm9455_vm9, %v9454_v2 }
0x4ceb   :  { %8478 = vmatprep.subr.bf16.mxu1 %v9454_v2 }
0x4cee   :  { %8479 = vmatpush3.bf16.msra.mxu1 %v9035_v49 }
0x4cef   :  { %8496 = vmatprep.subr.bf16.mxu1 %v9454_v2 }
0x4cf1   :  { %8481 = vmatmul.mubr.msk.bf16.vlgmr.msra.gmra.mxu1 %vm353_vm0, %v6487_v12 }
0x4cf2   :  { %8500 = vmatprep.mubr.msk.bf16.mxu1 %vm9455_vm9, %v9454_v2 }
0x4da9   :  { %v6661_v41 = vpop.f32.mrf.mxu1 }
0x4daa   :  { %v6672_v29 = vpack.c.bf16 %v6661_v41, %v6661_v41 }
0x4dab   :  { %v8466_v25 = vpop.f32.mrf.mxu1 }
0x4dac   :  { %8473 = vmatmul.mubr.msk.bf16.vlgmr.msra.gmra.mxu0 %vm353_vm0, %v6672_v29  ;;  %v7503_v29 = vld [vmem:[#allocation25] ss:$0 sm:$0xff] }
0x4dad   :  { %v6664_v32 = vpop.f32.mrf.mxu1  ;;  %8492 = vmatprep.mubr.msk.bf16.mxu0 %vm9455_vm9, %v9454_v2 }
0x4daf   :  { %v8467_v8 = vpop.f32.mrf.mxu1 }
0x4db1   :  { %v6779_v33 = vpop.f32.mrf.mxu1 }
0x4db3   :  { %v8482_v9 = vpop.f32.mrf.mxu1 }
0x4db4   :  { %v9042_v9 = vld [vmem:[%s10536_s19 + $0x8] sm:$0xff]  }
0x4db5   :  { %v6782_v35 = vpop.f32.mrf.mxu1  ;;  %8497 = vmatpush3.bf16.msra.mxu1 %v9042_v9 }
0x4db6   :  { %8498 = vmatprep.subr.bf16.mxu1 %v9454_v2  ;;  %v9043_v35 = vld [vmem:[%s10536_s19] sm:$0xff]  }
0x4db7   :  { %v8483_v38 = vpop.f32.mrf.mxu1 }
0x4db8   :  { %v7563_v38 = vld [vmem:[#allocation27] ss:$0 sm:$0xff] }
0x4db9   :  { %8499 = vmatpush3.bf16.msra.mxu1 %v9043_v35 }
0x4e6c   :  { %v6727_v60 = vpop.f32.mrf.mxu0 }
0x4e6d   :  { %v6780_v1 = vadd.f32 %v6779_v33, %v6727_v60 }
0x4e6e   :  { %v8474_v46 = vpop.f32.mrf.mxu0 }
0x4e6f   :  { %v6793_v44 = vadd.f32 %v7559_v37, %v6780_v1  ;;  %v7569_v1 = vld [vmem:[#allocation4] ss:$0 sm:$0xff] }
0x4e70   :  { %v6730_v45 = vpop.f32.mrf.mxu0 }
0x4e71   :  { %v7560_v50 = vmul.f32 -1.442695, %v6793_v44 }
0x4e72   :  { %v8475_v36 = vpop.f32.mrf.mxu0 }
0x4e73   :  { %9082 = vpow2.f32 %v7560_v50 }
0x4e74   :  { %9084 = vrcp.f32 %v6135_v22 }
0x4e80   :  { %v9083_v31 = vpop.eup %9082 }
0x4e81   :  { %v6797_v14 = vadd.f32 1.0, %v9083_v31  ;;  %v9085_v51 = vpop.eup %9084 }
0x4e82   :  { %v6138_v53 = vmul.f32 %v9085_v51, %v10390_v42  ;;  %v9038_v42 = vld [vmem:[%s10534_s17 + $0x18] sm:$0xff]  }
0x4e83   :  { %9086 = vrcp.f32 %v6797_v14  ;;  %8485 = vmatpush3.bf16.msra.mxu0 %v9038_v42 }
0x4e84   :  { %v6139_v54 = vsel %vm353_vm0, %v6138_v53, 0.0  ;;  %8486 = vmatprep.subr.bf16.mxu0 %v9454_v2 }
0x4e87   :  { %8487 = vmatpush3.bf16.msra.mxu0 %v9039_v3 }
0x4e88   :  { %8488 = vmatprep.subr.bf16.mxu0 %v9454_v2 }
0x4e8b   :  { %8489 = vmatpush3.bf16.msra.mxu0 %v9040_v30 }
0x4e8c   :  { %8490 = vmatprep.subr.bf16.mxu0 %v9454_v2 }
0x4e8f   :  { %8491 = vmatpush3.bf16.msra.mxu0 %v9041_v15 }
0x4e90   :  { %v9087_v21 = vpop.eup %9086 }
0x4e91   :  { %v6800_v48 = vmul.f32 %v9087_v21, %v6661_v41 }
0x4e93   :  { %v6801_v12 = vsel %vm353_vm0, %v6800_v48, 0.0 }
0x4e94   :  { %6802 = vadd.xlane.f32.xlu1 %v6801_v12 }
0x4e98   :  { %6140 = vadd.xlane.f32.xlu1 %v6139_v54 }
0x4f1d   :  { %v6803_v56 = vpop.xlane.xlu1 %6802 }
0x4f1e   :  { %v6804_v57 = vmul.f32 0.03125, %v6803_v56 }
0x4f20   :  { %v6805_v58 = vsub.f32 %v6800_v48, %v6804_v57 }
0x4f21   :  { %v6141_v59 = vpop.xlane.xlu1 %6140 }
0x4f22   :  { %v6143_v61 = vmul.f32 0.03125, %v6141_v59  ;;  %v6806_v62 = vmul.f32 %v6805_v58, %v6805_v58 }
0x4f24   :  { %v6144_v26 = vsub.f32 %v6138_v53, %v6143_v61  ;;  %v6807_v34 = vsel %vm353_vm0, %v6806_v62, 0.0 }
0x4f25   :  { %6808 = vadd.xlane.f32.xlu1 %v6807_v34 }
0x4f26   :  { %v6145_v43 = vmul.f32 %v6144_v26, %v6144_v26 }
0x4f28   :  { %v6146_v63 = vsel %vm353_vm0, %v6145_v43, 0.0 }
0x4f29   :  { %6147 = vadd.xlane.f32.xlu1 %v6146_v63 }
0x4fae   :  { %v6809_v5 = vpop.xlane.xlu1 %6808 }
0x4faf   :  { %v6810_v10 = vmul.f32 0.03125, %v6809_v5 }
0x4fb1   :  { %v6811_v13 = vadd.f32 1e-05, %v6810_v10 }
0x4fb2   :  { %v6148_v55 = vpop.xlane.xlu1 %6147 }
0x4fb3   :  { %9088 = vrsqrt.f32 %v6811_v13  ;;  %v6149_v27 = vmul.f32 0.03125, %v6148_v55 }
0x4fb5   :  { %v6150_v28 = vadd.f32 1e-05, %v6149_v27 }
0x4fb7   :  { %9090 = vrsqrt.f32 %v6150_v28 }
0x4fc0   :  { %v9089_v16 = vpop.eup %9088 }
0x4fc1   :  { %v6813_v18 = vmul.f32 %v9089_v16, %v6805_v58 }
0x4fc3   :  { %v6822_v20 = vmul.f32 %v7561_v17, %v6813_v18 }
0x4fc4   :  { %v9091_v47 = vpop.eup %9090 }
0x4fc5   :  { %v6831_v23 = vadd.f32 %v7562_v19, %v6822_v20  ;;  %v6152_v49 = vmul.f32 %v9091_v47, %v6144_v26 }
0x4fc7   :  { %6833 = vrot.lane.b32.xlu1 %v6831_v23, %s9458_s13  ;;  %v6160_v41 = vmul.f32 %v7502_v11, %v6152_v49 }
0x4fc9   :  { %v6168_v25 = vadd.f32 %v7503_v29, %v6160_v41 }
0x5039   :  { %v6834_v32 = vpop.permute.xlu1 %6833 }
0x503a   :  { %v6836_v8 = vsel %vm353_vm0, %v6168_v25, %v6834_v32 }
0x503b   :  { %v6837_v33 = vpack.c.bf16 %v6836_v8, %v6836_v8 }
0x503d   :  { %8493 = vmatmul.mubr.msk.bf16.vlgmr.msra.gmra.mxu0 %vm1885_vm5, %v6837_v33 }
0x50fd   :  { %v6915_v39 = vpop.f32.mrf.mxu0 }
0x50fe   :  { %v6916_v24 = vadd.f32 %v7563_v38, %v6915_v39 }
0x50ff   :  { %v8494_v52 = vpop.f32.mrf.mxu0 }
0x5100   :  { %9092 = vtanh.f32 %v6916_v24 }
0x5101   :  { %v6918_v40 = vpop.f32.mrf.mxu0 }
0x5103   :  { %v8495_v60 = vpop.f32.mrf.mxu0 }
0x510d   :  { %v9093_v37 = vpop.eup %9092 }
0x510e   :  { %7006 = vst.msk [vmem:[%s10538_s21] sm:$0xff] %vm353_vm0, %v9093_v37  ;;  %7007 = vst.msk [vmem:[#allocation2] sm:$0xff] %vm353_vm0, %v9093_v37  ;;  %v6922_v2 = vpack.c.bf16 %v9093_v37, %v9093_v37 }
0x5110   :  { %8501 = vmatmul.mubr.msk.bf16.vlgmr.msra.gmra.mxu1 %vm353_vm0, %v6922_v2 }
0x51d0   :  { %v6983_v46 = vpop.f32.mrf.mxu1 }
0x51d1   :  { %v6984_v44 = vadd.f32 %v7569_v1, %v6983_v46 }
0x51d2   :  { %v8502_v45 = vpop.f32.mrf.mxu1 }
0x51d3   :  { %v7573_v50 = vmul.f32 -1.442695, %v6984_v44 }
0x51d4   :  { %v6986_v36 = vpop.f32.mrf.mxu1 }
0x51d5   :  { %9094 = vpow2.f32 %v7573_v50 }
0x51d6   :  { %v8503_v0 = vpop.f32.mrf.mxu1 }
0x51e2   :  { %v9095_v22 = vpop.eup %9094 }
0x51e3   :  { %v6992_v31 = vadd.f32 1.0, %v9095_v22 }
0x51e5   :  { %9096 = vrcp.f32 %v6992_v31 }
0x51f2   :  { %v9097_v14 = vpop.eup %9096 }
0x51f3   :  { %v6996_v51 = vsel %vm2003_vm6, %v9097_v14, 0.0 }
0x51f4   :  { %6997 = vadd.xlane.f32.xlu0 %v6996_v51 }
0x527d   :  { %v6998_v21 = vpop.xlane.xlu0 %6997 }
0x527e   :  { %v6999_v48 = vrot.slane %v6998_v21, 4 }
0x5280   :  { %v7000_v12 = vadd.f32 %v6999_v48, %v6998_v21 }
0x5282   :  { %v7001_v53 = vrot.slane %v7000_v12, 2 }
0x5284   :  { %v7002_v54 = vadd.f32 %v7001_v53, %v7000_v12 }
0x5286   :  { %v7003_v56 = vrot.slane %v7002_v54, 1 }
0x5288   :  { %v7004_v57 = vadd.f32 %v7003_v56, %v7002_v54 }
0x528a   :  { %8516 = vpush %v7004_v57 }
0x52bb   :  { %s8517_s19 = spop %8516 }
0x52bc   :  { %p7008_p11 = scmp.ge.f32.partialorder %s8517_s19, 4.0 }
0x52be   :  { %s7009_s14 = scalar_select %p7008_p11, 1, 0 }
0x52c0   :  { %7010 = sst [smem:[#allocation3]] %s7009_s14 }
0x52c1 PF:  { %s7011_s2 = sld [smem:[#allocation3]] }
0x52c7   :  { %p7574_p12 = scmp.ne.s32.totalorder %s7011_s2, 0 }
0x52c9   :  { %7015 = sbr.rel (%p7574_p12) target bundleno = 21402 (0x539a), region = 165 }
0x52ce   :  { %v9459_v58 = vmov 0.0   ;;  %vm9460_vm10 = vmmov 0   ;;  %vm7016_vm11 = vcmask 130048  }
0x52cf   :  { %8504 = vmatprep.subr.bf16.mxu0 %v9459_v58  ;;  %8506 = vmatprep.mubr.msk.bf16.mxu0 %vm9460_vm10, %v9459_v58 }
0x52d0   :  { %8505 = vmatpush3.bf16.msra.mxu0 %v9665_v4 }
0x52d3   :  { %8507 = vmatmul.mubr.msk.bf16.vlgmr.msra.gmra.mxu0 %vm7016_vm11, %v9671_v6 }
0x5393   :  { %v7053_v59 = vpop.f32.mrf.mxu0 }
0x5394   :  { %v7054_v61 = vadd.f32 %v9675_v7, %v7053_v59 }
0x5395   :  { %v8508_v62 = vpop.f32.mrf.mxu0 }
0x5396   :  { %7059 = vst.msk [vmem:[%s10538_s21] sm:$0xff] %vm353_vm0, %v7054_v61 }
0x5397   :  { %v7056_v26 = vpop.f32.mrf.mxu0 }
0x5399   :  { %v8509_v34 = vpop.f32.mrf.mxu0 }
0x539a PF:  { %7064 = vsyncpa [#allocation6], 1 }
0x539b   :  { %7065 = vsyncpa [#allocation8], 1 }
0x539c   :  { %7066 = vsyncpa [#allocation11], 1 }
0x539d   :  { %7067 = vsyncpa [#allocation14], 1 }
0x539e   :  { %7068 = vsyncpa [#allocation17], 1 }
0x539f   :  { %7069 = vsyncpa [#allocation20], 1 }
0x53a0   :  { %7070 = vsyncpa [#allocation23], 1 }
0x53a1   :  { %7071 = vsyncpa [#allocation26], 1 }

</bundles_post_ra>
